<compile_context>
chip_gen: v5e
topology: v5e:2x2
jax: 0.10.0
libtpu: 0.0.40
codegen_flags: <defaults>
</compile_context>

<pallas_src>
import functools

import numpy as np
import jax
import jax.numpy as jnp
from jax import lax
from jax.experimental import pallas as pl
from jax.experimental.pallas import tpu as pltpu

EPS = 1e-5          # nn.BatchNorm1d default eps
NEG_SLOPE = 0.01    # nn.LeakyReLU default negative_slope

# Main data matmuls: default precision (bf16 MXU passes -> fastest, esp. v5e;
# BN renormalizes right after).  Statistic / broadcast matmuls use 0/1 selector
# matrices -> run them at HIGHEST so batch statistics stay effectively exact.
_dot = functools.partial(jnp.dot, preferred_element_type=jnp.float32)
_dotx = functools.partial(jnp.dot, preferred_element_type=jnp.float32,
                          precision=lax.Precision.HIGHEST)


# ---------------------------------------------------------------------------
# Fused Pallas kernel (whole forward pass)
# ---------------------------------------------------------------------------
def _cnn_fused_kernel(x_ref, t1_ref, s1_ref, s1t_ref, p1_ref,
                      t2_ref, s2_ref, s2t_ref, p2_ref,
                      wf1_ref, pf1_ref, wf2_ref, pf2_ref, o_ref):
    n = x_ref.shape[0]

    def conv_bn_lrelu(a, t_ref, s_ref, st_ref, p_ref):
        """Toeplitz-matmul conv + per-channel BatchNorm1d (batch stats) + LeakyReLU.

        a:      (N, Cin*Lin) activation
        t_ref:  (Cin*Lin, C*L) Toeplitz-expanded conv weights
        s_ref:  (C*L, C) 0/1 channel selector, st_ref: (C, C*L) its transpose
        p_ref:  (3, C*L) = [bias, gamma, beta] expanded per output column
        """
        p = p_ref[...]
        y = _dot(a, t_ref[...]) + p[0:1, :]                   # (N, C*L)
        c = s_ref.shape[1]
        inv = 1.0 / float(n * (y.shape[1] // c))              # 1 / (N * L)
        # Per-channel batch stats: segmented lane reduction via selector matmul.
        s_y = _dotx(y, s_ref[...])                            # (N, C) sums over L
        s_y2 = _dotx(y * y, s_ref[...])                       # (N, C)
        m_c = jnp.sum(s_y, axis=0, keepdims=True) * inv       # (1, C) E[y]
        m2_c = jnp.sum(s_y2, axis=0, keepdims=True) * inv     # (1, C) E[y^2]
        v_c = jnp.maximum(m2_c - m_c * m_c, 0.0)              # one-pass var, clamped
        r_c = lax.rsqrt(v_c + EPS)
        # Broadcast channel stats back to columns (exact: selector is 0/1).
        mean = _dotx(jnp.broadcast_to(m_c, (n, c)), st_ref[...])   # (N, C*L)
        rstd = _dotx(jnp.broadcast_to(r_c, (n, c)), st_ref[...])   # (N, C*L)
        y = (y - mean) * rstd * p[1:2, :] + p[2:3, :]
        # TODO(synk): Dropout(0.5) after LeakyReLU is inference-mode identity; no RNG.
        return jnp.where(y > 0, y, NEG_SLOPE * y)

    a1 = conv_bn_lrelu(x_ref[...], t1_ref, s1_ref, s1t_ref, p1_ref)   # (N, C1*L1)
    a2 = conv_bn_lrelu(a1, t2_ref, s2_ref, s2t_ref, p2_ref)           # (N, C2*L2)
    # a2's column order (c2*L2 + t) is exactly torch's .view(N, -1) flattening.

    def fc_bn(a, w_ref, p_ref):
        p = p_ref[...]
        z = _dot(a, w_ref[...]) + p[0:1, :]
        m = jnp.mean(z, axis=0, keepdims=True)
        v = jnp.maximum(jnp.mean(z * z, axis=0, keepdims=True) - m * m, 0.0)
        return (z - m) * lax.rsqrt(v + EPS) * p[1:2, :] + p[2:3, :]

    h = fc_bn(a2, wf1_ref, pf1_ref)                  # fc1 + BN
    h = jnp.where(h > 0, h, NEG_SLOPE * h)           # LeakyReLU (Dropout = identity)
    o_ref[...] = fc_bn(h, wf2_ref, pf2_ref)          # fc2 + BN


# ---------------------------------------------------------------------------
# Wrapper: weight-only layout glue (Toeplitz conv matrices, BN selectors)
# ---------------------------------------------------------------------------
def _placement(l_in, l_out, k, stride):
    """P[l, t, j] = 1  iff  l == stride*t + j  (VALID conv im2col placement)."""
    P = np.zeros((l_in, l_out, k), np.float32)
    for t in range(l_out):
        for j in range(k):
            P[stride * t + j, t, j] = 1.0
    return P


def _selector(c, l):
    """S[c*l + t, c] = 1  (per-channel column selector for BN pooling)."""
    S = np.zeros((c * l, c), np.float32)
    for i in range(c):
        S[i * l:(i + 1) * l, i] = 1.0
    return S


def prepare_inputs(x, params, stride=(2, 2)):
    (w1, b1, g1, be1, w2, b2, g2, be2,
     wf1, bf1, gf1, bef1, wf2, bf2, gf2, bef2) = params
    _, _, l0 = x.shape
    c1, _, k1 = w1.shape
    c2, _, k2 = w2.shape
    st1, st2 = stride
    l1 = (l0 - k1) // st1 + 1
    l2 = (l1 - k2) // st2 + 1

    # Toeplitz-expanded conv weights.
    t1 = jnp.einsum('ltk,ck->lct', _placement(l0, l1, k1, st1),
                    w1[:, 0, :]).reshape(l0, c1 * l1)
    t2 = jnp.einsum('ltk,dck->cldt', _placement(l1, l2, k2, st2),
                    w2).reshape(c1 * l1, c2 * l2)

    # BN channel selectors (0/1 constants).
    sel1 = _selector(c1, l1)
    sel2 = _selector(c2, l2)

    # Packed per-stage affine params: [bias, gamma, beta] expanded per column.
    p1 = jnp.stack([jnp.repeat(b1, l1), jnp.repeat(g1, l1), jnp.repeat(be1, l1)])
    p2 = jnp.stack([jnp.repeat(b2, l2), jnp.repeat(g2, l2), jnp.repeat(be2, l2)])
    pf1 = jnp.stack([bf1, gf1, bef1])
    pf2 = jnp.stack([bf2, gf2, bef2])

    return (x[:, 0, :],
            t1, jnp.asarray(sel1), jnp.asarray(sel1.T), p1,
            t2, jnp.asarray(sel2), jnp.asarray(sel2.T), p2,
            wf1.T, pf1, wf2.T, pf2)


def cnn_forward(x, params):
    args = prepare_inputs(x, params)
    n = x.shape[0]
    num_labels = params[12].shape[0]        # wf2: (num_labels, num_hidden)
    vmem = pl.BlockSpec(memory_space=pltpu.MemorySpace.VMEM)
    out = pl.pallas_call(
        _cnn_fused_kernel,
        out_shape=jax.ShapeDtypeStruct((n, num_labels), jnp.float32),
        in_specs=[vmem] * len(args),
        out_specs=vmem,
    )(*args)
    return jnp.squeeze(out)                 # matches out.squeeze()


# ---------------------------------------------------------------------------
# Pure-JAX reference (for correctness check)
# ---------------------------------------------------------------------------
def reference_forward(x, params):
    (w1, b1, g1, be1, w2, b2, g2, be2,
     wf1, bf1, gf1, bef1, wf2, bf2, gf2, bef2) = params

    def conv_block(x, w, b, g, be, stride):
        y = lax.conv_general_dilated(x, w, (stride,), 'VALID',
                                     dimension_numbers=('NCH', 'OIH', 'NCH'))
        y = y + b[None, :, None]
        m = jnp.mean(y, axis=(0, 2), keepdims=True)
        v = jnp.mean((y - m) ** 2, axis=(0, 2), keepdims=True)
        y = (y - m) / jnp.sqrt(v + EPS) * g[None, :, None] + be[None, :, None]
        return jnp.where(y > 0, y, NEG_SLOPE * y)

    o1 = conv_block(x, w1, b1, g1, be1, 2)
    o2 = conv_block(o1, w2, b2, g2, be2, 2)
    flat = o2.reshape(x.shape[0], -1)

    h = flat @ wf1.T + bf1
    m = jnp.mean(h, axis=0); v = jnp.mean((h - m) ** 2, axis=0)
    h = (h - m) / jnp.sqrt(v + EPS) * gf1 + bef1
    h = jnp.where(h > 0, h, NEG_SLOPE * h)

    z = h @ wf2.T + bf2
    m = jnp.mean(z, axis=0); v = jnp.mean((z - m) ** 2, axis=0)
    z = (z - m) / jnp.sqrt(v + EPS) * gf2 + bef2
    return jnp.squeeze(z)


# ---------------------------------------------------------------------------
if __name__ == "__main__":
    # Module config: CNN(num_labels=4, nbeats=64) with defaults.
    num_labels = 4
    nbeats = 64
    batch = 8
    num_chann = [20, 10]
    ker = [10, 10]
    stride = [2, 2]
    num_hidden = 60
    L1 = (nbeats - ker[0]) // stride[0] + 1      # 28
    L2 = (L1 - ker[1]) // stride[1] + 1          # 10
    fc_in = num_chann[1] * L2                    # 100

    ks = jax.random.split(jax.random.PRNGKey(0), 17)

    def init_w(k, shape, fan_in):
        return jax.random.uniform(k, shape, jnp.float32, -1.0, 1.0) / np.sqrt(fan_in)

    w1 = init_w(ks[0], (num_chann[0], 1, ker[0]), 1 * ker[0])
    b1 = init_w(ks[1], (num_chann[0],), 1 * ker[0])
    g1 = 1.0 + 0.1 * jax.random.normal(ks[2], (num_chann[0],))
    be1 = 0.1 * jax.random.normal(ks[3], (num_chann[0],))

    w2 = init_w(ks[4], (num_chann[1], num_chann[0], ker[1]), num_chann[0] * ker[1])
    b2 = init_w(ks[5], (num_chann[1],), num_chann[0] * ker[1])
    g2 = 1.0 + 0.1 * jax.random.normal(ks[6], (num_chann[1],))
    be2 = 0.1 * jax.random.normal(ks[7], (num_chann[1],))

    wf1 = init_w(ks[8], (num_hidden, fc_in), fc_in)
    bf1 = init_w(ks[9], (num_hidden,), fc_in)
    gf1 = 1.0 + 0.1 * jax.random.normal(ks[10], (num_hidden,))
    bef1 = 0.1 * jax.random.normal(ks[11], (num_hidden,))

    wf2 = init_w(ks[12], (num_labels, num_hidden), num_hidden)
    bf2 = init_w(ks[13], (num_labels,), num_hidden)
    gf2 = 1.0 + 0.1 * jax.random.normal(ks[14], (num_labels,))
    bef2 = 0.1 * jax.random.normal(ks[15], (num_labels,))

    params = (w1, b1, g1, be1, w2, b2, g2, be2,
              wf1, bf1, gf1, bef1, wf2, bf2, gf2, bef2)

    x = jax.random.normal(ks[16], (batch, 1, nbeats), jnp.float32)

    fwd = jax.jit(cnn_forward)
    ref_fwd = jax.jit(reference_forward)

    out = jax.block_until_ready(fwd(x, params))
    ref = jax.block_until_ready(ref_fwd(x, params))

    assert out.shape == (batch, num_labels), out.shape
    np.testing.assert_allclose(np.asarray(out), np.asarray(ref), rtol=2e-2, atol=2e-2)
    print("KERNEL_OK")
</pallas_src>

<mosaic_0001>
module attributes {stable_mosaic.version = 11 : i64} {
  func.func @_cnn_fused_kernel(%arg0: memref<8x64xf32, #tpu.memory_space<vmem>>, %arg1: memref<64x560xf32, #tpu.memory_space<vmem>>, %arg2: memref<560x20xf32, #tpu.memory_space<vmem>>, %arg3: memref<20x560xf32, #tpu.memory_space<vmem>>, %arg4: memref<3x560xf32, #tpu.memory_space<vmem>>, %arg5: memref<560x100xf32, #tpu.memory_space<vmem>>, %arg6: memref<100x10xf32, #tpu.memory_space<vmem>>, %arg7: memref<10x100xf32, #tpu.memory_space<vmem>>, %arg8: memref<3x100xf32, #tpu.memory_space<vmem>>, %arg9: memref<100x60xf32, #tpu.memory_space<vmem>>, %arg10: memref<3x60xf32, #tpu.memory_space<vmem>>, %arg11: memref<60x4xf32, #tpu.memory_space<vmem>>, %arg12: memref<3x4xf32, #tpu.memory_space<vmem>>, %arg13: memref<8x4xf32, #tpu.memory_space<vmem>>) attributes {dimension_semantics = [], scalar_prefetch = 0 : i64, scratch_operands = 0 : i64, tpu.core_type = #tpu.core_type<tc>} {
    %c0 = arith.constant 0 : index
    %c0_0 = arith.constant 0 : index
    %0 = vector.load %arg0[%c0, %c0_0] : memref<8x64xf32, #tpu.memory_space<vmem>>, vector<8x64xf32>
    %c0_1 = arith.constant 0 : index
    %c0_2 = arith.constant 0 : index
    %1 = vector.load %arg4[%c0_1, %c0_2] : memref<3x560xf32, #tpu.memory_space<vmem>>, vector<3x560xf32>
    %c0_3 = arith.constant 0 : index
    %c0_4 = arith.constant 0 : index
    %2 = vector.load %arg1[%c0_3, %c0_4] : memref<64x560xf32, #tpu.memory_space<vmem>>, vector<64x560xf32>
    %cst = arith.constant dense<0.000000e+00> : vector<8x560xf32>
    %3 = tpu.matmul %0, %2, %cst {dimension_numbers = #tpu.dot_dimension_numbers<[1], [0], [0], [1], [0, 0, 1, 1], [], []>} : vector<8x64xf32>, vector<64x560xf32>, vector<8x560xf32> -> vector<8x560xf32>
    %4 = vector.extract_strided_slice %1 {offsets = [0, 0], sizes = [1, 560], strides = [1, 1]} : vector<3x560xf32> to vector<1x560xf32>
    %5 = vector.broadcast %4 : vector<1x560xf32> to vector<8x560xf32>
    %6 = arith.addf %3, %5 : vector<8x560xf32>
    %c0_5 = arith.constant 0 : index
    %c0_6 = arith.constant 0 : index
    %7 = vector.load %arg2[%c0_5, %c0_6] : memref<560x20xf32, #tpu.memory_space<vmem>>, vector<560x20xf32>
    %cst_7 = arith.constant dense<0.000000e+00> : vector<8x20xf32>
    %8 = tpu.matmul %6, %7, %cst_7 {dimension_numbers = #tpu.dot_dimension_numbers<[1], [0], [0], [1], [0, 0, 1, 1], [], []>, precision = #tpu.contract_precision<fp32>} : vector<8x560xf32>, vector<560x20xf32>, vector<8x20xf32> -> vector<8x20xf32>
    %9 = arith.mulf %6, %6 : vector<8x560xf32>
    %c0_8 = arith.constant 0 : index
    %c0_9 = arith.constant 0 : index
    %10 = vector.load %arg2[%c0_8, %c0_9] : memref<560x20xf32, #tpu.memory_space<vmem>>, vector<560x20xf32>
    %cst_10 = arith.constant dense<0.000000e+00> : vector<8x20xf32>
    %11 = tpu.matmul %9, %10, %cst_10 {dimension_numbers = #tpu.dot_dimension_numbers<[1], [0], [0], [1], [0, 0, 1, 1], [], []>, precision = #tpu.contract_precision<fp32>} : vector<8x560xf32>, vector<560x20xf32>, vector<8x20xf32> -> vector<8x20xf32>
    %cst_11 = arith.constant dense<0.000000e+00> : vector<20xf32>
    %12 = vector.multi_reduction <add>, %8, %cst_11 [0] : vector<8x20xf32> to vector<20xf32>
    %13 = vector.shape_cast %12 : vector<20xf32> to vector<1x20xf32>
    %cst_12 = arith.constant 0.00446428591 : f32
    %14 = vector.broadcast %cst_12 : f32 to vector<1x20xf32>
    %15 = arith.mulf %13, %14 : vector<1x20xf32>
    %cst_13 = arith.constant dense<0.000000e+00> : vector<20xf32>
    %16 = vector.multi_reduction <add>, %11, %cst_13 [0] : vector<8x20xf32> to vector<20xf32>
    %17 = vector.shape_cast %16 : vector<20xf32> to vector<1x20xf32>
    %cst_14 = arith.constant 0.00446428591 : f32
    %18 = vector.broadcast %cst_14 : f32 to vector<1x20xf32>
    %19 = arith.mulf %17, %18 : vector<1x20xf32>
    %20 = arith.mulf %15, %15 : vector<1x20xf32>
    %21 = arith.subf %19, %20 : vector<1x20xf32>
    %cst_15 = arith.constant 0.000000e+00 : f32
    %22 = vector.broadcast %cst_15 : f32 to vector<1x20xf32>
    %23 = arith.maximumf %21, %22 : vector<1x20xf32>
    %cst_16 = arith.constant 9.99999974E-6 : f32
    %24 = vector.broadcast %cst_16 : f32 to vector<1x20xf32>
    %25 = arith.addf %23, %24 : vector<1x20xf32>
    %26 = math.rsqrt %25 : vector<1x20xf32>
    %27 = vector.shape_cast %15 : vector<1x20xf32> to vector<1x20xf32>
    %28 = vector.broadcast %27 : vector<1x20xf32> to vector<8x20xf32>
    %c0_17 = arith.constant 0 : index
    %c0_18 = arith.constant 0 : index
    %29 = vector.load %arg3[%c0_17, %c0_18] : memref<20x560xf32, #tpu.memory_space<vmem>>, vector<20x560xf32>
    %cst_19 = arith.constant dense<0.000000e+00> : vector<8x560xf32>
    %30 = tpu.matmul %28, %29, %cst_19 {dimension_numbers = #tpu.dot_dimension_numbers<[1], [0], [0], [1], [0, 0, 1, 1], [], []>, precision = #tpu.contract_precision<fp32>} : vector<8x20xf32>, vector<20x560xf32>, vector<8x560xf32> -> vector<8x560xf32>
    %31 = vector.shape_cast %26 : vector<1x20xf32> to vector<1x20xf32>
    %32 = vector.broadcast %31 : vector<1x20xf32> to vector<8x20xf32>
    %c0_20 = arith.constant 0 : index
    %c0_21 = arith.constant 0 : index
    %33 = vector.load %arg3[%c0_20, %c0_21] : memref<20x560xf32, #tpu.memory_space<vmem>>, vector<20x560xf32>
    %cst_22 = arith.constant dense<0.000000e+00> : vector<8x560xf32>
    %34 = tpu.matmul %32, %33, %cst_22 {dimension_numbers = #tpu.dot_dimension_numbers<[1], [0], [0], [1], [0, 0, 1, 1], [], []>, precision = #tpu.contract_precision<fp32>} : vector<8x20xf32>, vector<20x560xf32>, vector<8x560xf32> -> vector<8x560xf32>
    %35 = arith.subf %6, %30 : vector<8x560xf32>
    %36 = arith.mulf %35, %34 : vector<8x560xf32>
    %37 = vector.extract_strided_slice %1 {offsets = [1, 0], sizes = [1, 560], strides = [1, 1]} : vector<3x560xf32> to vector<1x560xf32>
    %38 = vector.broadcast %37 : vector<1x560xf32> to vector<8x560xf32>
    %39 = arith.mulf %36, %38 : vector<8x560xf32>
    %40 = vector.extract_strided_slice %1 {offsets = [2, 0], sizes = [1, 560], strides = [1, 1]} : vector<3x560xf32> to vector<1x560xf32>
    %41 = vector.broadcast %40 : vector<1x560xf32> to vector<8x560xf32>
    %42 = arith.addf %39, %41 : vector<8x560xf32>
    %cst_23 = arith.constant 0.000000e+00 : f32
    %43 = vector.broadcast %cst_23 : f32 to vector<8x560xf32>
    %44 = arith.cmpf ogt, %42, %43 : vector<8x560xf32>
    %cst_24 = arith.constant 0.00999999977 : f32
    %45 = vector.broadcast %cst_24 : f32 to vector<8x560xf32>
    %46 = arith.mulf %45, %42 : vector<8x560xf32>
    %47 = arith.select %44, %42, %46 : vector<8x560xi1>, vector<8x560xf32>
    %c0_25 = arith.constant 0 : index
    %c0_26 = arith.constant 0 : index
    %48 = vector.load %arg8[%c0_25, %c0_26] : memref<3x100xf32, #tpu.memory_space<vmem>>, vector<3x100xf32>
    %c0_27 = arith.constant 0 : index
    %c0_28 = arith.constant 0 : index
    %49 = vector.load %arg5[%c0_27, %c0_28] : memref<560x100xf32, #tpu.memory_space<vmem>>, vector<560x100xf32>
    %cst_29 = arith.constant dense<0.000000e+00> : vector<8x100xf32>
    %50 = tpu.matmul %47, %49, %cst_29 {dimension_numbers = #tpu.dot_dimension_numbers<[1], [0], [0], [1], [0, 0, 1, 1], [], []>} : vector<8x560xf32>, vector<560x100xf32>, vector<8x100xf32> -> vector<8x100xf32>
    %51 = vector.extract_strided_slice %48 {offsets = [0, 0], sizes = [1, 100], strides = [1, 1]} : vector<3x100xf32> to vector<1x100xf32>
    %52 = vector.broadcast %51 : vector<1x100xf32> to vector<8x100xf32>
    %53 = arith.addf %50, %52 : vector<8x100xf32>
    %c0_30 = arith.constant 0 : index
    %c0_31 = arith.constant 0 : index
    %54 = vector.load %arg6[%c0_30, %c0_31] : memref<100x10xf32, #tpu.memory_space<vmem>>, vector<100x10xf32>
    %cst_32 = arith.constant dense<0.000000e+00> : vector<8x10xf32>
    %55 = tpu.matmul %53, %54, %cst_32 {dimension_numbers = #tpu.dot_dimension_numbers<[1], [0], [0], [1], [0, 0, 1, 1], [], []>, precision = #tpu.contract_precision<fp32>} : vector<8x100xf32>, vector<100x10xf32>, vector<8x10xf32> -> vector<8x10xf32>
    %56 = arith.mulf %53, %53 : vector<8x100xf32>
    %c0_33 = arith.constant 0 : index
    %c0_34 = arith.constant 0 : index
    %57 = vector.load %arg6[%c0_33, %c0_34] : memref<100x10xf32, #tpu.memory_space<vmem>>, vector<100x10xf32>
    %cst_35 = arith.constant dense<0.000000e+00> : vector<8x10xf32>
    %58 = tpu.matmul %56, %57, %cst_35 {dimension_numbers = #tpu.dot_dimension_numbers<[1], [0], [0], [1], [0, 0, 1, 1], [], []>, precision = #tpu.contract_precision<fp32>} : vector<8x100xf32>, vector<100x10xf32>, vector<8x10xf32> -> vector<8x10xf32>
    %cst_36 = arith.constant dense<0.000000e+00> : vector<10xf32>
    %59 = vector.multi_reduction <add>, %55, %cst_36 [0] : vector<8x10xf32> to vector<10xf32>
    %60 = vector.shape_cast %59 : vector<10xf32> to vector<1x10xf32>
    %cst_37 = arith.constant 1.250000e-02 : f32
    %61 = vector.broadcast %cst_37 : f32 to vector<1x10xf32>
    %62 = arith.mulf %60, %61 : vector<1x10xf32>
    %cst_38 = arith.constant dense<0.000000e+00> : vector<10xf32>
    %63 = vector.multi_reduction <add>, %58, %cst_38 [0] : vector<8x10xf32> to vector<10xf32>
    %64 = vector.shape_cast %63 : vector<10xf32> to vector<1x10xf32>
    %cst_39 = arith.constant 1.250000e-02 : f32
    %65 = vector.broadcast %cst_39 : f32 to vector<1x10xf32>
    %66 = arith.mulf %64, %65 : vector<1x10xf32>
    %67 = arith.mulf %62, %62 : vector<1x10xf32>
    %68 = arith.subf %66, %67 : vector<1x10xf32>
    %cst_40 = arith.constant 0.000000e+00 : f32
    %69 = vector.broadcast %cst_40 : f32 to vector<1x10xf32>
    %70 = arith.maximumf %68, %69 : vector<1x10xf32>
    %cst_41 = arith.constant 9.99999974E-6 : f32
    %71 = vector.broadcast %cst_41 : f32 to vector<1x10xf32>
    %72 = arith.addf %70, %71 : vector<1x10xf32>
    %73 = math.rsqrt %72 : vector<1x10xf32>
    %74 = vector.shape_cast %62 : vector<1x10xf32> to vector<1x10xf32>
    %75 = vector.broadcast %74 : vector<1x10xf32> to vector<8x10xf32>
    %c0_42 = arith.constant 0 : index
    %c0_43 = arith.constant 0 : index
    %76 = vector.load %arg7[%c0_42, %c0_43] : memref<10x100xf32, #tpu.memory_space<vmem>>, vector<10x100xf32>
    %cst_44 = arith.constant dense<0.000000e+00> : vector<8x100xf32>
    %77 = tpu.matmul %75, %76, %cst_44 {dimension_numbers = #tpu.dot_dimension_numbers<[1], [0], [0], [1], [0, 0, 1, 1], [], []>, precision = #tpu.contract_precision<fp32>} : vector<8x10xf32>, vector<10x100xf32>, vector<8x100xf32> -> vector<8x100xf32>
    %78 = vector.shape_cast %73 : vector<1x10xf32> to vector<1x10xf32>
    %79 = vector.broadcast %78 : vector<1x10xf32> to vector<8x10xf32>
    %c0_45 = arith.constant 0 : index
    %c0_46 = arith.constant 0 : index
    %80 = vector.load %arg7[%c0_45, %c0_46] : memref<10x100xf32, #tpu.memory_space<vmem>>, vector<10x100xf32>
    %cst_47 = arith.constant dense<0.000000e+00> : vector<8x100xf32>
    %81 = tpu.matmul %79, %80, %cst_47 {dimension_numbers = #tpu.dot_dimension_numbers<[1], [0], [0], [1], [0, 0, 1, 1], [], []>, precision = #tpu.contract_precision<fp32>} : vector<8x10xf32>, vector<10x100xf32>, vector<8x100xf32> -> vector<8x100xf32>
    %82 = arith.subf %53, %77 : vector<8x100xf32>
    %83 = arith.mulf %82, %81 : vector<8x100xf32>
    %84 = vector.extract_strided_slice %48 {offsets = [1, 0], sizes = [1, 100], strides = [1, 1]} : vector<3x100xf32> to vector<1x100xf32>
    %85 = vector.broadcast %84 : vector<1x100xf32> to vector<8x100xf32>
    %86 = arith.mulf %83, %85 : vector<8x100xf32>
    %87 = vector.extract_strided_slice %48 {offsets = [2, 0], sizes = [1, 100], strides = [1, 1]} : vector<3x100xf32> to vector<1x100xf32>
    %88 = vector.broadcast %87 : vector<1x100xf32> to vector<8x100xf32>
    %89 = arith.addf %86, %88 : vector<8x100xf32>
    %cst_48 = arith.constant 0.000000e+00 : f32
    %90 = vector.broadcast %cst_48 : f32 to vector<8x100xf32>
    %91 = arith.cmpf ogt, %89, %90 : vector<8x100xf32>
    %cst_49 = arith.constant 0.00999999977 : f32
    %92 = vector.broadcast %cst_49 : f32 to vector<8x100xf32>
    %93 = arith.mulf %92, %89 : vector<8x100xf32>
    %94 = arith.select %91, %89, %93 : vector<8x100xi1>, vector<8x100xf32>
    %c0_50 = arith.constant 0 : index
    %c0_51 = arith.constant 0 : index
    %95 = vector.load %arg10[%c0_50, %c0_51] : memref<3x60xf32, #tpu.memory_space<vmem>>, vector<3x60xf32>
    %c0_52 = arith.constant 0 : index
    %c0_53 = arith.constant 0 : index
    %96 = vector.load %arg9[%c0_52, %c0_53] : memref<100x60xf32, #tpu.memory_space<vmem>>, vector<100x60xf32>
    %cst_54 = arith.constant dense<0.000000e+00> : vector<8x60xf32>
    %97 = tpu.matmul %94, %96, %cst_54 {dimension_numbers = #tpu.dot_dimension_numbers<[1], [0], [0], [1], [0, 0, 1, 1], [], []>} : vector<8x100xf32>, vector<100x60xf32>, vector<8x60xf32> -> vector<8x60xf32>
    %98 = vector.extract_strided_slice %95 {offsets = [0, 0], sizes = [1, 60], strides = [1, 1]} : vector<3x60xf32> to vector<1x60xf32>
    %99 = vector.broadcast %98 : vector<1x60xf32> to vector<8x60xf32>
    %100 = arith.addf %97, %99 : vector<8x60xf32>
    %cst_55 = arith.constant dense<0.000000e+00> : vector<60xf32>
    %101 = vector.multi_reduction <add>, %100, %cst_55 [0] : vector<8x60xf32> to vector<60xf32>
    %102 = vector.shape_cast %101 : vector<60xf32> to vector<1x60xf32>
    %cst_56 = arith.constant 8.000000e+00 : f32
    %103 = vector.broadcast %cst_56 : f32 to vector<1x60xf32>
    %104 = arith.divf %102, %103 : vector<1x60xf32>
    %105 = arith.mulf %100, %100 : vector<8x60xf32>
    %cst_57 = arith.constant dense<0.000000e+00> : vector<60xf32>
    %106 = vector.multi_reduction <add>, %105, %cst_57 [0] : vector<8x60xf32> to vector<60xf32>
    %107 = vector.shape_cast %106 : vector<60xf32> to vector<1x60xf32>
    %cst_58 = arith.constant 8.000000e+00 : f32
    %108 = vector.broadcast %cst_58 : f32 to vector<1x60xf32>
    %109 = arith.divf %107, %108 : vector<1x60xf32>
    %110 = arith.mulf %104, %104 : vector<1x60xf32>
    %111 = arith.subf %109, %110 : vector<1x60xf32>
    %cst_59 = arith.constant 0.000000e+00 : f32
    %112 = vector.broadcast %cst_59 : f32 to vector<1x60xf32>
    %113 = arith.maximumf %111, %112 : vector<1x60xf32>
    %114 = vector.broadcast %104 : vector<1x60xf32> to vector<8x60xf32>
    %115 = arith.subf %100, %114 : vector<8x60xf32>
    %cst_60 = arith.constant 9.99999974E-6 : f32
    %116 = vector.broadcast %cst_60 : f32 to vector<1x60xf32>
    %117 = arith.addf %113, %116 : vector<1x60xf32>
    %118 = math.rsqrt %117 : vector<1x60xf32>
    %119 = vector.broadcast %118 : vector<1x60xf32> to vector<8x60xf32>
    %120 = arith.mulf %115, %119 : vector<8x60xf32>
    %121 = vector.extract_strided_slice %95 {offsets = [1, 0], sizes = [1, 60], strides = [1, 1]} : vector<3x60xf32> to vector<1x60xf32>
    %122 = vector.broadcast %121 : vector<1x60xf32> to vector<8x60xf32>
    %123 = arith.mulf %120, %122 : vector<8x60xf32>
    %124 = vector.extract_strided_slice %95 {offsets = [2, 0], sizes = [1, 60], strides = [1, 1]} : vector<3x60xf32> to vector<1x60xf32>
    %125 = vector.broadcast %124 : vector<1x60xf32> to vector<8x60xf32>
    %126 = arith.addf %123, %125 : vector<8x60xf32>
    %cst_61 = arith.constant 0.000000e+00 : f32
    %127 = vector.broadcast %cst_61 : f32 to vector<8x60xf32>
    %128 = arith.cmpf ogt, %126, %127 : vector<8x60xf32>
    %cst_62 = arith.constant 0.00999999977 : f32
    %129 = vector.broadcast %cst_62 : f32 to vector<8x60xf32>
    %130 = arith.mulf %129, %126 : vector<8x60xf32>
    %131 = arith.select %128, %126, %130 : vector<8x60xi1>, vector<8x60xf32>
    %c0_63 = arith.constant 0 : index
    %c0_64 = arith.constant 0 : index
    %132 = vector.load %arg12[%c0_63, %c0_64] : memref<3x4xf32, #tpu.memory_space<vmem>>, vector<3x4xf32>
    %c0_65 = arith.constant 0 : index
    %c0_66 = arith.constant 0 : index
    %133 = vector.load %arg11[%c0_65, %c0_66] : memref<60x4xf32, #tpu.memory_space<vmem>>, vector<60x4xf32>
    %cst_67 = arith.constant dense<0.000000e+00> : vector<8x4xf32>
    %134 = tpu.matmul %131, %133, %cst_67 {dimension_numbers = #tpu.dot_dimension_numbers<[1], [0], [0], [1], [0, 0, 1, 1], [], []>} : vector<8x60xf32>, vector<60x4xf32>, vector<8x4xf32> -> vector<8x4xf32>
    %135 = vector.extract_strided_slice %132 {offsets = [0, 0], sizes = [1, 4], strides = [1, 1]} : vector<3x4xf32> to vector<1x4xf32>
    %136 = vector.broadcast %135 : vector<1x4xf32> to vector<8x4xf32>
    %137 = arith.addf %134, %136 : vector<8x4xf32>
    %cst_68 = arith.constant dense<0.000000e+00> : vector<4xf32>
    %138 = vector.multi_reduction <add>, %137, %cst_68 [0] : vector<8x4xf32> to vector<4xf32>
    %139 = vector.shape_cast %138 : vector<4xf32> to vector<1x4xf32>
    %cst_69 = arith.constant 8.000000e+00 : f32
    %140 = vector.broadcast %cst_69 : f32 to vector<1x4xf32>
    %141 = arith.divf %139, %140 : vector<1x4xf32>
    %142 = arith.mulf %137, %137 : vector<8x4xf32>
    %cst_70 = arith.constant dense<0.000000e+00> : vector<4xf32>
    %143 = vector.multi_reduction <add>, %142, %cst_70 [0] : vector<8x4xf32> to vector<4xf32>
    %144 = vector.shape_cast %143 : vector<4xf32> to vector<1x4xf32>
    %cst_71 = arith.constant 8.000000e+00 : f32
    %145 = vector.broadcast %cst_71 : f32 to vector<1x4xf32>
    %146 = arith.divf %144, %145 : vector<1x4xf32>
    %147 = arith.mulf %141, %141 : vector<1x4xf32>
    %148 = arith.subf %146, %147 : vector<1x4xf32>
    %cst_72 = arith.constant 0.000000e+00 : f32
    %149 = vector.broadcast %cst_72 : f32 to vector<1x4xf32>
    %150 = arith.maximumf %148, %149 : vector<1x4xf32>
    %151 = vector.broadcast %141 : vector<1x4xf32> to vector<8x4xf32>
    %152 = arith.subf %137, %151 : vector<8x4xf32>
    %cst_73 = arith.constant 9.99999974E-6 : f32
    %153 = vector.broadcast %cst_73 : f32 to vector<1x4xf32>
    %154 = arith.addf %150, %153 : vector<1x4xf32>
    %155 = math.rsqrt %154 : vector<1x4xf32>
    %156 = vector.broadcast %155 : vector<1x4xf32> to vector<8x4xf32>
    %157 = arith.mulf %152, %156 : vector<8x4xf32>
    %158 = vector.extract_strided_slice %132 {offsets = [1, 0], sizes = [1, 4], strides = [1, 1]} : vector<3x4xf32> to vector<1x4xf32>
    %159 = vector.broadcast %158 : vector<1x4xf32> to vector<8x4xf32>
    %160 = arith.mulf %157, %159 : vector<8x4xf32>
    %161 = vector.extract_strided_slice %132 {offsets = [2, 0], sizes = [1, 4], strides = [1, 1]} : vector<3x4xf32> to vector<1x4xf32>
    %162 = vector.broadcast %161 : vector<1x4xf32> to vector<8x4xf32>
    %163 = arith.addf %160, %162 : vector<8x4xf32>
    %c0_74 = arith.constant 0 : index
    %c0_75 = arith.constant 0 : index
    %164 = vector.load %arg13[%c0_74, %c0_75] : memref<8x4xf32, #tpu.memory_space<vmem>>, vector<8x4xf32>
    tpu.vector_store %arg13[%c0_74, %c0_75], %163 {strides = array<i32>} : memref<8x4xf32, #tpu.memory_space<vmem>>, vector<8x4xf32>,
    return
  }
}

</mosaic_0001>

<bundles_post_ra>
// kernel: cnn_forward.1
= control target key start
LH: loop header
LB: loop body
LE: loop exit
PB: predicated region body
PF: predicated region fallthrough
CT: control target
= control target key end

     0   :  { %vm106_vm0 = vcmask 523264   ;;  %vm280_vm1 = vcmask 392192   ;;  %vm3442_vm2 = vcmask 162816   ;;  %vm3491_vm3 = vcmask 1043456   ;;  %s10232_s1 = inlined_call_operand.vmem [shape: f32[64,560], index: 1, kind: input, shape index: {}]   ;;  %s10233_s0 = inlined_call_operand.vmem [shape: f32[8,64], index: 0, kind: input, shape index: {}]   ;;  %s10234_s2 = inlined_call_operand.vmem [shape: f32[560,20], index: 2, kind: input, shape index: {}]   ;;  %s10235_s4 = inlined_call_operand.vmem [shape: f32[3,560], index: 4, kind: input, shape index: {}]   ;;  %s10236_s3 = inlined_call_operand.vmem [shape: f32[20,560], index: 3, kind: input, shape index: {}]   ;;  %s10237_s5 = inlined_call_operand.vmem [shape: f32[560,100], index: 5, kind: input, shape index: {}]   ;;  %s10238_s6 = inlined_call_operand.vmem [shape: f32[100,10], index: 6, kind: input, shape index: {}]   ;;  %s10239_s8 = inlined_call_operand.vmem [shape: f32[3,100], index: 8, kind: input, shape index: {}]   ;;  %s10240_s7 = inlined_call_operand.vmem [shape: f32[10,100], index: 7, kind: input, shape index: {}]   ;;  %s10241_s9 = inlined_call_operand.vmem [shape: f32[100,60], index: 9, kind: input, shape index: {}]   ;;  %s10242_s10 = inlined_call_operand.vmem [shape: f32[3,60], index: 10, kind: input, shape index: {}]   ;;  %s10243_s11 = inlined_call_operand.vmem [shape: f32[60,4], index: 11, kind: input, shape index: {}]   ;;  %s10244_s12 = inlined_call_operand.vmem [shape: f32[3,4], index: 12, kind: input, shape index: {}]   ;;  %s10245_s13 = inlined_call_operand.vmem [shape: f32[8,4], index: 13, kind: output, shape index: {}]  }
   0x1   :  { %v83_v0 = vld [vmem:[%s10232_s1 + $0x118] sm:$0xff]  ;;  %v78_v1 = vld [vmem:[%s10232_s1 + $0xf0] sm:$0xff]  ;;  %v84_v2 = vld [vmem:[%s10232_s1 + $0x120] sm:$0xff]  ;;  %vm5483_vm12 = vcmask 818176   ;;  %vm6134_vm13 = vcmask 1041408   ;;  %vm6098_vm14 = vcmask 80896  }
   0x2   :  { %118 = vmatpush.msra.mxu0 %v83_v0  ;;  %v73_v3 = vld [vmem:[%s10232_s1 + $0xc8] sm:$0xff]  ;;  %138 = vmatpush.msra.mxu1 %v84_v2  ;;  %v79_v4 = vld [vmem:[%s10232_s1 + $0xf8] sm:$0xff]  ;;  %v74_v5 = vld [vmem:[%s10232_s1 + $0xd0] sm:$0xff] }
   0x3   :  { %v68_v6 = vld [vmem:[%s10232_s1 + $0xa0] sm:$0xff]  ;;  %v69_v7 = vld [vmem:[%s10232_s1 + $0xa8] sm:$0xff]  ;;  %v63_v9 = vld [vmem:[%s10232_s1 + $0x78] sm:$0xff] }
   0x4   :  { %119 = vmatpush.msra.mxu0 %v78_v1  ;;  %139 = vmatpush.msra.mxu1 %v79_v4  ;;  %v85_v8 = vld [vmem:[%s10232_s1 + $0x128] sm:$0xff]  ;;  %v80_v10 = vld [vmem:[%s10232_s1 + $0x100] sm:$0xff]  ;;  %v75_v12 = vld [vmem:[%s10232_s1 + $0xd8] sm:$0xff] }
   0x5   :  { %158 = vmatpush.msra.mxu2 %v85_v8  ;;  %v64_v11 = vld [vmem:[%s10232_s1 + $0x80] sm:$0xff]  ;;  %v58_v13 = vld [vmem:[%s10232_s1 + $0x50] sm:$0xff]  ;;  %v81_v15 = vld [vmem:[%s10232_s1 + $0x108] sm:$0xff] }
   0x6   :  { %120 = vmatpush.msra.mxu0 %v73_v3  ;;  %140 = vmatpush.msra.mxu1 %v74_v5  ;;  %v86_v14 = vld [vmem:[%s10232_s1 + $0x130] sm:$0xff]  ;;  %v59_v16 = vld [vmem:[%s10232_s1 + $0x58] sm:$0xff]  ;;  %v53_v18 = vld [vmem:[%s10232_s1 + $0x28] sm:$0xff] }
   0x7   :  { %159 = vmatpush.msra.mxu2 %v80_v10  ;;  %v70_v17 = vld [vmem:[%s10232_s1 + $0xb0] sm:$0xff]  ;;  %178 = vmatpush.msra.mxu3 %v86_v14  ;;  %v48_v19 = vld [vmem:[%s10232_s1] sm:$0xff]  ;;  %v65_v23 = vld [vmem:[%s10232_s1 + $0x88] sm:$0xff] }
   0x8   :  { %121 = vmatpush.msra.mxu0 %v68_v6  ;;  %141 = vmatpush.msra.mxu1 %v69_v7  ;;  %v76_v20 = vld [vmem:[%s10232_s1 + $0xe0] sm:$0xff]  ;;  %v54_v22 = vld [vmem:[%s10232_s1 + $0x30] sm:$0xff]  ;;  %v49_v24 = vld [vmem:[%s10232_s1 + $0x8] sm:$0xff] }
   0x9   :  { %160 = vmatpush.msra.mxu2 %v75_v12  ;;  %v6797_v21 = vld [vmem:[%s10233_s0] sm:$0xff]  ;;  %179 = vmatpush.msra.mxu3 %v81_v15  ;;  %v71_v25 = vld [vmem:[%s10232_s1 + $0xb8] sm:$0xff]  ;;  %v224_v30 = vld [vmem:[%s10234_s2 + $0x70] sm:$0xff] }
   0xa   :  { %122 = vmatpush.msra.mxu0 %v63_v9  ;;  %142 = vmatpush.msra.mxu1 %v64_v11  ;;  %v225_v26 = vld [vmem:[%s10234_s2 + $0x78] sm:$0xff]  ;;  %v60_v27 = vld [vmem:[%s10232_s1 + $0x60] sm:$0xff]  ;;  %v66_v31 = vld [vmem:[%s10232_s1 + $0x90] sm:$0xff]  ;;  %v6828_v32 = vand.u32 4294901760, %v224_v30 }
   0xb   :  { %161 = vmatpush.msra.mxu2 %v70_v17  ;;  %v87_v28 = vld [vmem:[%s10232_s1 + $0x138] sm:$0xff]  ;;  %180 = vmatpush.msra.mxu3 %v76_v20  ;;  %v6820_v29 = vand.u32 4294901760, %v225_v26  ;;  %v223_v33 = vld [vmem:[%s10234_s2 + $0x68] sm:$0xff]  ;;  %v222_v34 = vld [vmem:[%s10234_s2 + $0x60] sm:$0xff] }
   0xc   :  { %123 = vmatpush.msra.mxu0 %v58_v13  ;;  %143 = vmatpush.msra.mxu1 %v59_v16  ;;  %10579 = vst [vmem:[#allocation3_spill] sm:$0xff] %v6828_v32  ;;  %v6839_v36 = vand.u32 4294901760, %v223_v33  ;;  %v6841_v37 = vand.u32 4294901760, %v222_v34  ;;  %v221_v38 = vld [vmem:[%s10234_s2 + $0x58] sm:$0xff]  ;;  %v220_v39 = vld [vmem:[%s10234_s2 + $0x50] sm:$0xff]  ;;  %v219_v40 = vld [vmem:[%s10234_s2 + $0x48] sm:$0xff]  ;;  %v6858_v42 = vsub.f32 %v224_v30, %v6828_v32 }
   0xd   :  { %10578 = vst [vmem:[#allocation2_spill] sm:$0xff] %v6820_v29  ;;  %162 = vmatpush.msra.mxu2 %v65_v23  ;;  %181 = vmatpush.msra.mxu3 %v71_v25  ;;  %v6837_v35 = vsub.f32 %v225_v26, %v6820_v29  ;;  %v55_v41 = vld [vmem:[%s10232_s1 + $0x38] sm:$0xff]  ;;  %v6860_v43 = vand.u32 4294901760, %v221_v38  ;;  %v6862_v44 = vand.u32 4294901760, %v220_v39  ;;  %v6864_v45 = vand.u32 4294901760, %v219_v40  ;;  %v218_v46 = vld [vmem:[%s10234_s2 + $0x40] sm:$0xff] }
   0xe   :  { %124 = vmatpush.msra.mxu0 %v53_v18  ;;  %144 = vmatpush.msra.mxu1 %v54_v22  ;;  %10581 = vst [vmem:[#allocation5_spill] sm:$0xff] %v6839_v36  ;;  %v82_v47 = vld [vmem:[%s10232_s1 + $0x110] sm:$0xff]  ;;  %v61_v48 = vld [vmem:[%s10232_s1 + $0x68] sm:$0xff]  ;;  %v6881_v50 = vsub.f32 %v223_v33, %v6839_v36  ;;  %v6884_v51 = vsub.f32 %v222_v34, %v6841_v37  ;;  %v6886_v52 = vand.u32 4294901760, %v218_v46  ;;  %v6892_v54 = vand.u32 4294901760, %v6858_v42  ;;  %v56_v62 = vld [vmem:[%s10232_s1 + $0x40] sm:$0xff] }
   0xf   :  { %10580 = vst [vmem:[#allocation4_spill] sm:$0xff] %v6837_v35  ;;  %163 = vmatpush.msra.mxu2 %v60_v27  ;;  %v6878_v49 = vand.u32 4294901760, %v6837_v35  ;;  %v50_v53 = vld [vmem:[%s10232_s1 + $0x10] sm:$0xff]  ;;  %182 = vmatpush.msra.mxu3 %v66_v31  ;;  %v6895_v55 = vsub.f32 %v221_v38, %v6860_v43  ;;  %v6898_v56 = vsub.f32 %v220_v39, %v6862_v44  ;;  %v77_v58 = vld [vmem:[%s10232_s1 + $0xe8] sm:$0xff]  ;;  %v217_v3 = vld [vmem:[%s10234_s2 + $0x38] sm:$0xff] }
  0x10   :  { %125 = vmatpush.msra.mxu0 %v48_v19  ;;  %10582 = vst [vmem:[#allocation6_spill] sm:$0xff] %v6841_v37  ;;  %145 = vmatpush.msra.mxu1 %v49_v24  ;;  %v6901_v57 = vsub.f32 %v219_v40, %v6864_v45  ;;  %v6909_v60 = vand.u32 4294901760, %v6881_v50  ;;  %v6912_v61 = vand.u32 4294901760, %v6884_v51  ;;  %v334_v63 = vsub.f32 %v6858_v42, %v6892_v54  ;;  %v72_v4 = vld [vmem:[%s10232_s1 + $0xc0] sm:$0xff]  ;;  %v216_v8 = vld [vmem:[%s10234_s2 + $0x30] sm:$0xff]  ;;  %v51_v9 = vld [vmem:[%s10232_s1 + $0x18] sm:$0xff] }
  0x11   :  { %6636 = vmatmul.msk.f32.vlgmr.msra.gmra.mxu0 %vm106_vm0, %v6797_v21  ;;  %10583 = vst [vmem:[#allocation7_spill] sm:$0xff] %v6858_v42  ;;  %6637 = vmatmul.msk.f32.vlgmr.msra.gmra.mxu1 %vm106_vm0, %v6797_v21  ;;  %v328_v59 = vsub.f32 %v6837_v35, %v6878_v49  ;;  %v6921_v0 = vand.u32 4294901760, %v6895_v55  ;;  %v6924_v1 = vand.u32 4294901760, %v6898_v56  ;;  %v6927_v2 = vsub.f32 %v218_v46, %v6886_v52  ;;  %v215_v12 = vld [vmem:[%s10234_s2 + $0x28] sm:$0xff]  ;;  %v214_v13 = vld [vmem:[%s10234_s2 + $0x20] sm:$0xff]  ;;  %v67_v14 = vld [vmem:[%s10232_s1 + $0x98] sm:$0xff] }
  0x12   :  { %10584 = vst [vmem:[#allocation8_spill] sm:$0xff] %v6860_v43  ;;  %198 = vmatpush.msrb.mxu0 %v87_v28  ;;  %164 = vmatpush.msra.mxu2 %v55_v41  ;;  %v340_v6 = vsub.f32 %v6881_v50, %v6909_v60  ;;  %v346_v7 = vsub.f32 %v6884_v51, %v6912_v61  ;;  %v6950_v10 = vand.u32 4294901760, %v334_v63  ;;  %v6953_v11 = vand.u32 4294901760, %v6901_v57  ;;  %v213_v22 = vld [vmem:[%s10234_s2 + $0x18] sm:$0xff]  ;;  %v62_v23 = vld [vmem:[%s10232_s1 + $0x70] sm:$0xff]  ;;  %v57_v33 = vld [vmem:[%s10232_s1 + $0x48] sm:$0xff] }
  0x13   :  { %10585 = vst [vmem:[#allocation9_spill] sm:$0xff] %v6862_v44  ;;  %285 = vmatpush.msrb.mxu1 %v6820_v29  ;;  %183 = vmatpush.msra.mxu3 %v61_v48  ;;  %v6935_v5 = vand.u32 4294901760, %v328_v59  ;;  %v352_v16 = vsub.f32 %v6895_v55, %v6921_v0  ;;  %v6969_v17 = vand.u32 4294901760, %v217_v3  ;;  %v358_v18 = vsub.f32 %v6898_v56, %v6924_v1  ;;  %v212_v31 = vld [vmem:[%s10234_s2 + $0x10] sm:$0xff]  ;;  %v211_v46 = vld [vmem:[%s10234_s2 + $0x8] sm:$0xff]  ;;  %v210_v63 = vld [vmem:[%s10234_s2] sm:$0xff] }
  0x14   :  { %10586 = vst [vmem:[#allocation10_spill] sm:$0xff] %v6864_v45  ;;  %199 = vmatpush.msrb.mxu0 %v82_v47  ;;  %165 = vmatpush.msra.mxu2 %v50_v53  ;;  %v6965_v15 = vand.u32 4294901760, %v340_v6  ;;  %v6975_v19 = vand.u32 4294901760, %v6927_v2  ;;  %v6977_v20 = vand.u32 4294901760, %v216_v8  ;;  %v6986_v24 = vand.u32 4294901760, %v346_v7  ;;  %v52_v47 = vld [vmem:[%s10232_s1 + $0x20] sm:$0xff] }
  0x15   :  { %10587 = vst [vmem:[#allocation11_spill] sm:$0xff] %v6878_v49  ;;  %287 = vmatpush.msrb.mxu1 %v6828_v32  ;;  %6638 = vmatmul.msk.f32.vlgmr.msra.gmra.mxu2 %vm106_vm0, %v6797_v21  ;;  %v6989_v25 = vsub.f32 %v217_v3, %v6969_v17  ;;  %v6991_v26 = vand.u32 4294901760, %v215_v12  ;;  %v6993_v27 = vand.u32 4294901760, %v214_v13  ;;  %v364_v28 = vsub.f32 %v6901_v57, %v6953_v11 }
  0x16   :  { %10588 = vst [vmem:[#allocation12_spill] sm:$0xff] %v6881_v50  ;;  %200 = vmatpush.msrb.mxu0 %v77_v58  ;;  %184 = vmatpush.msra.mxu3 %v56_v62  ;;  %v6999_v30 = vsub.f32 %v216_v8, %v6977_v20  ;;  %v7008_v34 = vand.u32 4294901760, %v352_v16  ;;  %v7017_v40 = vand.u32 4294901760, %v213_v22  ;;  %v370_v41 = vsub.f32 %v6927_v2, %v6975_v19 }
  0x17   :  { %10589 = vst [vmem:[#allocation13_spill] sm:$0xff] %v6884_v51  ;;  %330 = vmatpush.msrb.mxu2 %v6935_v5  ;;  %289 = vmatpush.msrb.mxu1 %v6839_v36  ;;  %v7012_v38 = vand.u32 4294901760, %v6989_v25  ;;  %v7015_v39 = vsub.f32 %v215_v12, %v6991_v26  ;;  %v7029_v48 = vand.u32 4294901760, %v358_v18  ;;  %v7036_v58 = vsub.f32 %v214_v13, %v6993_v27 }
  0x18   :  { %10590 = vst [vmem:[#allocation14_spill] sm:$0xff] %v6886_v52  ;;  %201 = vmatpush.msrb.mxu0 %v72_v4  ;;  %185 = vmatpush.msra.mxu3 %v51_v9  ;;  %v7033_v53 = vand.u32 4294901760, %v6999_v30  ;;  %v7038_v59 = vand.u32 4294901760, %v212_v31  ;;  %v7041_v62 = vand.u32 4294901760, %v364_v28  ;;  %v7055_v6 = vsub.f32 %v213_v22, %v7017_v40 }
  0x19   :  { %10591 = vst [vmem:[#allocation15_spill] sm:$0xff] %v6892_v54  ;;  %336 = vmatpush.msrb.mxu2 %v6950_v10  ;;  %291 = vmatpush.msrb.mxu1 %v6841_v37  ;;  %v376_v3 = vsub.f32 %v6989_v25, %v7012_v38  ;;  %v7052_v4 = vand.u32 4294901760, %v7015_v39  ;;  %v7057_v7 = vand.u32 4294901760, %v211_v46  ;;  %v7060_v8 = vand.u32 4294901760, %v370_v41 }
  0x1a   :  { %10592 = vst [vmem:[#allocation16_spill] sm:$0xff] %v6895_v55  ;;  %202 = vmatpush.msrb.mxu0 %v67_v14  ;;  %428 = vmatpush.msrb.mxu3 %v6837_v35  ;;  %v382_v9 = vsub.f32 %v6999_v30, %v7033_v53  ;;  %v7067_v12 = vand.u32 4294901760, %v7036_v58  ;;  %v7070_v13 = vsub.f32 %v212_v31, %v7038_v59  ;;  %v7072_v14 = vand.u32 4294901760, %v210_v63 }
  0x1b   :  { %10593 = vst [vmem:[#allocation17_spill] sm:$0xff] %v6898_v56  ;;  %342 = vmatpush.msrb.mxu2 %v6965_v15  ;;  %293 = vmatpush.msrb.mxu1 %v6860_v43  ;;  %v7078_v16 = vand.u32 4294901760, %v376_v3  ;;  %v388_v18 = vsub.f32 %v7015_v39, %v7052_v4  ;;  %v7083_v22 = vand.u32 4294901760, %v7055_v6 }
  0x1c   :  { %10594 = vst [vmem:[#allocation18_spill] sm:$0xff] %v6901_v57  ;;  %203 = vmatpush.msrb.mxu0 %v62_v23  ;;  %431 = vmatpush.msrb.mxu3 %v6858_v42  ;;  %v7086_v23 = vsub.f32 %v211_v46, %v7057_v7  ;;  %v7092_v28 = vand.u32 4294901760, %v382_v9  ;;  %v394_v31 = vsub.f32 %v7036_v58, %v7067_v12 }
  0x1d   :  { %10595 = vst [vmem:[#allocation19_spill] sm:$0xff] %v6909_v60  ;;  %348 = vmatpush.msrb.mxu2 %v6986_v24  ;;  %6639 = vmatmul.msk.f32.vlgmr.msra.gmra.mxu3 %vm106_vm0, %v6797_v21  ;;  %v7100_v41 = vsub.f32 %v210_v63, %v7072_v14  ;;  %v7106_v46 = vand.u32 4294901760, %v388_v18 }
  0x1e   :  { %10596 = vst [vmem:[#allocation20_spill] sm:$0xff] %v6912_v61  ;;  %204 = vmatpush.msrb.mxu0 %v57_v33  ;;  %434 = vmatpush.msrb.mxu3 %v6881_v50  ;;  %v7097_v33 = vand.u32 4294901760, %v7070_v13  ;;  %v7111_v3 = vand.u32 4294901760, %v7086_v23  ;;  %v7117_v63 = vand.u32 4294901760, %v394_v31 }
  0x1f   :  { %10597 = vst [vmem:[#allocation21_spill] sm:$0xff] %v6921_v0  ;;  %354 = vmatpush.msrb.mxu2 %v7008_v34  ;;  %295 = vmatpush.msrb.mxu1 %v6862_v44  ;;  %v7122_v18 = vand.u32 4294901760, %v7100_v41 }
  0x20   :  { %10598 = vst [vmem:[#allocation22_spill] sm:$0xff] %v6924_v1  ;;  %205 = vmatpush.msrb.mxu0 %v52_v47  ;;  %437 = vmatpush.msrb.mxu3 %v6884_v51  ;;  %v400_v47 = vsub.f32 %v7055_v6, %v7083_v22  ;;  %v406_v9 = vsub.f32 %v7070_v13, %v7097_v33 }
  0x21   :  { %10599 = vst [vmem:[#allocation23_spill] sm:$0xff] %v6927_v2  ;;  %360 = vmatpush.msrb.mxu2 %v7029_v48  ;;  %297 = vmatpush.msrb.mxu1 %v6864_v45  ;;  %v418_v51 = vsub.f32 %v7100_v41, %v7122_v18 }
  0x22   :  { %10600 = vst [vmem:[#allocation24_spill] sm:$0xff] %v6935_v5  ;;  %481 = vmatpush.msra.mxu0 %v6820_v29  ;;  %440 = vmatpush.msrb.mxu3 %v6895_v55  ;;  %v7131_v31 = vand.u32 4294901760, %v400_v47  ;;  %v239_v55 = vld [vmem:[%s10234_s2 + $0xe8] sm:$0xff]  ;;  %v7147_v47 = vand.u32 4294901760, %v406_v9 }
  0x23   :  { %10601 = vst [vmem:[#allocation25_spill] sm:$0xff] %v6950_v10  ;;  %366 = vmatpush.msrb.mxu2 %v7041_v62  ;;  %299 = vmatpush.msrb.mxu1 %v6886_v52  ;;  %v7162_v9 = vand.u32 4294901760, %v239_v55  ;;  %v7171_v50 = vand.u32 4294901760, %v418_v51 }
  0x24   :  { %10602 = vst [vmem:[#allocation26_spill] sm:$0xff] %v6953_v11  ;;  %483 = vmatpush.msra.mxu0 %v6828_v32  ;;  %443 = vmatpush.msrb.mxu3 %v6898_v56  ;;  %v240_v56 = vld [vmem:[%s10234_s2 + $0xf0] sm:$0xff] }
  0x25   :  { %10603 = vst [vmem:[#allocation27_spill] sm:$0xff] %v6965_v15  ;;  %372 = vmatpush.msrb.mxu2 %v7060_v8  ;;  %301 = vmatpush.msrb.mxu1 %v6969_v17  ;;  %v7186_v51 = vsub.f32 %v239_v55, %v7162_v9  ;;  %v231_v15 = vld [vmem:[%s10234_s2 + $0xa8] sm:$0xff] }
  0x26   :  { %10604 = vst [vmem:[#allocation28_spill] sm:$0xff] %v6969_v17  ;;  %485 = vmatpush.msra.mxu0 %v6839_v36  ;;  %446 = vmatpush.msrb.mxu3 %v6901_v57  ;;  %v241_v57 = vld [vmem:[%s10234_s2 + $0xf8] sm:$0xff] }
  0x27   :  { %10605 = vst [vmem:[#allocation29_spill] sm:$0xff] %v6975_v19  ;;  %378 = vmatpush.msrb.mxu2 %v7078_v16  ;;  %303 = vmatpush.msrb.mxu1 %v6977_v20 }
  0x28   :  { %10606 = vst [vmem:[#allocation30_spill] sm:$0xff] %v6977_v20  ;;  %487 = vmatpush.msra.mxu0 %v6841_v37  ;;  %449 = vmatpush.msrb.mxu3 %v6927_v2  ;;  %v412_v2 = vsub.f32 %v7086_v23, %v7111_v3 }
  0x29   :  { %10607 = vst [vmem:[#allocation31_spill] sm:$0xff] %v6986_v24  ;;  %384 = vmatpush.msrb.mxu2 %v7092_v28  ;;  %305 = vmatpush.msrb.mxu1 %v6991_v26 }
  0x2a   :  { %10608 = vst [vmem:[#allocation32_spill] sm:$0xff] %v6989_v25  ;;  %489 = vmatpush.msra.mxu0 %v6860_v43  ;;  %452 = vmatpush.msrb.mxu3 %v6989_v25  ;;  %v7140_v25 = vand.u32 4294901760, %v241_v57 }
  0x2b   :  { %10609 = vst [vmem:[#allocation33_spill] sm:$0xff] %v6991_v26  ;;  %390 = vmatpush.msrb.mxu2 %v7106_v46  ;;  %307 = vmatpush.msrb.mxu1 %v6993_v27 }
  0x2c   :  { %10610 = vst [vmem:[#allocation34_spill] sm:$0xff] %v6993_v27  ;;  %491 = vmatpush.msra.mxu0 %v6862_v44  ;;  %455 = vmatpush.msrb.mxu3 %v6999_v30 }
  0x2d   :  { %10611 = vst [vmem:[#allocation35_spill] sm:$0xff] %v6999_v30  ;;  %396 = vmatpush.msrb.mxu2 %v7117_v63  ;;  %v7153_v30 = vand.u32 4294901760, %v240_v56  ;;  %309 = vmatpush.msrb.mxu1 %v7017_v40 }
  0x2e   :  { %10612 = vst [vmem:[#allocation36_spill] sm:$0xff] %v7008_v34  ;;  %493 = vmatpush.msra.mxu0 %v6864_v45  ;;  %458 = vmatpush.msrb.mxu3 %v7015_v39 }
  0x2f   :  { %10613 = vst [vmem:[#allocation37_spill] sm:$0xff] %v7012_v38  ;;  %402 = vmatpush.msrb.mxu2 %v7131_v31  ;;  %311 = vmatpush.msrb.mxu1 %v7038_v59 }
  0x30   :  { %10614 = vst [vmem:[#allocation38_spill] sm:$0xff] %v7015_v39  ;;  %495 = vmatpush.msra.mxu0 %v6886_v52  ;;  %461 = vmatpush.msrb.mxu3 %v7036_v58  ;;  %v7167_v39 = vsub.f32 %v241_v57, %v7140_v25  ;;  %v236_v57 = vld [vmem:[%s10234_s2 + $0xd0] sm:$0xff] }
  0x31   :  { %10615 = vst [vmem:[#allocation39_spill] sm:$0xff] %v7017_v40  ;;  %408 = vmatpush.msrb.mxu2 %v7147_v47  ;;  %6640 = vmatmul.msk.f32.vlgmr.msrb.gmra.mxu0 %vm106_vm0, %v6797_v21 }
  0x32   :  { %10616 = vst [vmem:[#allocation40_spill] sm:$0xff] %v7029_v48  ;;  %497 = vmatpush.msra.mxu0 %v6969_v17  ;;  %464 = vmatpush.msrb.mxu3 %v7055_v6 }
  0x33   :  { %10617 = vst [vmem:[#allocation41_spill] sm:$0xff] %v7033_v53  ;;  %313 = vmatpush.msrb.mxu1 %v7057_v7 }
  0x34   :  { %10618 = vst [vmem:[#allocation42_spill] sm:$0xff] %v7036_v58  ;;  %v7181_v58 = vsub.f32 %v240_v56, %v7153_v30  ;;  %499 = vmatpush.msra.mxu0 %v6977_v20  ;;  %467 = vmatpush.msrb.mxu3 %v7070_v13 }
  0x35   :  { %10619 = vst [vmem:[#allocation43_spill] sm:$0xff] %v7038_v59  ;;  %315 = vmatpush.msrb.mxu1 %v7072_v14 }
  0x36   :  { %10620 = vst [vmem:[#allocation44_spill] sm:$0xff] %v7041_v62  ;;  %501 = vmatpush.msra.mxu0 %v6991_v26  ;;  %470 = vmatpush.msrb.mxu3 %v7086_v23  ;;  %v7210_v21 = vand.u32 4294901760, %v7181_v58  ;;  %v232_v62 = vld [vmem:[%s10234_s2 + $0xb0] sm:$0xff] }
  0x37   :  { %10621 = vst [vmem:[#allocation45_spill] sm:$0xff] %v7052_v4  ;;  %522 = vmatpush.msra.mxu1 %v6878_v49  ;;  %v7284_v5 = vand.u32 4294901760, %v232_v62 }
  0x38   :  { %10622 = vst [vmem:[#allocation46_spill] sm:$0xff] %v7055_v6  ;;  %v7195_v6 = vand.u32 4294901760, %v7167_v39  ;;  %503 = vmatpush.msra.mxu0 %v6993_v27  ;;  %473 = vmatpush.msrb.mxu3 %v7100_v41 }
  0x39   :  { %10623 = vst [vmem:[#allocation47_spill] sm:$0xff] %v7057_v7  ;;  %526 = vmatpush.msra.mxu1 %v6892_v54 }
  0x3a   :  { %10624 = vst [vmem:[#allocation48_spill] sm:$0xff] %v7060_v8  ;;  %505 = vmatpush.msra.mxu0 %v7017_v40  ;;  %626 = vmatpush.msra.mxu3 %v7140_v25 }
  0x3b   :  { %10625 = vst [vmem:[#allocation49_spill] sm:$0xff] %v7067_v12  ;;  %530 = vmatpush.msra.mxu1 %v6909_v60 }
  0x3c   :  { %10626 = vst [vmem:[#allocation50_spill] sm:$0xff] %v7070_v13  ;;  %v7212_v13 = vand.u32 4294901760, %v236_v57  ;;  %507 = vmatpush.msra.mxu0 %v7038_v59  ;;  %628 = vmatpush.msra.mxu3 %v7153_v30 }
  0x3d   :  { %10627 = vst [vmem:[#allocation51_spill] sm:$0xff] %v7072_v14  ;;  %534 = vmatpush.msra.mxu1 %v6912_v61 }
  0x3e   :  { %10628 = vst [vmem:[#allocation52_spill] sm:$0xff] %v7078_v16  ;;  %v675_v16 = vsub.f32 %v7181_v58, %v7210_v21  ;;  %509 = vmatpush.msra.mxu0 %v7057_v7  ;;  %630 = vmatpush.msra.mxu3 %v7162_v9 }
  0x3f   :  { %10629 = vst [vmem:[#allocation53_spill] sm:$0xff] %v7083_v22  ;;  %538 = vmatpush.msra.mxu1 %v6921_v0 }
  0x40   :  { %10630 = vst [vmem:[#allocation54_spill] sm:$0xff] %v7086_v23  ;;  %v669_v23 = vsub.f32 %v7167_v39, %v7195_v6  ;;  %v7274_v49 = vand.u32 4294901760, %v675_v16  ;;  %511 = vmatpush.msra.mxu0 %v7072_v14 }
  0x41   :  { %10631 = vst [vmem:[#allocation55_spill] sm:$0xff] %v7092_v28  ;;  %542 = vmatpush.msra.mxu1 %v6924_v1 }
  0x42   :  { %10632 = vst [vmem:[#allocation56_spill] sm:$0xff] %v7097_v33  ;;  %v7255_v48 = vand.u32 4294901760, %v669_v23 }
  0x43   :  { %10633 = vst [vmem:[#allocation57_spill] sm:$0xff] %v7100_v41  ;;  %v233_v41 = vld [vmem:[%s10234_s2 + $0xb8] sm:$0xff]  ;;  %546 = vmatpush.msra.mxu1 %v6953_v11 }
  0x44   :  { %10634 = vst [vmem:[#allocation58_spill] sm:$0xff] %v7106_v46  ;;  %v238_v46 = vld [vmem:[%s10234_s2 + $0xe0] sm:$0xff]  ;;  %v7265_v24 = vand.u32 4294901760, %v233_v41  ;;  %671 = vmatpush.msrb.mxu0 %v7255_v48 }
  0x45   :  { %10635 = vst [vmem:[#allocation59_spill] sm:$0xff] %v7111_v3  ;;  %v7173_v28 = vand.u32 4294901760, %v238_v46  ;;  %550 = vmatpush.msra.mxu1 %v6975_v19 }
  0x46   :  { %10636 = vst [vmem:[#allocation60_spill] sm:$0xff] %v7117_v63  ;;  %v7160_v63 = vand.u32 4294901760, %v412_v2  ;;  %v237_v2 = vld [vmem:[%s10234_s2 + $0xd8] sm:$0xff]  ;;  %677 = vmatpush.msrb.mxu0 %v7274_v49 }
  0x47   :  { %10637 = vst [vmem:[#allocation61_spill] sm:$0xff] %v7122_v18  ;;  %v7197_v56 = vand.u32 4294901760, %v237_v2  ;;  %v7202_v55 = vsub.f32 %v238_v46, %v7173_v28  ;;  %v7217_v46 = vand.u32 4294901760, %v7186_v51  ;;  %632 = vmatpush.msra.mxu3 %v7173_v28  ;;  %554 = vmatpush.msra.mxu1 %v7012_v38 }
  0x48   :  { %10638 = vst [vmem:[#allocation62_spill] sm:$0xff] %v7131_v31  ;;  %414 = vmatpush.msrb.mxu2 %v7160_v63 }
  0x49   :  { %10639 = vst [vmem:[#allocation63_spill] sm:$0xff] %v7140_v25  ;;  %v7234_v42 = vand.u32 4294901760, %v7202_v55  ;;  %v681_v8 = vsub.f32 %v7186_v51, %v7217_v46  ;;  %634 = vmatpush.msra.mxu3 %v7197_v56  ;;  %558 = vmatpush.msra.mxu1 %v7033_v53  ;;  %v226_v53 = vld [vmem:[%s10234_s2 + $0x80] sm:$0xff] }
  0x4a   :  { %10640 = vst [vmem:[#allocation64_spill] sm:$0xff] %v7147_v47  ;;  %420 = vmatpush.msrb.mxu2 %v7171_v50  ;;  %v7227_v47 = vsub.f32 %v237_v2, %v7197_v56  ;;  %v7244_v2 = vsub.f32 %v236_v57, %v7212_v13  ;;  %v7440_v38 = vand.u32 4294901760, %v226_v53 }
  0x4b   :  { %10641 = vst [vmem:[#allocation65_spill] sm:$0xff] %v7153_v30  ;;  %v687_v23 = vsub.f32 %v7202_v55, %v7234_v42  ;;  %636 = vmatpush.msra.mxu3 %v7212_v13  ;;  %562 = vmatpush.msra.mxu1 %v7052_v4 }
  0x4c   :  { %10642 = vst [vmem:[#allocation66_spill] sm:$0xff] %v7160_v63  ;;  %v235_v63 = vld [vmem:[%s10234_s2 + $0xc8] sm:$0xff]  ;;  %589 = vmatpush.msra.mxu2 %v6820_v29  ;;  %v7260_v57 = vand.u32 4294901760, %v7227_v47 }
  0x4d   :  { %10643 = vst [vmem:[#allocation67_spill] sm:$0xff] %v7162_v9  ;;  %v7229_v31 = vand.u32 4294901760, %v235_v63  ;;  %566 = vmatpush.msra.mxu1 %v7067_v12 }
  0x4e   :  { %10644 = vst [vmem:[#allocation68_spill] sm:$0xff] %v7167_v39  ;;  %591 = vmatpush.msra.mxu2 %v6828_v32  ;;  %v693_v16 = vsub.f32 %v7227_v47, %v7260_v57 }
  0x4f   :  { %10645 = vst [vmem:[#allocation69_spill] sm:$0xff] %v7171_v50  ;;  %v234_v50 = vld [vmem:[%s10234_s2 + $0xc0] sm:$0xff]  ;;  %v7263_v34 = vsub.f32 %v235_v63, %v7229_v31  ;;  %v7279_v63 = vand.u32 4294901760, %v7244_v2  ;;  %638 = vmatpush.msra.mxu3 %v7229_v31  ;;  %570 = vmatpush.msra.mxu1 %v7083_v22 }
  0x50   :  { %10646 = vst [vmem:[#allocation70_spill] sm:$0xff] %v7173_v28  ;;  %593 = vmatpush.msra.mxu2 %v6839_v36  ;;  %v7246_v35 = vand.u32 4294901760, %v234_v50 }
  0x51   :  { %10647 = vst [vmem:[#allocation71_spill] sm:$0xff] %v7181_v58  ;;  %v7295_v54 = vand.u32 4294901760, %v7263_v34  ;;  %574 = vmatpush.msra.mxu1 %v7097_v33 }
  0x52   :  { %10648 = vst [vmem:[#allocation72_spill] sm:$0xff] %v7186_v51  ;;  %595 = vmatpush.msra.mxu2 %v6841_v37  ;;  %v7282_v10 = vsub.f32 %v234_v50, %v7246_v35  ;;  %v7288_v37 = vand.u32 4294901760, %v681_v8  ;;  %v7298_v50 = vsub.f32 %v233_v41, %v7265_v24  ;;  %v7305_v8 = vand.u32 4294901760, %v687_v23  ;;  %640 = vmatpush.msra.mxu3 %v7246_v35 }
  0x53   :  { %10649 = vst [vmem:[#allocation73_spill] sm:$0xff] %v7195_v6  ;;  %v7314_v41 = vsub.f32 %v232_v62, %v7284_v5  ;;  %v705_v23 = vsub.f32 %v7263_v34, %v7295_v54  ;;  %578 = vmatpush.msra.mxu1 %v7111_v3 }
  0x54   :  { %10650 = vst [vmem:[#allocation74_spill] sm:$0xff] %v7197_v56  ;;  %597 = vmatpush.msra.mxu2 %v6860_v43  ;;  %v7300_v43 = vand.u32 4294901760, %v231_v15  ;;  %683 = vmatpush.msrb.mxu0 %v7288_v37  ;;  %v7325_v60 = vand.u32 4294901760, %v7298_v50 }
  0x55   :  { %10651 = vst [vmem:[#allocation75_spill] sm:$0xff] %v7202_v55  ;;  %642 = vmatpush.msra.mxu3 %v7265_v24  ;;  %582 = vmatpush.msra.mxu1 %v7122_v18  ;;  %v227_v18 = vld [vmem:[%s10234_s2 + $0x88] sm:$0xff] }
  0x56   :  { %10652 = vst [vmem:[#allocation76_spill] sm:$0xff] %v7210_v21  ;;  %599 = vmatpush.msra.mxu2 %v6862_v44  ;;  %v7311_v44 = vand.u32 4294901760, %v7282_v10  ;;  %689 = vmatpush.msrb.mxu0 %v7305_v8  ;;  %v7424_v33 = vand.u32 4294901760, %v227_v18 }
  0x57   :  { %10653 = vst [vmem:[#allocation77_spill] sm:$0xff] %v7212_v13  ;;  %644 = vmatpush.msra.mxu3 %v7284_v5 }
  0x58   :  { %10654 = vst [vmem:[#allocation78_spill] sm:$0xff] %v7217_v46  ;;  %601 = vmatpush.msra.mxu2 %v6864_v45  ;;  %v7328_v45 = vsub.f32 %v231_v15, %v7300_v43  ;;  %v7344_v15 = vand.u32 4294901760, %v705_v23  ;;  %v7443_v19 = vsub.f32 %v227_v18, %v7424_v33 }
  0x59   :  { %10655 = vst [vmem:[#allocation79_spill] sm:$0xff] %v7227_v47  ;;  %646 = vmatpush.msra.mxu3 %v7300_v43 }
  0x5a   :  { %10656 = vst [vmem:[#allocation80_spill] sm:$0xff] %v7229_v31  ;;  %603 = vmatpush.msra.mxu2 %v6886_v52  ;;  %v7452_v61 = vand.u32 4294901760, %v7443_v19 }
  0x5b   :  { %10657 = vst [vmem:[#allocation81_spill] sm:$0xff] %v7234_v42 }
  0x5c   :  { %10658 = vst [vmem:[#allocation82_spill] sm:$0xff] %v7244_v2  ;;  %605 = vmatpush.msra.mxu2 %v6969_v17  ;;  %v753_v18 = vsub.f32 %v7443_v19, %v7452_v61 }
  0x5d   :  { %10659 = vst [vmem:[#allocation83_spill] sm:$0xff] %v7246_v35 }
  0x5e   :  { %10660 = vst [vmem:[#allocation84_spill] sm:$0xff] %v7255_v48  ;;  %v699_v48 = vsub.f32 %v7244_v2, %v7279_v63  ;;  %607 = vmatpush.msra.mxu2 %v6977_v20 }
  0x5f   :  { %10661 = vst [vmem:[#allocation85_spill] sm:$0xff] %v7260_v57 }
  0x60   :  { %10662 = vst [vmem:[#allocation86_spill] sm:$0xff] %v7263_v34  ;;  %v7333_v62 = vand.u32 4294901760, %v699_v48  ;;  %v717_v48 = vsub.f32 %v7298_v50, %v7325_v60  ;;  %609 = vmatpush.msra.mxu2 %v6991_v26 }
  0x61   :  { %10663 = vst [vmem:[#allocation87_spill] sm:$0xff] %v7265_v24 }
  0x62   :  { %10664 = vst [vmem:[#allocation88_spill] sm:$0xff] %v7274_v49  ;;  %v7319_v49 = vand.u32 4294901760, %v693_v16  ;;  %v711_v16 = vsub.f32 %v7282_v10, %v7311_v44  ;;  %v7366_v11 = vand.u32 4294901760, %v717_v48  ;;  %611 = vmatpush.msra.mxu2 %v6993_v27 }
  0x63   :  { %10665 = vst [vmem:[#allocation89_spill] sm:$0xff] %v7279_v63 }
  0x64   :  { %10666 = vst [vmem:[#allocation90_spill] sm:$0xff] %v7282_v10  ;;  %695 = vmatpush.msrb.mxu0 %v7319_v49  ;;  %v7355_v0 = vand.u32 4294901760, %v711_v16  ;;  %613 = vmatpush.msra.mxu2 %v7017_v40 }
  0x65   :  { %10667 = vst [vmem:[#allocation91_spill] sm:$0xff] %v7284_v5 }
  0x66   :  { %10668 = vst [vmem:[#allocation92_spill] sm:$0xff] %v7288_v37  ;;  %v7339_v37 = vand.u32 4294901760, %v7314_v41  ;;  %701 = vmatpush.msrb.mxu0 %v7333_v62  ;;  %615 = vmatpush.msra.mxu2 %v7038_v59 }
  0x67   :  { %10669 = vst [vmem:[#allocation93_spill] sm:$0xff] %v7295_v54 }
  0x68   :  { %10670 = vst [vmem:[#allocation94_spill] sm:$0xff] %v7298_v50  ;;  %v723_v23 = vsub.f32 %v7314_v41, %v7339_v37  ;;  %707 = vmatpush.msrb.mxu0 %v7344_v15  ;;  %617 = vmatpush.msra.mxu2 %v7057_v7 }
  0x69   :  { %10671 = vst [vmem:[#allocation95_spill] sm:$0xff] %v7300_v43 }
  0x6a   :  { %10672 = vst [vmem:[#allocation96_spill] sm:$0xff] %v7305_v8  ;;  %v7350_v8 = vand.u32 4294901760, %v7328_v45  ;;  %713 = vmatpush.msrb.mxu0 %v7355_v0  ;;  %v7376_v1 = vand.u32 4294901760, %v723_v23  ;;  %619 = vmatpush.msra.mxu2 %v7072_v14  ;;  %v229_v23 = vld [vmem:[%s10234_s2 + $0x98] sm:$0xff]  ;;  %v7455_v14 = vsub.f32 %v226_v53, %v7440_v38 }
  0x6b   :  { %10673 = vst [vmem:[#allocation97_spill] sm:$0xff] %v7311_v44 }
  0x6c   :  { %10674 = vst [vmem:[#allocation98_spill] sm:$0xff] %v7314_v41  ;;  %v729_v16 = vsub.f32 %v7328_v45, %v7350_v8  ;;  %719 = vmatpush.msrb.mxu0 %v7366_v11 }
  0x6d   :  { %10675 = vst [vmem:[#allocation99_spill] sm:$0xff] %v7319_v49  ;;  %v230_v49 = vld [vmem:[%s10234_s2 + $0xa0] sm:$0xff] }
  0x6e   :  { %10676 = vst [vmem:[#allocation100_spill] sm:$0xff] %v7325_v60  ;;  %v7382_v48 = vand.u32 4294901760, %v729_v16  ;;  %725 = vmatpush.msrb.mxu0 %v7376_v1  ;;  %v7398_v16 = vand.u32 4294901760, %v229_v23 }
  0x6f   :  { %10677 = vst [vmem:[#allocation101_spill] sm:$0xff] %v7328_v45 }
  0x70   :  { %10678 = vst [vmem:[#allocation102_spill] sm:$0xff] %v7333_v62  ;;  %v7373_v62 = vand.u32 4294901760, %v230_v49  ;;  %731 = vmatpush.msrb.mxu0 %v7382_v48 }
  0x71   :  { %10679 = vst [vmem:[#allocation103_spill] sm:$0xff] %v7339_v37 }
  0x72   :  { %10680 = vst [vmem:[#allocation104_spill] sm:$0xff] %v7344_v15  ;;  %648 = vmatpush.msra.mxu3 %v7373_v62  ;;  %v7413_v15 = vsub.f32 %v229_v23, %v7398_v16 }
  0x73   :  { %10681 = vst [vmem:[#allocation105_spill] sm:$0xff] %v7350_v8 }
  0x74   :  { %10682 = vst [vmem:[#allocation106_spill] sm:$0xff] %v7355_v0  ;;  %650 = vmatpush.msra.mxu3 %v7398_v16  ;;  %v7422_v3 = vand.u32 4294901760, %v7413_v15 }
  0x75   :  { %10683 = vst [vmem:[#allocation107_spill] sm:$0xff] %v7366_v11 }
  0x76   :  { %10684 = vst [vmem:[#allocation108_spill] sm:$0xff] %v7373_v62  ;;  %v741_v23 = vsub.f32 %v7413_v15, %v7422_v3 }
  0x77   :  { %10685 = vst [vmem:[#allocation109_spill] sm:$0xff] %v7376_v1  ;;  %v7401_v1 = vsub.f32 %v230_v49, %v7373_v62 }
  0x78   :  { %10686 = vst [vmem:[#allocation110_spill] sm:$0xff] %v7382_v48  ;;  %v228_v48 = vld [vmem:[%s10234_s2 + $0x90] sm:$0xff] }
  0x79   :  { %10687 = vst [vmem:[#allocation111_spill] sm:$0xff] %v7398_v16  ;;  %v7408_v11 = vand.u32 4294901760, %v7401_v1  ;;  %v7410_v0 = vand.u32 4294901760, %v228_v48 }
  0x7a   :  { %10688 = vst [vmem:[#allocation112_spill] sm:$0xff] %v7401_v1 }
  0x7b   :  { %10689 = vst [vmem:[#allocation113_spill] sm:$0xff] %v7408_v11  ;;  %v735_v49 = vsub.f32 %v7401_v1, %v7408_v11  ;;  %652 = vmatpush.msra.mxu3 %v7410_v0  ;;  %v7427_v22 = vsub.f32 %v228_v48, %v7410_v0  ;;  %v7446_v48 = vand.u32 4294901760, %v741_v23  ;;  %v7463_v23 = vand.u32 4294901760, %v7455_v14 }
  0x7c   :  { %10690 = vst [vmem:[#allocation114_spill] sm:$0xff] %v7410_v0 }
  0x7d   :  { %10691 = vst [vmem:[#allocation115_spill] sm:$0xff] %v7413_v15  ;;  %v7429_v12 = vand.u32 4294901760, %v735_v49  ;;  %654 = vmatpush.msra.mxu3 %v7424_v33  ;;  %v7435_v4 = vand.u32 4294901760, %v7427_v22  ;;  %v759_v59 = vsub.f32 %v7455_v14, %v7463_v23 }
  0x7e   :  { %10692 = vst [vmem:[#allocation116_spill] sm:$0xff] %v7422_v3 }
  0x7f   :  { %10693 = vst [vmem:[#allocation117_spill] sm:$0xff] %v7424_v33  ;;  %737 = vmatpush.msrb.mxu0 %v7429_v12  ;;  %v747_v49 = vsub.f32 %v7427_v22, %v7435_v4  ;;  %656 = vmatpush.msra.mxu3 %v7440_v38  ;;  %v7471_v53 = vand.u32 4294901760, %v759_v59 }
  0x80   :  { %10694 = vst [vmem:[#allocation118_spill] sm:$0xff] %v7427_v22 }
  0x81   :  { %10695 = vst [vmem:[#allocation119_spill] sm:$0xff] %v7429_v12  ;;  %743 = vmatpush.msrb.mxu0 %v7446_v48  ;;  %v7458_v7 = vand.u32 4294901760, %v747_v49  ;;  %v7466_v12 = vand.u32 4294901760, %v753_v18  ;;  %v45_v49 = vld [vmem:[%s10235_s4] sm:$0x77] }
  0x82   :  { %10696 = vst [vmem:[#allocation120_spill] sm:$0xff] %v7435_v4  ;;  %v92_v40 = vperm.slane %v45_v49, 4 }
  0x83   :  { %10697 = vst [vmem:[#allocation121_spill] sm:$0xff] %v7440_v38  ;;  %749 = vmatpush.msrb.mxu0 %v7458_v7 }
  0x84   :  { %10698 = vst [vmem:[#allocation122_spill] sm:$0xff] %v7443_v19  ;;  %v102_v26 = vperm.slane %v92_v40, 0 }
  0x85   :  { %10699 = vst [vmem:[#allocation123_spill] sm:$0xff] %v7446_v48  ;;  %755 = vmatpush.msrb.mxu0 %v7466_v12  ;;  %v91_v48 = vperm.slane %v45_v49, 0  ;;  %v257_v49 = vld [vmem:[%s10234_s2 + $0x178] sm:$0xff] }
  0x86   :  { %10700 = vst [vmem:[#allocation124_spill] sm:$0xff] %v7452_v61 }
  0x87   :  { %10701 = vst [vmem:[#allocation125_spill] sm:$0xff] %v7455_v14  ;;  %761 = vmatpush.msrb.mxu0 %v7471_v53  ;;  %v101_v27 = vperm.slane %v91_v48, 0 }
  0x88   :  { %10702 = vst [vmem:[#allocation126_spill] sm:$0xff] %v7458_v7 }
  0x89   :  { %10703 = vst [vmem:[#allocation127_spill] sm:$0xff] %v7463_v23 }
  0x8a   :  { %10704 = vst [vmem:[#allocation128_spill] sm:$0xff] %v7466_v12 }
  0x8b   :  { %10705 = vst [vmem:[#allocation129_spill] sm:$0xff] %v7471_v53 }
  0x8e   :  { %v127_v7 = vpop.f32.mrf.mxu0  ;;  %v147_v20 = vpop.f32.mrf.mxu1 }
  0x8f   :  { %v7477_v18 = vadd.f32 %v127_v7, %v101_v27  ;;  %v7479_v17 = vadd.f32 %v147_v20, %v102_v26 }
  0x91   :  { %10706 = vst [vmem:[#allocation130_spill] sm:$0xff] %v7477_v18  ;;  %v316_v12 = vand.u32 4294901760, %v7477_v18  ;;  %v7483_v59 = vand.u32 4294901760, %v7479_v17 }
  0x92   :  { %10707 = vst [vmem:[#allocation131_spill] sm:$0xff] %v7479_v17 }
  0x93   :  { %422 = vmatmul.f32.vlgmr.msrb.gmra.mxu2 %v316_v12  ;;  %v317_v53 = vsub.f32 %v7477_v18, %v316_v12  ;;  %v7489_v48 = vsub.f32 %v7479_v17, %v7483_v59 }
  0x94   :  { %822 = vmatpush.msrb.mxu2 %v7140_v25 }
  0x95   :  { %476 = vmatmul.f32.vlgmr.msrb.gmra.mxu3 %v317_v53  ;;  %v318_v27 = vand.u32 4294901760, %v317_v53  ;;  %v10334_v20 = vand.u32 4294901760, %v7489_v48 }
  0x96   :  { %824 = vmatpush.msrb.mxu2 %v7153_v30  ;;  %863 = vmatpush.msrb.mxu3 %v7195_v6  ;;  %v250_v6 = vld [vmem:[%s10234_s2 + $0x140] sm:$0xff] }
  0x97   :  { %515 = vmatmul.f32.vlgmr.msra.gmra.mxu0 %v318_v27  ;;  %v319_v26 = vsub.f32 %v317_v53, %v318_v27  ;;  %v660_v7 = vsub.f32 %v7489_v48, %v10334_v20  ;;  %v256_v27 = vld [vmem:[%s10234_s2 + $0x170] sm:$0xff]  ;;  %v254_v20 = vld [vmem:[%s10234_s2 + $0x160] sm:$0xff] }
  0x98   :  { %826 = vmatpush.msrb.mxu2 %v7162_v9  ;;  %867 = vmatpush.msrb.mxu3 %v7210_v21 }
  0x99   :  { %930 = vmatpush.msra.mxu0 %v7140_v25  ;;  %v320_v40 = vand.u32 4294901760, %v319_v26  ;;  %v661_v53 = vand.u32 4294901760, %v660_v7  ;;  %v7521_v26 = vand.u32 4294901760, %v257_v49  ;;  %v255_v7 = vld [vmem:[%s10234_s2 + $0x168] sm:$0xff] }
  0x9a   :  { %828 = vmatpush.msrb.mxu2 %v7173_v28  ;;  %871 = vmatpush.msrb.mxu3 %v7217_v46 }
  0x9b   :  { %932 = vmatpush.msra.mxu0 %v7153_v30  ;;  %321 = vmatmul.f32.vlgmr.msrb.gmra.mxu1 %v320_v40  ;;  %10708 = vst [vmem:[#allocation132_spill] sm:$0xff] %v7521_v26  ;;  %v7527_v40 = vand.u32 4294901760, %v256_v27  ;;  %v266_v30 = vld [vmem:[%s10234_s2 + $0x1c0] sm:$0xff] }
  0x9c   :  { %621 = vmatmul.f32.vlgmr.msra.gmra.mxu2 %v316_v12  ;;  %769 = vmatpush.msrb.mxu1 %v7167_v39  ;;  %v7961_v18 = vand.u32 4294901760, %v266_v30 }
  0x9d   :  { %830 = vmatpush.msrb.mxu2 %v7197_v56  ;;  %875 = vmatpush.msrb.mxu3 %v7234_v42  ;;  %10709 = vst [vmem:[#allocation133_spill] sm:$0xff] %v7527_v40  ;;  %v251_v42 = vld [vmem:[%s10234_s2 + $0x148] sm:$0xff] }
  0x9e   :  { %934 = vmatpush.msra.mxu0 %v7162_v9  ;;  %772 = vmatpush.msrb.mxu1 %v7181_v58 }
  0x9f   :  { %832 = vmatpush.msrb.mxu2 %v7212_v13  ;;  %879 = vmatpush.msrb.mxu3 %v7260_v57  ;;  %v252_v57 = vld [vmem:[%s10234_s2 + $0x150] sm:$0xff] }
  0xa0   :  { %936 = vmatpush.msra.mxu0 %v7173_v28  ;;  %775 = vmatpush.msrb.mxu1 %v7186_v51  ;;  %v7589_v21 = vand.u32 4294901760, %v252_v57  ;;  %v270_v28 = vld [vmem:[%s10234_s2 + $0x1e0] sm:$0xff] }
  0xa1   :  { %834 = vmatpush.msrb.mxu2 %v7229_v31  ;;  %883 = vmatpush.msrb.mxu3 %v7279_v63  ;;  %v7892_v39 = vand.u32 4294901760, %v270_v28 }
  0xa2   :  { %938 = vmatpush.msra.mxu0 %v7197_v56  ;;  %662 = vmatmul.f32.vlgmr.msra.gmra.mxu3 %v661_v53  ;;  %v7536_v53 = vsub.f32 %v257_v49, %v7521_v26  ;;  %v253_v49 = vld [vmem:[%s10234_s2 + $0x158] sm:$0xff]  ;;  %10719 = vst [vmem:[#allocation143_spill] sm:$0xff] %v7589_v21 }
  0xa3   :  { %778 = vmatpush.msrb.mxu1 %v7202_v55  ;;  %836 = vmatpush.msrb.mxu2 %v7246_v35 }
  0xa4   :  { %887 = vmatpush.msrb.mxu3 %v7295_v54  ;;  %940 = vmatpush.msra.mxu0 %v7212_v13  ;;  %10710 = vst [vmem:[#allocation134_spill] sm:$0xff] %v7536_v53  ;;  %v7543_v54 = vand.u32 4294901760, %v255_v7  ;;  %v7560_v63 = vand.u32 4294901760, %v7536_v53 }
  0xa5   :  { %584 = vmatmul.f32.vlgmr.msra.gmra.mxu1 %v316_v12  ;;  %838 = vmatpush.msrb.mxu2 %v7265_v24  ;;  %v7548_v12 = vsub.f32 %v256_v27, %v7527_v40 }
  0xa6   :  { %781 = vmatpush.msrb.mxu1 %v7227_v47  ;;  %891 = vmatpush.msrb.mxu3 %v7311_v44  ;;  %10711 = vst [vmem:[#allocation135_spill] sm:$0xff] %v7543_v54  ;;  %v7555_v44 = vand.u32 4294901760, %v254_v20  ;;  %v7565_v27 = vsub.f32 %v255_v7, %v7543_v54  ;;  %v1010_v46 = vsub.f32 %v7536_v53, %v7560_v63 }
  0xa7   :  { %942 = vmatpush.msra.mxu0 %v7229_v31  ;;  %840 = vmatpush.msrb.mxu2 %v7284_v5  ;;  %10712 = vst [vmem:[#allocation136_spill] sm:$0xff] %v7548_v12 }
  0xa8   :  { %784 = vmatpush.msrb.mxu1 %v7244_v2  ;;  %895 = vmatpush.msrb.mxu3 %v7325_v60  ;;  %10713 = vst [vmem:[#allocation137_spill] sm:$0xff] %v7555_v44  ;;  %v7567_v60 = vand.u32 4294901760, %v253_v49  ;;  %v7583_v7 = vsub.f32 %v254_v20, %v7555_v44  ;;  %v7597_v20 = vand.u32 4294901760, %v7565_v27 }
  0xa9   :  { %944 = vmatpush.msra.mxu0 %v7246_v35  ;;  %842 = vmatpush.msrb.mxu2 %v7300_v43  ;;  %10714 = vst [vmem:[#allocation138_spill] sm:$0xff] %v7560_v63 }
  0xaa   :  { %787 = vmatpush.msrb.mxu1 %v7263_v34  ;;  %899 = vmatpush.msrb.mxu3 %v7339_v37  ;;  %10715 = vst [vmem:[#allocation139_spill] sm:$0xff] %v7565_v27  ;;  %v7575_v37 = vand.u32 4294901760, %v7548_v12 }
  0xab   :  { %946 = vmatpush.msra.mxu0 %v7265_v24  ;;  %844 = vmatpush.msrb.mxu2 %v7373_v62  ;;  %10716 = vst [vmem:[#allocation140_spill] sm:$0xff] %v7567_v60 }
  0xac   :  { %763 = vmatmul.f32.vlgmr.msrb.gmra.mxu0 %v7483_v59  ;;  %790 = vmatpush.msrb.mxu1 %v7282_v10  ;;  %10717 = vst [vmem:[#allocation141_spill] sm:$0xff] %v7575_v37  ;;  %v7623_v10 = vsub.f32 %v252_v57, %v7589_v21 }
  0xad   :  { %903 = vmatpush.msrb.mxu3 %v7350_v8  ;;  %948 = vmatpush.msra.mxu0 %v7284_v5  ;;  %10718 = vst [vmem:[#allocation142_spill] sm:$0xff] %v7583_v7  ;;  %v7600_v8 = vsub.f32 %v253_v49, %v7567_v60  ;;  %v1016_v5 = vsub.f32 %v7548_v12, %v7575_v37  ;;  %v249_v49 = vld [vmem:[%s10234_s2 + $0x138] sm:$0xff] }
  0xae   :  { %793 = vmatpush.msrb.mxu1 %v7298_v50  ;;  %846 = vmatpush.msrb.mxu2 %v7398_v16  ;;  %10720 = vst [vmem:[#allocation144_spill] sm:$0xff] %v7597_v20  ;;  %v7602_v50 = vand.u32 4294901760, %v251_v42 }
  0xaf   :  { %907 = vmatpush.msrb.mxu3 %v7408_v11  ;;  %950 = vmatpush.msra.mxu0 %v7300_v43  ;;  %10721 = vst [vmem:[#allocation145_spill] sm:$0xff] %v7600_v8  ;;  %v7611_v11 = vand.u32 4294901760, %v7583_v7  ;;  %v7613_v43 = vand.u32 4294901760, %v250_v6  ;;  %v7640_v57 = vand.u32 4294901760, %v1016_v5  ;;  %v7657_v5 = vand.u32 4294901760, %v7623_v10 }
  0xb0   :  { %10722 = vst [vmem:[#allocation146_spill] sm:$0xff] %v7602_v50  ;;  %796 = vmatpush.msrb.mxu1 %v7314_v41  ;;  %848 = vmatpush.msrb.mxu2 %v7410_v0  ;;  %v7620_v41 = vand.u32 4294901760, %v1010_v46  ;;  %v7633_v24 = vsub.f32 %v251_v42, %v7602_v50  ;;  %v248_v46 = vld [vmem:[%s10234_s2 + $0x130] sm:$0xff] }
  0xb1   :  { %911 = vmatpush.msrb.mxu3 %v7422_v3  ;;  %952 = vmatpush.msra.mxu0 %v7373_v62  ;;  %10723 = vst [vmem:[#allocation147_spill] sm:$0xff] %v7613_v43  ;;  %v1022_v3 = vsub.f32 %v7565_v27, %v7597_v20  ;;  %v7630_v62 = vand.u32 4294901760, %v7600_v8  ;;  %v1028_v42 = vsub.f32 %v7583_v7, %v7611_v11 }
  0xb2   :  { %799 = vmatpush.msrb.mxu1 %v7328_v45  ;;  %850 = vmatpush.msrb.mxu2 %v7424_v33  ;;  %10724 = vst [vmem:[#allocation148_spill] sm:$0xff] %v7620_v41  ;;  %v7668_v45 = vand.u32 4294901760, %v7633_v24 }
  0xb3   :  { %10725 = vst [vmem:[#allocation149_spill] sm:$0xff] %v7623_v10  ;;  %915 = vmatpush.msrb.mxu3 %v7435_v4  ;;  %954 = vmatpush.msra.mxu0 %v7398_v16  ;;  %v7642_v4 = vand.u32 4294901760, %v249_v49  ;;  %v7649_v16 = vsub.f32 %v250_v6, %v7613_v43  ;;  %v1034_v6 = vsub.f32 %v7600_v8, %v7630_v62 }
  0xb4   :  { %10726 = vst [vmem:[#allocation150_spill] sm:$0xff] %v7630_v62  ;;  %802 = vmatpush.msrb.mxu1 %v7401_v1  ;;  %852 = vmatpush.msrb.mxu2 %v7440_v38  ;;  %v247_v1 = vld [vmem:[%s10234_s2 + $0x128] sm:$0xff]  ;;  %v1046_v34 = vsub.f32 %v7633_v24, %v7668_v45 }
  0xb5   :  { %10727 = vst [vmem:[#allocation151_spill] sm:$0xff] %v7633_v24  ;;  %919 = vmatpush.msrb.mxu3 %v7452_v61  ;;  %956 = vmatpush.msra.mxu0 %v7410_v0  ;;  %v7659_v61 = vand.u32 4294901760, %v248_v46  ;;  %v7663_v0 = vand.u32 4294901760, %v1022_v3  ;;  %v7682_v3 = vand.u32 4294901760, %v1028_v42 }
  0xb6   :  { %10728 = vst [vmem:[#allocation152_spill] sm:$0xff] %v7640_v57  ;;  %1012 = vmatpush.msra.mxu2 %v7620_v41  ;;  %805 = vmatpush.msrb.mxu1 %v7413_v15  ;;  %v246_v41 = vld [vmem:[%s10234_s2 + $0x120] sm:$0xff]  ;;  %v7685_v15 = vand.u32 4294901760, %v7649_v16 }
  0xb7   :  { %10729 = vst [vmem:[#allocation153_spill] sm:$0xff] %v7649_v16  ;;  %923 = vmatpush.msrb.mxu3 %v7463_v23  ;;  %958 = vmatpush.msra.mxu0 %v7424_v33  ;;  %v7676_v23 = vsub.f32 %v249_v49, %v7642_v4  ;;  %v7678_v33 = vand.u32 4294901760, %v247_v1  ;;  %v1040_v49 = vsub.f32 %v7623_v10, %v7657_v5  ;;  %v7698_v42 = vand.u32 4294901760, %v246_v41 }
  0xb8   :  { %10730 = vst [vmem:[#allocation154_spill] sm:$0xff] %v7657_v5  ;;  %1018 = vmatpush.msra.mxu2 %v7640_v57  ;;  %808 = vmatpush.msrb.mxu1 %v7427_v22  ;;  %v245_v57 = vld [vmem:[%s10234_s2 + $0x118] sm:$0xff]  ;;  %v7696_v22 = vsub.f32 %v248_v46, %v7659_v61 }
  0xb9   :  { %10731 = vst [vmem:[#allocation155_spill] sm:$0xff] %v7663_v0  ;;  %1110 = vmatpush.msra.mxu3 %v7536_v53  ;;  %960 = vmatpush.msra.mxu0 %v7440_v38  ;;  %v10735_v53 = vand.u32 4294901760, %v7489_v48  ;;  %v7702_v38 = vand.u32 4294901760, %v1034_v6  ;;  %v7712_v46 = vand.u32 4294901760, %v7676_v23  ;;  %v1052_v6 = vsub.f32 %v7649_v16, %v7685_v15 }
  0xba   :  { %10732 = vst [vmem:[#allocation156_spill] sm:$0xff] %v7676_v23  ;;  %1024 = vmatpush.msra.mxu2 %v7663_v0  ;;  %811 = vmatpush.msrb.mxu1 %v7443_v19  ;;  %v7717_v0 = vand.u32 4294901760, %v245_v57  ;;  %v243_v19 = vld [vmem:[%s10234_s2 + $0x108] sm:$0xff]  ;;  %v7728_v35 = vand.u32 4294901760, %v1040_v49  ;;  %v242_v49 = vld [vmem:[%s10234_s2 + $0x100] sm:$0xff] }
  0xbb   :  { %10733 = vst [vmem:[#allocation157_spill] sm:$0xff] %v7682_v3  ;;  %856 = vmatmul.f32.vlgmr.msrb.gmra.mxu2 %v10735_v53  ;;  %1113 = vmatpush.msra.mxu3 %v7548_v12  ;;  %v244_v53 = vld [vmem:[%s10234_s2 + $0x110] sm:$0xff]  ;;  %v7715_v12 = vsub.f32 %v247_v1, %v7678_v33  ;;  %v7731_v1 = vand.u32 4294901760, %v7696_v22  ;;  %v7777_v47 = vand.u32 4294901760, %v242_v49 }
  0xbc   :  { %10734 = vst [vmem:[#allocation158_spill] sm:$0xff] %v7685_v15  ;;  %1163 = vmatpush.msrb.mxu0 %v7521_v26  ;;  %925 = vmatmul.f32.vlgmr.msrb.gmra.mxu3 %v7483_v59  ;;  %v7741_v2 = vand.u32 4294901760, %v244_v53 }
  0xbd   :  { %10736 = vst [vmem:[#allocation159_spill] sm:$0xff] %v7696_v22  ;;  %962 = vmatmul.f32.vlgmr.msra.gmra.mxu0 %v7483_v59  ;;  %1030 = vmatpush.msra.mxu2 %v7682_v3  ;;  %v7734_v59 = vsub.f32 %v246_v41, %v7698_v42  ;;  %v7739_v3 = vld [vmem:[%s10235_s4 + $0x8] sm:$0x77]  ;;  %v1058_v41 = vsub.f32 %v7676_v23, %v7712_v46  ;;  %v7755_v31 = vand.u32 4294901760, %v7715_v12 }
  0xbe   :  { %10737 = vst [vmem:[#allocation160_spill] sm:$0xff] %v7702_v38  ;;  %1116 = vmatpush.msra.mxu3 %v7565_v27  ;;  %1165 = vmatpush.msrb.mxu0 %v7527_v40  ;;  %v7745_v27 = vand.u32 4294901760, %v1046_v34  ;;  %v7764_v34 = vand.u32 4294901760, %v1052_v6  ;;  %v7775_v17 = vsub.f32 %v244_v53, %v7741_v2 }
  0xbf   :  { %10738 = vst [vmem:[#allocation161_spill] sm:$0xff] %v7712_v46  ;;  %814 = vmatpush.msrb.mxu1 %v7455_v14  ;;  %1036 = vmatpush.msra.mxu2 %v7702_v38  ;;  %v7758_v14 = vsub.f32 %v245_v57, %v7717_v0  ;;  %v7760_v38 = vand.u32 4294901760, %v243_v19  ;;  %v7772_v57 = vand.u32 4294901760, %v7734_v59  ;;  %v7783_v6 = vand.u32 4294901760, %v1058_v41 }
  0xc0   :  { %10739 = vst [vmem:[#allocation162_spill] sm:$0xff] %v7715_v12  ;;  %817 = vmatmul.f32.vlgmr.msrb.gmra.mxu1 %v7489_v48  ;;  %1119 = vmatpush.msra.mxu3 %v7583_v7  ;;  %v93_v48 = vperm.slane %v7739_v3, 0  ;;  %v1064_v7 = vsub.f32 %v7696_v22, %v7731_v1  ;;  %v7802_v55 = vand.u32 4294901760, %v7775_v17 }
  0xc1   :  { %10740 = vst [vmem:[#allocation163_spill] sm:$0xff] %v7728_v35  ;;  %967 = vmatpush.msra.mxu1 %v7521_v26  ;;  %1167 = vmatpush.msrb.mxu0 %v7543_v54  ;;  %v7791_v53 = vsub.f32 %v243_v19, %v7760_v38  ;;  %v7805_v19 = vsub.f32 %v242_v49, %v7777_v47 }
  0xc2   :  { %10741 = vst [vmem:[#allocation164_spill] sm:$0xff] %v7734_v59  ;;  %1042 = vmatpush.msra.mxu2 %v7728_v35  ;;  %1122 = vmatpush.msra.mxu3 %v7600_v8  ;;  %v1070_v8 = vsub.f32 %v7715_v12, %v7755_v31  ;;  %v7788_v35 = vand.u32 4294901760, %v7758_v14  ;;  %v103_v13 = vperm.slane %v93_v48, 0  ;;  %v7797_v41 = vand.u32 4294901760, %v1064_v7  ;;  %v273_v48 = vld [vmem:[%s10234_s2 + $0x1f8] sm:$0xff] }
  0xc3   :  { %10742 = vst [vmem:[#allocation165_spill] sm:$0xff] %v7745_v27  ;;  %969 = vmatpush.msra.mxu1 %v7527_v40  ;;  %1169 = vmatpush.msrb.mxu0 %v7555_v44  ;;  %v7819_v49 = vand.u32 4294901760, %v7791_v53  ;;  %v7825_v56 = vand.u32 4294901760, %v273_v48  ;;  %v7837_v51 = vand.u32 4294901760, %v7805_v19 }
  0xc4   :  { %10743 = vst [vmem:[#allocation166_spill] sm:$0xff] %v7758_v14  ;;  %1048 = vmatpush.msra.mxu2 %v7745_v27  ;;  %1125 = vmatpush.msra.mxu3 %v7623_v10  ;;  %v1076_v10 = vsub.f32 %v7734_v59, %v7772_v57  ;;  %v167_v27 = vpop.f32.mrf.mxu2  ;;  %v7814_v7 = vand.u32 4294901760, %v1070_v8 }
  0xc5   :  { %10744 = vst [vmem:[#allocation167_spill] sm:$0xff] %v7764_v34  ;;  %971 = vmatpush.msra.mxu1 %v7543_v54  ;;  %1171 = vmatpush.msrb.mxu0 %v7567_v60 }
  0xc6   :  { %10745 = vst [vmem:[#allocation168_spill] sm:$0xff] %v7775_v17  ;;  %1054 = vmatpush.msra.mxu2 %v7764_v34  ;;  %1128 = vmatpush.msra.mxu3 %v7633_v24  ;;  %v1082_v24 = vsub.f32 %v7758_v14, %v7788_v35  ;;  %v7823_v34 = vadd.f32 %v167_v27, %v103_v13  ;;  %v7832_v8 = vand.u32 4294901760, %v1076_v10 }
  0xc7   :  { %10746 = vst [vmem:[#allocation169_spill] sm:$0xff] %v7783_v6  ;;  %973 = vmatpush.msra.mxu1 %v7555_v44  ;;  %1173 = vmatpush.msrb.mxu0 %v7589_v21  ;;  %v1094_v10 = vsub.f32 %v7791_v53, %v7819_v49 }
  0xc8   :  { %10747 = vst [vmem:[#allocation170_spill] sm:$0xff] %v7791_v53  ;;  %1060 = vmatpush.msra.mxu2 %v7783_v6  ;;  %1131 = vmatpush.msra.mxu3 %v7649_v16  ;;  %v272_v16 = vld [vmem:[%s10234_s2 + $0x1f0] sm:$0xff]  ;;  %v1088_v6 = vsub.f32 %v7775_v17, %v7802_v55  ;;  %v7843_v13 = vand.u32 4294901760, %v1082_v24 }
  0xc9   :  { %10748 = vst [vmem:[#allocation171_spill] sm:$0xff] %v7797_v41  ;;  %975 = vmatpush.msra.mxu1 %v7567_v60  ;;  %1175 = vmatpush.msrb.mxu0 %v7602_v50  ;;  %v7847_v27 = vand.u32 4294901760, %v272_v16 }
  0xca   :  { %10749 = vst [vmem:[#allocation172_spill] sm:$0xff] %v7805_v19  ;;  %1066 = vmatpush.msra.mxu2 %v7797_v41  ;;  %1134 = vmatpush.msra.mxu3 %v7676_v23  ;;  %v271_v23 = vld [vmem:[%s10234_s2 + $0x1e8] sm:$0xff]  ;;  %v7855_v41 = vand.u32 4294901760, %v7823_v34  ;;  %v7862_v24 = vand.u32 4294901760, %v1088_v6  ;;  %v7878_v6 = vand.u32 4294901760, %v1094_v10  ;;  %v268_v10 = vld [vmem:[%s10234_s2 + $0x1d0] sm:$0xff] }
  0xcb   :  { %10750 = vst [vmem:[#allocation173_spill] sm:$0xff] %v7814_v7  ;;  %977 = vmatpush.msra.mxu1 %v7589_v21  ;;  %1177 = vmatpush.msrb.mxu0 %v7613_v43  ;;  %v7871_v58 = vand.u32 4294901760, %v271_v23 }
  0xcc   :  { %10751 = vst [vmem:[#allocation174_spill] sm:$0xff] %v7823_v34  ;;  %1072 = vmatpush.msra.mxu2 %v7814_v7  ;;  %1137 = vmatpush.msra.mxu3 %v7696_v22  ;;  %v7858_v22 = vsub.f32 %v273_v48, %v7825_v56  ;;  %v1100_v7 = vsub.f32 %v7805_v19, %v7837_v51  ;;  %v269_v48 = vld [vmem:[%s10234_s2 + $0x1d8] sm:$0xff] }
  0xcd   :  { %10752 = vst [vmem:[#allocation175_spill] sm:$0xff] %v7832_v8  ;;  %979 = vmatpush.msra.mxu1 %v7602_v50  ;;  %1179 = vmatpush.msrb.mxu0 %v7642_v4  ;;  %v7890_v9 = vsub.f32 %v7823_v34, %v7855_v41 }
  0xce   :  { %10753 = vst [vmem:[#allocation176_spill] sm:$0xff] %v7837_v51  ;;  %1078 = vmatpush.msra.mxu2 %v7832_v8  ;;  %1140 = vmatpush.msra.mxu3 %v7715_v12  ;;  %v7881_v12 = vsub.f32 %v272_v16, %v7847_v27  ;;  %v7886_v8 = vand.u32 4294901760, %v7858_v22  ;;  %v7899_v16 = vand.u32 4294901760, %v1100_v7  ;;  %v267_v7 = vld [vmem:[%s10234_s2 + $0x1c8] sm:$0xff] }
  0xcf   :  { %10754 = vst [vmem:[#allocation177_spill] sm:$0xff] %v7843_v13  ;;  %981 = vmatpush.msra.mxu1 %v7613_v43  ;;  %1181 = vmatpush.msrb.mxu0 %v7659_v61 }
  0xd0   :  { %10755 = vst [vmem:[#allocation178_spill] sm:$0xff] %v7858_v22  ;;  %1084 = vmatpush.msra.mxu2 %v7843_v13  ;;  %1143 = vmatpush.msra.mxu3 %v7734_v59  ;;  %v7901_v59 = vand.u32 4294901760, %v269_v48  ;;  %v7906_v13 = vsub.f32 %v271_v23, %v7871_v58  ;;  %v7911_v34 = vand.u32 4294901760, %v7881_v12  ;;  %v1351_v23 = vsub.f32 %v7858_v22, %v7886_v8 }
  0xd1   :  { %10756 = vst [vmem:[#allocation179_spill] sm:$0xff] %v7862_v24  ;;  %983 = vmatpush.msra.mxu1 %v7642_v4  ;;  %1183 = vmatpush.msrb.mxu0 %v7678_v33  ;;  %v7995_v22 = vsub.f32 %v266_v30, %v7961_v18 }
  0xd2   :  { %10757 = vst [vmem:[#allocation180_spill] sm:$0xff] %v7878_v6  ;;  %1090 = vmatpush.msra.mxu2 %v7862_v24  ;;  %1146 = vmatpush.msra.mxu3 %v7758_v14  ;;  %v7913_v24 = vand.u32 4294901760, %v268_v10  ;;  %v7937_v14 = vand.u32 4294901760, %v7906_v13  ;;  %v7953_v25 = vand.u32 4294901760, %v1351_v23  ;;  %v264_v23 = vld [vmem:[%s10234_s2 + $0x1b0] sm:$0xff] }
  0xd3   :  { %10758 = vst [vmem:[#allocation181_spill] sm:$0xff] %v7881_v12  ;;  %985 = vmatpush.msra.mxu1 %v7659_v61  ;;  %1185 = vmatpush.msrb.mxu0 %v7698_v42 }
  0xd4   :  { %10759 = vst [vmem:[#allocation182_spill] sm:$0xff] %v7886_v8  ;;  %1096 = vmatpush.msra.mxu2 %v7878_v6  ;;  %1149 = vmatpush.msra.mxu3 %v7775_v17  ;;  %v7924_v17 = vsub.f32 %v270_v28, %v7892_v39  ;;  %v7929_v6 = vsub.f32 %v269_v48, %v7901_v59  ;;  %v7939_v28 = vand.u32 4294901760, %v267_v7 }
  0xd5   :  { %10760 = vst [vmem:[#allocation183_spill] sm:$0xff] %v7899_v16  ;;  %987 = vmatpush.msra.mxu1 %v7678_v33  ;;  %1187 = vmatpush.msrb.mxu0 %v7717_v0  ;;  %v1357_v48 = vsub.f32 %v7881_v12, %v7911_v34  ;;  %v263_v12 = vld [vmem:[%s10234_s2 + $0x1a8] sm:$0xff] }
  0xd6   :  { %10761 = vst [vmem:[#allocation184_spill] sm:$0xff] %v7906_v13  ;;  %1102 = vmatpush.msra.mxu2 %v7899_v16  ;;  %1152 = vmatpush.msra.mxu3 %v7791_v53  ;;  %v7946_v53 = vsub.f32 %v268_v10, %v7913_v24  ;;  %v265_v16 = vld [vmem:[%s10234_s2 + $0x1b8] sm:$0xff]  ;;  %v7959_v52 = vand.u32 4294901760, %v7924_v17  ;;  %v7966_v10 = vand.u32 4294901760, %v7929_v6  ;;  %v7976_v36 = vsub.f32 %v267_v7, %v7939_v28 }
  0xd7   :  { %10762 = vst [vmem:[#allocation185_spill] sm:$0xff] %v7911_v34  ;;  %989 = vmatpush.msra.mxu1 %v7698_v42  ;;  %1189 = vmatpush.msrb.mxu0 %v7741_v2  ;;  %v7982_v32 = vand.u32 4294901760, %v1357_v48  ;;  %v7997_v48 = vand.u32 4294901760, %v264_v23 }
  0xd8   :  { %10763 = vst [vmem:[#allocation186_spill] sm:$0xff] %v7924_v17  ;;  %1271 = vmatpush.msrb.mxu2 %v7521_v26  ;;  %1155 = vmatpush.msra.mxu3 %v7805_v19  ;;  %v10768_v26 = vand.u32 4294901760, %v7890_v9  ;;  %v7985_v29 = vand.u32 4294901760, %v7946_v53  ;;  %v1375_v51 = vsub.f32 %v7929_v6, %v7966_v10  ;;  %v8011_v30 = vand.u32 4294901760, %v7976_v36 }
  0xd9   :  { %10764 = vst [vmem:[#allocation187_spill] sm:$0xff] %v7929_v6  ;;  %991 = vmatpush.msra.mxu1 %v7717_v0  ;;  %1191 = vmatpush.msrb.mxu0 %v7760_v38 }
  0xda   :  { %10765 = vst [vmem:[#allocation188_spill] sm:$0xff] %v7937_v14  ;;  %v1001_v19 = vsub.f32 %v7890_v9, %v10768_v26  ;;  %1273 = vmatpush.msrb.mxu2 %v7527_v40  ;;  %1308 = vmatpush.msrb.mxu3 %v7825_v56  ;;  %v1363_v26 = vsub.f32 %v7906_v13, %v7937_v14  ;;  %v7978_v40 = vand.u32 4294901760, %v265_v16 }
  0xdb   :  { %10766 = vst [vmem:[#allocation189_spill] sm:$0xff] %v7946_v53  ;;  %993 = vmatpush.msra.mxu1 %v7741_v2  ;;  %1193 = vmatpush.msrb.mxu0 %v7777_v47  ;;  %v1369_v13 = vsub.f32 %v7924_v17, %v7959_v52  ;;  %v8016_v17 = vand.u32 4294901760, %v263_v12  ;;  %v1381_v6 = vsub.f32 %v7946_v53, %v7985_v29 }
  0xdc   :  { %10767 = vst [vmem:[#allocation190_spill] sm:$0xff] %v7953_v25  ;;  %1104 = vmatmul.f32.vlgmr.msra.gmra.mxu2 %v7855_v41  ;;  %1310 = vmatpush.msrb.mxu3 %v7847_v27  ;;  %v1002_v7 = vand.u32 4294901760, %v1001_v19  ;;  %v8008_v19 = vand.u32 4294901760, %v1363_v26  ;;  %v261_v26 = vld [vmem:[%s10234_s2 + $0x198] sm:$0xff] }
  0xdd   :  { %10769 = vst [vmem:[#allocation191_spill] sm:$0xff] %v7959_v52  ;;  %1275 = vmatpush.msrb.mxu2 %v7543_v54  ;;  %1353 = vmatpush.msra.mxu0 %v7953_v25  ;;  %v262_v25 = vld [vmem:[%s10234_s2 + $0x1a0] sm:$0xff]  ;;  %v8014_v54 = vsub.f32 %v265_v16, %v7978_v40  ;;  %v8027_v16 = vand.u32 4294901760, %v1369_v13  ;;  %v1387_v13 = vsub.f32 %v7976_v36, %v8011_v30 }
  0xde   :  { %10770 = vst [vmem:[#allocation192_spill] sm:$0xff] %v7966_v10  ;;  %995 = vmatpush.msra.mxu1 %v7760_v38  ;;  %1158 = vmatmul.f32.vlgmr.msra.gmra.mxu3 %v7890_v9  ;;  %v8030_v10 = vand.u32 4294901760, %v7995_v22  ;;  %v8035_v52 = vand.u32 4294901760, %v262_v25 }
  0xdf   :  { %10771 = vst [vmem:[#allocation193_spill] sm:$0xff] %v7976_v36  ;;  %1277 = vmatpush.msrb.mxu2 %v7555_v44  ;;  %1312 = vmatpush.msrb.mxu3 %v7871_v58  ;;  %v94_v44 = vperm.slane %v7739_v3, 4  ;;  %v8039_v3 = vand.u32 4294901760, %v1375_v51  ;;  %v8058_v51 = vand.u32 4294901760, %v1381_v6  ;;  %v8079_v6 = vand.u32 4294901760, %v1387_v13 }
  0xe0   :  { %10772 = vst [vmem:[#allocation194_spill] sm:$0xff] %v7982_v32  ;;  %1359 = vmatpush.msra.mxu0 %v7982_v32  ;;  %997 = vmatpush.msra.mxu1 %v7777_v47  ;;  %v8033_v32 = vsub.f32 %v264_v23, %v7997_v48  ;;  %v8049_v23 = vand.u32 4294901760, %v8014_v54  ;;  %v8068_v53 = vsub.f32 %v262_v25, %v8035_v52 }
  0xe1   :  { %10773 = vst [vmem:[#allocation195_spill] sm:$0xff] %v7985_v29  ;;  %1003 = vmatmul.f32.vlgmr.msra.gmra.mxu1 %v1002_v7  ;;  %1279 = vmatpush.msrb.mxu2 %v7567_v60  ;;  %v260_v7 = vld [vmem:[%s10234_s2 + $0x190] sm:$0xff]  ;;  %v8054_v60 = vand.u32 4294901760, %v261_v26 }
  0xe2   :  { %10774 = vst [vmem:[#allocation196_spill] sm:$0xff] %v7995_v22  ;;  %1204 = vmatpush.msrb.mxu1 %v7560_v63  ;;  %1314 = vmatpush.msrb.mxu3 %v7892_v39  ;;  %v8052_v63 = vsub.f32 %v263_v12, %v8016_v17  ;;  %v8065_v36 = vand.u32 4294901760, %v8033_v32  ;;  %v187_v12 = vpop.f32.mrf.mxu3  ;;  %v1399_v25 = vsub.f32 %v8014_v54, %v8049_v23 }
  0xe3   :  { %10775 = vst [vmem:[#allocation197_spill] sm:$0xff] %v7997_v48  ;;  %1365 = vmatpush.msra.mxu0 %v8008_v19  ;;  %1281 = vmatpush.msrb.mxu2 %v7589_v21  ;;  %v1393_v21 = vsub.f32 %v7995_v22, %v8030_v10  ;;  %v10795_v22 = vand.u32 4294901760, %v7890_v9 }
  0xe4   :  { %10776 = vst [vmem:[#allocation198_spill] sm:$0xff] %v8008_v19  ;;  %1208 = vmatpush.msrb.mxu1 %v7575_v37  ;;  %1316 = vmatpush.msrb.mxu3 %v7901_v59  ;;  %v104_v19 = vperm.slane %v94_v44, 0  ;;  %v8070_v37 = vand.u32 4294901760, %v260_v7  ;;  %v259_v44 = vld [vmem:[%s10234_s2 + $0x188] sm:$0xff] }
  0xe5   :  { %10777 = vst [vmem:[#allocation199_spill] sm:$0xff] %v8011_v30  ;;  %1371 = vmatpush.msra.mxu0 %v8027_v16  ;;  %1283 = vmatpush.msrb.mxu2 %v7602_v50  ;;  %v8087_v50 = vsub.f32 %v261_v26, %v8054_v60  ;;  %v1405_v26 = vsub.f32 %v8033_v32, %v8065_v36 }
  0xe6   :  { %10778 = vst [vmem:[#allocation200_spill] sm:$0xff] %v8014_v54  ;;  %1212 = vmatpush.msrb.mxu1 %v7597_v20  ;;  %1318 = vmatpush.msrb.mxu3 %v7913_v24  ;;  %v258_v20 = vld [vmem:[%s10234_s2 + $0x180] sm:$0xff]  ;;  %v8095_v13 = vadd.f32 %v187_v12, %v104_v19  ;;  %v8106_v54 = vand.u32 4294901760, %v8068_v53 }
  0xe7   :  { %10779 = vst [vmem:[#allocation201_spill] sm:$0xff] %v8016_v17  ;;  %1377 = vmatpush.msra.mxu0 %v8039_v3  ;;  %1285 = vmatpush.msrb.mxu2 %v7613_v43  ;;  %v8101_v43 = vand.u32 4294901760, %v1393_v21  ;;  %v8113_v9 = vand.u32 4294901760, %v258_v20  ;;  %v8117_v21 = vand.u32 4294901760, %v1399_v25  ;;  %v8122_v12 = vand.u32 4294901760, %v8087_v50 }
  0xe8   :  { %10780 = vst [vmem:[#allocation202_spill] sm:$0xff] %v8027_v16  ;;  %v8084_v16 = vand.u32 4294901760, %v8052_v63  ;;  %1197 = vmatmul.f32.vlgmr.msrb.gmra.mxu0 %v10795_v22  ;;  %1216 = vmatpush.msrb.mxu1 %v7611_v11  ;;  %v8109_v22 = vsub.f32 %v260_v7, %v8070_v37  ;;  %v8127_v7 = vand.u32 4294901760, %v8095_v13  ;;  %v8134_v25 = vand.u32 4294901760, %v1405_v26 }
  0xe9   :  { %10781 = vst [vmem:[#allocation203_spill] sm:$0xff] %v8030_v10  ;;  %1320 = vmatpush.msrb.mxu3 %v7939_v28  ;;  %1383 = vmatpush.msra.mxu0 %v8058_v51  ;;  %v1423_v26 = vsub.f32 %v8087_v50, %v8122_v12 }
  0xea   :  { %10782 = vst [vmem:[#allocation204_spill] sm:$0xff] %v8033_v32  ;;  %1220 = vmatpush.msrb.mxu1 %v7630_v62  ;;  %1287 = vmatpush.msrb.mxu2 %v7642_v4  ;;  %v1411_v19 = vsub.f32 %v8052_v63, %v8084_v16  ;;  %v8139_v62 = vand.u32 4294901760, %v8109_v22 }
  0xeb   :  { %10783 = vst [vmem:[#allocation205_spill] sm:$0xff] %v8035_v52  ;;  %1322 = vmatpush.msrb.mxu3 %v7961_v18  ;;  %1389 = vmatpush.msra.mxu0 %v8079_v6 }
  0xec   :  { %10784 = vst [vmem:[#allocation206_spill] sm:$0xff] %v8039_v3  ;;  %v8097_v3 = vand.u32 4294901760, %v259_v44  ;;  %1224 = vmatpush.msrb.mxu1 %v7657_v5  ;;  %1289 = vmatpush.msrb.mxu2 %v7659_v61  ;;  %v8144_v5 = vsub.f32 %v258_v20, %v8113_v9 }
  0xed   :  { %10785 = vst [vmem:[#allocation207_spill] sm:$0xff] %v8049_v23  ;;  %1324 = vmatpush.msrb.mxu3 %v7978_v40  ;;  %1395 = vmatpush.msra.mxu0 %v8101_v43 }
  0xee   :  { %10786 = vst [vmem:[#allocation208_spill] sm:$0xff] %v8052_v63  ;;  %1228 = vmatpush.msrb.mxu1 %v7668_v45  ;;  %1291 = vmatpush.msrb.mxu2 %v7678_v33 }
  0xef   :  { %10787 = vst [vmem:[#allocation209_spill] sm:$0xff] %v8054_v60  ;;  %1326 = vmatpush.msrb.mxu3 %v7997_v48  ;;  %1401 = vmatpush.msra.mxu0 %v8117_v21 }
  0xf0   :  { %10788 = vst [vmem:[#allocation210_spill] sm:$0xff] %v8058_v51  ;;  %v8130_v51 = vsub.f32 %v259_v44, %v8097_v3  ;;  %v8148_v44 = vand.u32 4294901760, %v1411_v19  ;;  %1232 = vmatpush.msrb.mxu1 %v7685_v15  ;;  %1293 = vmatpush.msrb.mxu2 %v7698_v42  ;;  %v8170_v15 = vand.u32 4294901760, %v8144_v5 }
  0xf1   :  { %10789 = vst [vmem:[#allocation211_spill] sm:$0xff] %v8065_v36  ;;  %1328 = vmatpush.msrb.mxu3 %v8016_v17  ;;  %1407 = vmatpush.msra.mxu0 %v8134_v25 }
  0xf2   :  { %10790 = vst [vmem:[#allocation212_spill] sm:$0xff] %v8068_v53  ;;  %v8159_v20 = vand.u32 4294901760, %v8130_v51  ;;  %1236 = vmatpush.msrb.mxu1 %v7712_v46  ;;  %1295 = vmatpush.msrb.mxu2 %v7717_v0 }
  0xf3   :  { %10791 = vst [vmem:[#allocation213_spill] sm:$0xff] %v8070_v37  ;;  %1330 = vmatpush.msrb.mxu3 %v8035_v52  ;;  %1413 = vmatpush.msra.mxu0 %v8148_v44 }
  0xf4   :  { %10792 = vst [vmem:[#allocation214_spill] sm:$0xff] %v8079_v6  ;;  %v1417_v6 = vsub.f32 %v8068_v53, %v8106_v54  ;;  %1240 = vmatpush.msrb.mxu1 %v7731_v1  ;;  %1297 = vmatpush.msrb.mxu2 %v7741_v2 }
  0xf5   :  { %10793 = vst [vmem:[#allocation215_spill] sm:$0xff] %v8084_v16  ;;  %1332 = vmatpush.msrb.mxu3 %v8054_v60 }
  0xf6   :  { %10794 = vst [vmem:[#allocation216_spill] sm:$0xff] %v8087_v50  ;;  %v8163_v19 = vand.u32 4294901760, %v1417_v6  ;;  %v1435_v6 = vsub.f32 %v8130_v51, %v8159_v20  ;;  %1244 = vmatpush.msrb.mxu1 %v7755_v31  ;;  %1299 = vmatpush.msrb.mxu2 %v7760_v38 }
  0xf7   :  { %10796 = vst [vmem:[#allocation217_spill] sm:$0xff] %v8095_v13  ;;  %1334 = vmatpush.msrb.mxu3 %v8070_v37 }
  0xf8   :  { %10797 = vst [vmem:[#allocation218_spill] sm:$0xff] %v8097_v3  ;;  %1419 = vmatpush.msra.mxu0 %v8163_v19  ;;  %1248 = vmatpush.msrb.mxu1 %v7772_v57 }
  0xf9   :  { %10798 = vst [vmem:[#allocation219_spill] sm:$0xff] %v8101_v43  ;;  %v8156_v43 = vsub.f32 %v8095_v13, %v8127_v7  ;;  %v8174_v13 = vand.u32 4294901760, %v1423_v26  ;;  %v1441_v26 = vsub.f32 %v8144_v5, %v8170_v15  ;;  %1301 = vmatpush.msrb.mxu2 %v7777_v47  ;;  %1336 = vmatpush.msrb.mxu3 %v8097_v3 }
  0xfa   :  { %10799 = vst [vmem:[#allocation220_spill] sm:$0xff] %v8106_v54  ;;  %1303 = vmatmul.f32.vlgmr.msrb.gmra.mxu2 %v7855_v41  ;;  %1252 = vmatpush.msrb.mxu1 %v7788_v35 }
  0xfb   :  { %10800 = vst [vmem:[#allocation221_spill] sm:$0xff] %v8109_v22  ;;  %1425 = vmatpush.msra.mxu0 %v8174_v13  ;;  %1504 = vmatpush.msra.mxu2 %v7825_v56 }
  0xfc   :  { %10801 = vst [vmem:[#allocation222_spill] sm:$0xff] %v8113_v9  ;;  %1338 = vmatpush.msrb.mxu3 %v8113_v9  ;;  %1256 = vmatpush.msrb.mxu1 %v7802_v55 }
  0xfd   :  { %10802 = vst [vmem:[#allocation223_spill] sm:$0xff] %v8117_v21  ;;  %v1429_v21 = vsub.f32 %v8109_v22, %v8139_v62  ;;  %1506 = vmatpush.msra.mxu2 %v7847_v27 }
  0xfe   :  { %10803 = vst [vmem:[#allocation224_spill] sm:$0xff] %v8122_v12  ;;  %1545 = vmatpush.msra.mxu3 %v7886_v8  ;;  %1260 = vmatpush.msrb.mxu1 %v7819_v49  ;;  %v10821_v8 = vld [vmem:[#allocation184_spill] sm:$0xff] }
  0xff   :  { %10804 = vst [vmem:[#allocation225_spill] sm:$0xff] %v8130_v51  ;;  %v8183_v46 = vand.u32 4294901760, %v1429_v21  ;;  %v10814_v21 = vand.u32 4294901760, %v8156_v43  ;;  %1508 = vmatpush.msra.mxu2 %v7871_v58 }
 0x100   :  { %10805 = vst [vmem:[#allocation226_spill] sm:$0xff] %v8134_v25  ;;  %v8193_v25 = vand.u32 4294901760, %v1435_v6  ;;  %1549 = vmatpush.msra.mxu3 %v7911_v34  ;;  %v10820_v34 = vld [vmem:[#allocation192_spill] sm:$0xff] }
 0x101   :  { %10806 = vst [vmem:[#allocation227_spill] sm:$0xff] %v8139_v62  ;;  %1431 = vmatpush.msra.mxu0 %v8183_v46  ;;  %1510 = vmatpush.msra.mxu2 %v7892_v39 }
 0x102   :  { %10807 = vst [vmem:[#allocation228_spill] sm:$0xff] %v8144_v5  ;;  %1553 = vmatpush.msra.mxu3 %v7937_v14  ;;  %v10819_v14 = vld [vmem:[#allocation181_spill] sm:$0xff] }
 0x103   :  { %10808 = vst [vmem:[#allocation229_spill] sm:$0xff] %v8148_v44  ;;  %v8202_v44 = vand.u32 4294901760, %v1441_v26  ;;  %1437 = vmatpush.msra.mxu0 %v8193_v25  ;;  %1512 = vmatpush.msra.mxu2 %v7901_v59  ;;  %v10817_v26 = vld [vmem:[#allocation178_spill] sm:$0xff] }
 0x104   :  { %10809 = vst [vmem:[#allocation230_spill] sm:$0xff] %v8159_v20 }
 0x105   :  { %10810 = vst [vmem:[#allocation231_spill] sm:$0xff] %v8163_v19  ;;  %v1342_v19 = vsub.f32 %v8156_v43, %v10814_v21  ;;  %1443 = vmatpush.msra.mxu0 %v8202_v44  ;;  %v10818_v21 = vld [vmem:[#allocation191_spill] sm:$0xff]  ;;  %1514 = vmatpush.msra.mxu2 %v7913_v24 }
 0x106   :  { %10811 = vst [vmem:[#allocation232_spill] sm:$0xff] %v8170_v15  ;;  %1557 = vmatpush.msra.mxu3 %v10818_v21  ;;  %1445 = vmatmul.f32.vlgmr.msra.gmra.mxu0 %v8127_v7  ;;  %v10822_v21 = vld [vmem:[#allocation186_spill] sm:$0xff] }
 0x107   :  { %10812 = vst [vmem:[#allocation233_spill] sm:$0xff] %v8183_v46  ;;  %v1343_v6 = vand.u32 4294901760, %v1342_v19  ;;  %1612 = vmatpush.msrb.mxu0 %v7825_v56  ;;  %v10816_v19 = vld [vmem:[#allocation176_spill] sm:$0xff]  ;;  %1516 = vmatpush.msra.mxu2 %v7939_v28 }
 0x108   :  { %10813 = vst [vmem:[#allocation234_spill] sm:$0xff] %v8193_v25  ;;  %1264 = vmatpush.msrb.mxu1 %v10816_v19  ;;  %1561 = vmatpush.msra.mxu3 %v10820_v34 }
 0x109   :  { %10815 = vst [vmem:[#allocation235_spill] sm:$0xff] %v8202_v44  ;;  %1344 = vmatmul.f32.vlgmr.msrb.gmra.mxu3 %v1343_v6  ;;  %1614 = vmatpush.msrb.mxu0 %v7847_v27  ;;  %v47_v6 = vld [vmem:[%s10235_s4 + $0x10] sm:$0x7]  ;;  %v10823_v44 = vld [vmem:[#allocation187_spill] sm:$0xff] }
 0x10a   :  { %1266 = vmatmul.f32.vlgmr.msrb.gmra.mxu1 %v7855_v41  ;;  %v95_v41 = vperm.slane %v47_v6, 0  ;;  %1565 = vmatpush.msra.mxu3 %v7985_v29  ;;  %v207_v6 = vpop.f32.mrf.mxu0  ;;  %v10824_v29 = vld [vmem:[#allocation189_spill] sm:$0xff] }
 0x10b   :  { %1451 = vmatpush.msra.mxu1 %v10817_v26  ;;  %1616 = vmatpush.msrb.mxu0 %v7871_v58 }
 0x10c   :  { %1518 = vmatpush.msra.mxu2 %v7961_v18  ;;  %1569 = vmatpush.msra.mxu3 %v8011_v30  ;;  %v105_v34 = vperm.slane %v95_v41, 0  ;;  %v10826_v41 = vld [vmem:[#allocation193_spill] sm:$0xff] }
 0x10d   :  { %1454 = vmatpush.msra.mxu1 %v10819_v14  ;;  %1618 = vmatpush.msrb.mxu0 %v7892_v39 }
 0x10e   :  { %1520 = vmatpush.msra.mxu2 %v7978_v40  ;;  %1573 = vmatpush.msra.mxu3 %v8030_v10  ;;  %v8248_v30 = vadd.f32 %v207_v6, %v105_v34  ;;  %v10827_v10 = vld [vmem:[#allocation196_spill] sm:$0xff] }
 0x10f   :  { %1457 = vmatpush.msra.mxu1 %v10821_v8  ;;  %1620 = vmatpush.msrb.mxu0 %v7901_v59  ;;  %v10828_v6 = vld [vmem:[#allocation200_spill] sm:$0xff] }
 0x110   :  { %1522 = vmatpush.msra.mxu2 %v7997_v48  ;;  %1577 = vmatpush.msra.mxu3 %v8049_v23  ;;  %10825 = vst [vmem:[#allocation176_spill] sm:$0xff] %v8248_v30  ;;  %v282_v34 = vsel %vm280_vm1, %v8248_v30, 0  ;;  %v278_v30 = vld [vmem:[%s10234_s2 + $0x220] sm:$0xff] }
 0x111   :  { %1460 = vmatpush.msra.mxu1 %v10822_v21  ;;  %1622 = vmatpush.msrb.mxu0 %v7913_v24 }
 0x112   :  { %1524 = vmatpush.msra.mxu2 %v8016_v17  ;;  %1581 = vmatpush.msra.mxu3 %v8065_v36  ;;  %v279_v36 = vld [vmem:[%s10234_s2 + $0x228] sm:$0xff] }
 0x113   :  { %1463 = vmatpush.msra.mxu1 %v10823_v44  ;;  %1624 = vmatpush.msrb.mxu0 %v7939_v28  ;;  %v8273_v23 = vand.u32 4294901760, %v279_v36 }
 0x114   :  { %1526 = vmatpush.msra.mxu2 %v8035_v52  ;;  %1585 = vmatpush.msra.mxu3 %v8084_v16  ;;  %v8269_v16 = vand.u32 4294901760, %v282_v34 }
 0x115   :  { %1466 = vmatpush.msra.mxu1 %v10824_v29  ;;  %1626 = vmatpush.msrb.mxu0 %v7961_v18 }
 0x116   :  { %1528 = vmatpush.msra.mxu2 %v8054_v60  ;;  %1589 = vmatpush.msra.mxu3 %v8106_v54  ;;  %v8286_v54 = vsub.f32 %v282_v34, %v8269_v16  ;;  %v10831_v34 = vand.u32 4294901760, %v8156_v43 }
 0x117   :  { %1469 = vmatpush.msra.mxu1 %v10826_v41  ;;  %1628 = vmatpush.msrb.mxu0 %v7978_v40 }
 0x118   :  { %1530 = vmatpush.msra.mxu2 %v8070_v37  ;;  %1593 = vmatpush.msra.mxu3 %v8122_v12  ;;  %v277_v12 = vld [vmem:[%s10234_s2 + $0x218] sm:$0xff] }
 0x119   :  { %1472 = vmatpush.msra.mxu1 %v10827_v10  ;;  %1630 = vmatpush.msrb.mxu0 %v7997_v48 }
 0x11a   :  { %1532 = vmatpush.msra.mxu2 %v8097_v3  ;;  %1597 = vmatpush.msra.mxu3 %v8139_v62  ;;  %v8295_v62 = vsub.f32 %v279_v36, %v8273_v23  ;;  %v275_v36 = vld [vmem:[%s10234_s2 + $0x208] sm:$0xff] }
 0x11b   :  { %1475 = vmatpush.msra.mxu1 %v10828_v6  ;;  %1632 = vmatpush.msrb.mxu0 %v8016_v17 }
 0x11c   :  { %1534 = vmatpush.msra.mxu2 %v8113_v9  ;;  %1601 = vmatpush.msra.mxu3 %v8159_v20  ;;  %10830 = vst [vmem:[#allocation181_spill] sm:$0xff] %v8295_v62 }
 0x11d   :  { %1478 = vmatpush.msra.mxu1 %v8033_v32  ;;  %1634 = vmatpush.msrb.mxu0 %v8035_v52  ;;  %v8290_v52 = vand.u32 4294901760, %v278_v30 }
 0x11e   :  { %1538 = vmatmul.f32.vlgmr.msra.gmra.mxu2 %v10831_v34  ;;  %1605 = vmatpush.msra.mxu3 %v8170_v15  ;;  %v274_v15 = vld [vmem:[%s10234_s2 + $0x200] sm:$0xff] }
 0x11f   :  { %1481 = vmatpush.msra.mxu1 %v8052_v63  ;;  %1636 = vmatpush.msrb.mxu0 %v8054_v60  ;;  %10829 = vst [vmem:[#allocation178_spill] sm:$0xff] %v8290_v52  ;;  %v276_v60 = vld [vmem:[%s10234_s2 + $0x210] sm:$0xff]  ;;  %v8313_v20 = vsub.f32 %v278_v30, %v8290_v52  ;;  %v10838_v63 = vld [vmem:[#allocation2_spill] sm:$0xff] }
 0x120   :  { %1659 = vmatpush.msrb.mxu2 %v8273_v23  ;;  %1607 = vmatmul.f32.vlgmr.msra.gmra.mxu3 %v8127_v7  ;;  %v8315_v34 = vand.u32 4294901760, %v276_v60 }
 0x121   :  { %1484 = vmatpush.msra.mxu1 %v8068_v53  ;;  %1638 = vmatpush.msrb.mxu0 %v8070_v37  ;;  %v8303_v53 = vand.u32 4294901760, %v277_v12  ;;  %10832 = vst [vmem:[#allocation184_spill] sm:$0xff] %v8313_v20  ;;  %v8324_v37 = vand.u32 4294901760, %v8295_v62 }
 0x122   :  { %10833 = vst [vmem:[#allocation186_spill] sm:$0xff] %v8315_v34  ;;  %1661 = vmatpush.msrb.mxu2 %v8290_v52  ;;  %1742 = vmatpush.msrb.mxu3 %v8295_v62 }
 0x123   :  { %1487 = vmatpush.msra.mxu1 %v8087_v50  ;;  %1640 = vmatpush.msrb.mxu0 %v8097_v3  ;;  %10834 = vst [vmem:[#allocation187_spill] sm:$0xff] %v8324_v37  ;;  %v8329_v30 = vsub.f32 %v277_v12, %v8303_v53  ;;  %v8331_v3 = vand.u32 4294901760, %v275_v36  ;;  %v8336_v50 = vand.u32 4294901760, %v8313_v20  ;;  %v10841_v12 = vand.u32 4294901760, %v8286_v54 }
 0x124   :  { %1663 = vmatpush.msrb.mxu2 %v8303_v53  ;;  %1745 = vmatpush.msrb.mxu3 %v8313_v20 }
 0x125   :  { %1490 = vmatpush.msra.mxu1 %v8109_v22  ;;  %1642 = vmatpush.msrb.mxu0 %v8113_v9  ;;  %10835 = vst [vmem:[#allocation189_spill] sm:$0xff] %v8329_v30  ;;  %v8341_v22 = vsub.f32 %v276_v60, %v8315_v34  ;;  %v8343_v9 = vand.u32 4294901760, %v274_v15  ;;  %v1673_v32 = vsub.f32 %v8286_v54, %v10841_v12  ;;  %v8353_v17 = vand.u32 4294901760, %v8329_v30  ;;  %v10843_v60 = vld [vmem:[#allocation3_spill] sm:$0xff] }
 0x126   :  { %10836 = vst [vmem:[#allocation193_spill] sm:$0xff] %v8331_v3  ;;  %1644 = vmatmul.f32.vlgmr.msrb.gmra.mxu0 %v8127_v7  ;;  %1665 = vmatpush.msrb.mxu2 %v8315_v34  ;;  %v1692_v7 = vsub.f32 %v8295_v62, %v8324_v37  ;;  %v8358_v25 = vsub.f32 %v275_v36, %v8331_v3  ;;  %v10847_v36 = vld [vmem:[#allocation5_spill] sm:$0xff] }
 0x127   :  { %10837 = vst [vmem:[#allocation196_spill] sm:$0xff] %v8336_v50  ;;  %1868 = vmatpush.msra.mxu0 %v10838_v63  ;;  %1493 = vmatpush.msra.mxu1 %v8130_v51  ;;  %v1698_v12 = vsub.f32 %v8313_v20, %v8336_v50  ;;  %v8365_v51 = vand.u32 4294901760, %v8341_v22  ;;  %v1674_v62 = vand.u32 4294901760, %v1673_v32  ;;  %v8370_v6 = vsub.f32 %v274_v15, %v8343_v9  ;;  %v10850_v32 = vld [vmem:[#allocation6_spill] sm:$0xff] }
 0x128   :  { %10839 = vst [vmem:[#allocation2_spill] sm:$0xff] %v8341_v22  ;;  %1748 = vmatpush.msrb.mxu3 %v8329_v30  ;;  %1667 = vmatpush.msrb.mxu2 %v8331_v3  ;;  %v1704_v20 = vsub.f32 %v8329_v30, %v8353_v17  ;;  %v8379_v48 = vand.u32 4294901760, %v8358_v25 }
 0x129   :  { %10840 = vst [vmem:[#allocation236_spill] sm:$0xff] %v8343_v9  ;;  %1870 = vmatpush.msra.mxu0 %v10843_v60  ;;  %1496 = vmatpush.msra.mxu1 %v8144_v5  ;;  %v8374_v5 = vand.u32 4294901760, %v1692_v7  ;;  %v1710_v15 = vsub.f32 %v8341_v22, %v8365_v51  ;;  %v8390_v7 = vand.u32 4294901760, %v8370_v6 }
 0x12a   :  { %10842 = vst [vmem:[#allocation237_spill] sm:$0xff] %v8353_v17  ;;  %1499 = vmatmul.f32.vlgmr.msra.gmra.mxu1 %v8156_v43  ;;  %1751 = vmatpush.msrb.mxu3 %v8341_v22  ;;  %v8385_v43 = vand.u32 4294901760, %v1698_v12  ;;  %v8395_v30 = vand.u32 4294901760, %v1704_v20  ;;  %v1716_v46 = vsub.f32 %v8358_v25, %v8379_v48  ;;  %v10854_v12 = vld [vmem:[#allocation8_spill] sm:$0xff]  ;;  %v10856_v20 = vld [vmem:[#allocation9_spill] sm:$0xff] }
 0x12b   :  { %10844 = vst [vmem:[#allocation3_spill] sm:$0xff] %v8358_v25  ;;  %1775 = vmatpush.msrb.mxu1 %v8273_v23  ;;  %1872 = vmatpush.msra.mxu0 %v10847_v36  ;;  %v1722_v22 = vsub.f32 %v8370_v6, %v8390_v7 }
 0x12c   :  { %10845 = vst [vmem:[#allocation238_spill] sm:$0xff] %v8365_v51  ;;  %1669 = vmatpush.msrb.mxu2 %v8343_v9  ;;  %1754 = vmatpush.msrb.mxu3 %v8358_v25  ;;  %v8411_v25 = vand.u32 4294901760, %v1716_v46  ;;  %v10862_v46 = vand.u32 4294901760, %v8286_v54 }
 0x12d   :  { %10846 = vst [vmem:[#allocation239_spill] sm:$0xff] %v8370_v6  ;;  %1777 = vmatpush.msrb.mxu1 %v8290_v52  ;;  %1874 = vmatpush.msra.mxu0 %v10850_v32 }
 0x12e   :  { %10848 = vst [vmem:[#allocation5_spill] sm:$0xff] %v8374_v5  ;;  %1675 = vmatmul.f32.vlgmr.msrb.gmra.mxu2 %v1674_v62  ;;  %1757 = vmatpush.msrb.mxu3 %v8370_v6  ;;  %v8403_v62 = vand.u32 4294901760, %v1710_v15  ;;  %v10859_v15 = vld [vmem:[#allocation10_spill] sm:$0xff]  ;;  %v8419_v6 = vand.u32 4294901760, %v1722_v22  ;;  %v10865_v22 = vld [vmem:[#allocation25_spill] sm:$0xff] }
 0x12f   :  { %10849 = vst [vmem:[#allocation240_spill] sm:$0xff] %v8379_v48  ;;  %1694 = vmatpush.msra.mxu2 %v8374_v5  ;;  %1779 = vmatpush.msrb.mxu1 %v8303_v53  ;;  %v10858_v5 = vld [vmem:[#allocation130_spill] sm:$0xff] }
 0x130   :  { %10851 = vst [vmem:[#allocation6_spill] sm:$0xff] %v8385_v43  ;;  %1876 = vmatpush.msra.mxu0 %v10854_v12  ;;  %1760 = vmatmul.f32.vlgmr.msrb.gmra.mxu3 %v8286_v54 }
 0x131   :  { %10852 = vst [vmem:[#allocation241_spill] sm:$0xff] %v8390_v7  ;;  %1700 = vmatpush.msra.mxu2 %v8385_v43  ;;  %1843 = vmatpush.msra.mxu3 %v8273_v23  ;;  %v1859_v43 = vmul.f32 %v10858_v5, %v10858_v5 }
 0x132   :  { %10853 = vst [vmem:[#allocation242_spill] sm:$0xff] %v8395_v30  ;;  %1781 = vmatpush.msrb.mxu1 %v8315_v34  ;;  %1878 = vmatpush.msra.mxu0 %v10856_v20 }
 0x133   :  { %10855 = vst [vmem:[#allocation8_spill] sm:$0xff] %v8403_v62  ;;  %1706 = vmatpush.msra.mxu2 %v8395_v30  ;;  %1845 = vmatpush.msra.mxu3 %v8290_v52  ;;  %v10861_v30 = vld [vmem:[#allocation14_spill] sm:$0xff]  ;;  %v8426_v5 = vand.u32 4294901760, %v1859_v43  ;;  %v10863_v52 = vld [vmem:[#allocation24_spill] sm:$0xff] }
 0x134   :  { %10857 = vst [vmem:[#allocation9_spill] sm:$0xff] %v8411_v25  ;;  %1783 = vmatpush.msrb.mxu1 %v8331_v3  ;;  %1880 = vmatpush.msra.mxu0 %v10859_v15 }
 0x135   :  { %1712 = vmatpush.msra.mxu2 %v8403_v62  ;;  %1847 = vmatpush.msra.mxu3 %v8303_v53  ;;  %10860 = vst [vmem:[#allocation10_spill] sm:$0xff] %v8419_v6  ;;  %v10864_v62 = vld [vmem:[#allocation28_spill] sm:$0xff]  ;;  %v8437_v54 = vsub.f32 %v1859_v43, %v8426_v5  ;;  %v10870_v43 = vld [vmem:[#allocation34_spill] sm:$0xff] }
 0x136   :  { %1785 = vmatpush.msrb.mxu1 %v8343_v9  ;;  %1882 = vmatpush.msra.mxu0 %v10861_v30 }
 0x137   :  { %1718 = vmatpush.msra.mxu2 %v8411_v25  ;;  %1789 = vmatmul.f32.vlgmr.msrb.gmra.mxu1 %v10862_v46  ;;  %v10866_v25 = vld [vmem:[#allocation30_spill] sm:$0xff]  ;;  %v10868_v46 = vld [vmem:[#allocation33_spill] sm:$0xff] }
 0x138   :  { %1849 = vmatpush.msra.mxu3 %v8315_v34  ;;  %1913 = vmatpush.msra.mxu1 %v10863_v52  ;;  %v10867_v52 = vld [vmem:[#allocation27_spill] sm:$0xff] }
 0x139   :  { %1884 = vmatpush.msra.mxu0 %v10864_v62  ;;  %1724 = vmatpush.msra.mxu2 %v8419_v6  ;;  %v10569_v6 = vand.u32 4294901760, %v8437_v54  ;;  %v10883_v34 = vld [vmem:[#allocation55_spill] sm:$0xff] }
 0x13a   :  { %1851 = vmatpush.msra.mxu3 %v8331_v3  ;;  %1919 = vmatpush.msra.mxu1 %v10865_v22  ;;  %v10869_v22 = vld [vmem:[#allocation31_spill] sm:$0xff] }
 0x13b   :  { %1726 = vmatmul.f32.vlgmr.msra.gmra.mxu2 %v8269_v16  ;;  %1886 = vmatpush.msra.mxu0 %v10866_v25  ;;  %v10879_v3 = vld [vmem:[#allocation51_spill] sm:$0xff] }
 0x13c   :  { %1806 = vmatpush.msrb.mxu2 %v8324_v37  ;;  %1853 = vmatpush.msra.mxu3 %v8343_v9  ;;  %v10871_v37 = vld [vmem:[#allocation36_spill] sm:$0xff] }
 0x13d   :  { %1925 = vmatpush.msra.mxu1 %v10867_v52  ;;  %1855 = vmatmul.f32.vlgmr.msra.gmra.mxu3 %v8269_v16  ;;  %v10872_v52 = vld [vmem:[#allocation39_spill] sm:$0xff]  ;;  %v10875_v9 = vld [vmem:[#allocation44_spill] sm:$0xff] }
 0x13e   :  { %1810 = vmatpush.msrb.mxu2 %v8336_v50  ;;  %1888 = vmatpush.msra.mxu0 %v10868_v46  ;;  %v10873_v50 = vld [vmem:[#allocation40_spill] sm:$0xff] }
 0x13f   :  { %2064 = vmatpush.msrb.mxu3 %v10838_v63  ;;  %1931 = vmatpush.msra.mxu1 %v10869_v22  ;;  %v10874_v22 = vld [vmem:[#allocation43_spill] sm:$0xff] }
 0x140   :  { %1814 = vmatpush.msrb.mxu2 %v8353_v17  ;;  %1890 = vmatpush.msra.mxu0 %v10870_v43  ;;  %v1902_v17 = vsub.f32 %v8437_v54, %v10569_v6  ;;  %v10880_v6 = vld [vmem:[#allocation52_spill] sm:$0xff] }
 0x141   :  { %2066 = vmatpush.msrb.mxu3 %v10843_v60  ;;  %1937 = vmatpush.msra.mxu1 %v10871_v37  ;;  %v10876_v37 = vld [vmem:[#allocation47_spill] sm:$0xff] }
 0x142   :  { %1818 = vmatpush.msrb.mxu2 %v8365_v51  ;;  %1892 = vmatpush.msra.mxu0 %v10872_v52  ;;  %v1903_v51 = vand.u32 4294901760, %v1902_v17  ;;  %v10886_v17 = vld [vmem:[#allocation58_spill] sm:$0xff] }
 0x143   :  { %2068 = vmatpush.msrb.mxu3 %v10847_v36  ;;  %1943 = vmatpush.msra.mxu1 %v10873_v50  ;;  %v10877_v50 = vld [vmem:[#allocation48_spill] sm:$0xff] }
 0x144   :  { %1822 = vmatpush.msrb.mxu2 %v8379_v48  ;;  %1894 = vmatpush.msra.mxu0 %v10874_v22  ;;  %v10878_v48 = vld [vmem:[#allocation4_spill] sm:$0xff] }
 0x145   :  { %2070 = vmatpush.msrb.mxu3 %v10850_v32  ;;  %1949 = vmatpush.msra.mxu1 %v10875_v9  ;;  %v10881_v9 = vld [vmem:[#allocation7_spill] sm:$0xff] }
 0x146   :  { %1826 = vmatpush.msrb.mxu2 %v8390_v7  ;;  %1896 = vmatpush.msra.mxu0 %v10876_v37  ;;  %v10882_v7 = vld [vmem:[#allocation11_spill] sm:$0xff] }
 0x147   :  { %2072 = vmatpush.msrb.mxu3 %v10854_v12  ;;  %1828 = vmatmul.f32.vlgmr.msrb.gmra.mxu2 %v8269_v16  ;;  %v10884_v16 = vld [vmem:[#allocation12_spill] sm:$0xff] }
 0x148   :  { %1955 = vmatpush.msra.mxu1 %v10877_v50  ;;  %2011 = vmatpush.msra.mxu2 %v10878_v48  ;;  %v10885_v50 = vld [vmem:[#allocation15_spill] sm:$0xff]  ;;  %v10887_v48 = vld [vmem:[#allocation13_spill] sm:$0xff] }
 0x149   :  { %1898 = vmatpush.msra.mxu0 %v10879_v3  ;;  %2074 = vmatpush.msrb.mxu3 %v10856_v20 }
 0x14a   :  { %1904 = vmatmul.f32.vlgmr.msra.gmra.mxu0 %v1903_v51  ;;  %1961 = vmatpush.msra.mxu1 %v10880_v6  ;;  %v10888_v51 = vld [vmem:[#allocation19_spill] sm:$0xff]  ;;  %v10889_v6 = vld [vmem:[#allocation60_spill] sm:$0xff] }
 0x14b   :  { %2014 = vmatpush.msra.mxu2 %v10881_v9  ;;  %2105 = vmatpush.msrb.mxu0 %v10882_v7  ;;  %v10890_v7 = vld [vmem:[#allocation16_spill] sm:$0xff] }
 0x14c   :  { %2076 = vmatpush.msrb.mxu3 %v10859_v15  ;;  %1967 = vmatpush.msra.mxu1 %v10883_v34  ;;  %v10891_v9 = vld [vmem:[#allocation20_spill] sm:$0xff]  ;;  %v10892_v34 = vld [vmem:[#allocation62_spill] sm:$0xff] }
 0x14d   :  { %2017 = vmatpush.msra.mxu2 %v10884_v16  ;;  %2109 = vmatpush.msrb.mxu0 %v10885_v50  ;;  %v10893_v16 = vld [vmem:[#allocation17_spill] sm:$0xff] }
 0x14e   :  { %2078 = vmatpush.msrb.mxu3 %v10861_v30  ;;  %1973 = vmatpush.msra.mxu1 %v10886_v17  ;;  %v10894_v50 = vld [vmem:[#allocation21_spill] sm:$0xff]  ;;  %v10895_v17 = vld [vmem:[#allocation64_spill] sm:$0xff] }
 0x14f   :  { %2020 = vmatpush.msra.mxu2 %v10887_v48  ;;  %2113 = vmatpush.msrb.mxu0 %v10888_v51  ;;  %v10896_v48 = vld [vmem:[#allocation18_spill] sm:$0xff] }
 0x150   :  { %2080 = vmatpush.msrb.mxu3 %v10864_v62  ;;  %1979 = vmatpush.msra.mxu1 %v10889_v6  ;;  %v10897_v51 = vld [vmem:[#allocation22_spill] sm:$0xff] }
 0x151   :  { %2023 = vmatpush.msra.mxu2 %v10890_v7  ;;  %2117 = vmatpush.msrb.mxu0 %v10891_v9  ;;  %v10898_v6 = vld [vmem:[#allocation66_spill] sm:$0xff]  ;;  %v10899_v7 = vld [vmem:[#allocation23_spill] sm:$0xff] }
 0x152   :  { %2082 = vmatpush.msrb.mxu3 %v10866_v25  ;;  %1985 = vmatpush.msra.mxu1 %v10892_v34  ;;  %v10900_v9 = vld [vmem:[#allocation26_spill] sm:$0xff]  ;;  %v10901_v34 = vld [vmem:[#allocation69_spill] sm:$0xff] }
 0x153   :  { %2026 = vmatpush.msra.mxu2 %v10893_v16  ;;  %2121 = vmatpush.msrb.mxu0 %v10894_v50  ;;  %v10902_v16 = vld [vmem:[#allocation32_spill] sm:$0xff]  ;;  %v10903_v50 = vld [vmem:[#allocation29_spill] sm:$0xff] }
 0x154   :  { %2084 = vmatpush.msrb.mxu3 %v10868_v46  ;;  %1991 = vmatpush.msra.mxu1 %v10895_v17  ;;  %v10904_v17 = vld [vmem:[#allocation35_spill] sm:$0xff] }
 0x155   :  { %2029 = vmatpush.msra.mxu2 %v10896_v48  ;;  %2125 = vmatpush.msrb.mxu0 %v10897_v51  ;;  %v10905_v48 = vld [vmem:[#allocation37_spill] sm:$0xff]  ;;  %v10906_v51 = vld [vmem:[#allocation38_spill] sm:$0xff] }
 0x156   :  { %2086 = vmatpush.msrb.mxu3 %v10870_v43  ;;  %1997 = vmatpush.msra.mxu1 %v10898_v6  ;;  %v10907_v6 = vld [vmem:[#allocation41_spill] sm:$0xff] }
 0x157   :  { %2032 = vmatpush.msra.mxu2 %v10899_v7  ;;  %2129 = vmatpush.msrb.mxu0 %v10900_v9  ;;  %v10908_v7 = vld [vmem:[#allocation42_spill] sm:$0xff]  ;;  %v10910_v9 = vld [vmem:[#allocation45_spill] sm:$0xff] }
 0x158   :  { %2088 = vmatpush.msrb.mxu3 %v10872_v52  ;;  %2003 = vmatpush.msra.mxu1 %v10901_v34  ;;  %v10911_v34 = vld [vmem:[#allocation84_spill] sm:$0xff] }
 0x159   :  { %2035 = vmatpush.msra.mxu2 %v10902_v16  ;;  %2133 = vmatpush.msrb.mxu0 %v10903_v50  ;;  %v10913_v16 = vld [vmem:[#allocation49_spill] sm:$0xff]  ;;  %v10914_v50 = vld [vmem:[#allocation88_spill] sm:$0xff] }
 0x15a   :  { %2005 = vmatmul.f32.vlgmr.msra.gmra.mxu1 %v8426_v5  ;;  %2090 = vmatpush.msrb.mxu3 %v10874_v22 }
 0x15b   :  { %2172 = vmatpush.msrb.mxu1 %v10838_v63  ;;  %2038 = vmatpush.msra.mxu2 %v10904_v17  ;;  %v10909_v63 = vand.u32 4294901760, %v8437_v54  ;;  %v10916_v17 = vld [vmem:[#allocation53_spill] sm:$0xff] }
 0x15c   :  { %2137 = vmatpush.msrb.mxu0 %v10905_v48  ;;  %2092 = vmatpush.msrb.mxu3 %v10876_v37  ;;  %v10917_v48 = vld [vmem:[#allocation92_spill] sm:$0xff] }
 0x15d   :  { %2174 = vmatpush.msrb.mxu1 %v10843_v60  ;;  %2041 = vmatpush.msra.mxu2 %v10906_v51  ;;  %v10912_v60 = vld [vmem:[#allocation46_spill] sm:$0xff] }
 0x15e   :  { %2141 = vmatpush.msrb.mxu0 %v10907_v6  ;;  %2094 = vmatpush.msrb.mxu3 %v10879_v3  ;;  %v10918_v51 = vld [vmem:[#allocation54_spill] sm:$0xff]  ;;  %v10919_v6 = vld [vmem:[#allocation56_spill] sm:$0xff] }
 0x15f   :  { %2176 = vmatpush.msrb.mxu1 %v10847_v36  ;;  %2044 = vmatpush.msra.mxu2 %v10908_v7  ;;  %v10915_v36 = vld [vmem:[#allocation50_spill] sm:$0xff]  ;;  %v10921_v7 = vld [vmem:[#allocation57_spill] sm:$0xff] }
 0x160   :  { %2098 = vmatmul.f32.vlgmr.msrb.gmra.mxu3 %v10909_v63  ;;  %2145 = vmatpush.msrb.mxu0 %v10910_v9  ;;  %v10922_v63 = vld [vmem:[#allocation59_spill] sm:$0xff] }
 0x161   :  { %2254 = vmatpush.msra.mxu3 %v10911_v34  ;;  %2178 = vmatpush.msrb.mxu1 %v10850_v32  ;;  %v10920_v32 = vld [vmem:[#allocation96_spill] sm:$0xff]  ;;  %v10924_v9 = vld [vmem:[#allocation63_spill] sm:$0xff]  ;;  %v10926_v34 = vld [vmem:[#allocation102_spill] sm:$0xff] }
 0x162   :  { %2047 = vmatpush.msra.mxu2 %v10912_v60  ;;  %2149 = vmatpush.msrb.mxu0 %v10913_v16  ;;  %v10928_v60 = vld [vmem:[#allocation68_spill] sm:$0xff] }
 0x163   :  { %2260 = vmatpush.msra.mxu3 %v10914_v50  ;;  %2180 = vmatpush.msrb.mxu1 %v10854_v12  ;;  %v10923_v12 = vld [vmem:[#allocation99_spill] sm:$0xff]  ;;  %v10929_v16 = vld [vmem:[#allocation104_spill] sm:$0xff]  ;;  %v10932_v50 = vld [vmem:[#allocation106_spill] sm:$0xff] }
 0x164   :  { %2050 = vmatpush.msra.mxu2 %v10915_v36  ;;  %2153 = vmatpush.msrb.mxu0 %v10916_v17  ;;  %v10933_v36 = vld [vmem:[#allocation70_spill] sm:$0xff]  ;;  %v10934_v17 = vld [vmem:[#allocation72_spill] sm:$0xff] }
 0x165   :  { %2266 = vmatpush.msra.mxu3 %v10917_v48  ;;  %2182 = vmatpush.msrb.mxu1 %v10856_v20  ;;  %v10925_v20 = vld [vmem:[#allocation61_spill] sm:$0xff]  ;;  %v10936_v48 = vld [vmem:[#allocation74_spill] sm:$0xff] }
 0x166   :  { %2053 = vmatpush.msra.mxu2 %v10918_v51  ;;  %2157 = vmatpush.msrb.mxu0 %v10919_v6  ;;  %v10937_v51 = vld [vmem:[#allocation75_spill] sm:$0xff]  ;;  %v10939_v6 = vld [vmem:[#allocation77_spill] sm:$0xff] }
 0x167   :  { %2272 = vmatpush.msra.mxu3 %v10920_v32  ;;  %2184 = vmatpush.msrb.mxu1 %v10859_v15  ;;  %v10927_v15 = vld [vmem:[#allocation65_spill] sm:$0xff]  ;;  %v10940_v32 = vld [vmem:[#allocation79_spill] sm:$0xff] }
 0x168   :  { %2056 = vmatpush.msra.mxu2 %v10921_v7  ;;  %2161 = vmatpush.msrb.mxu0 %v10922_v63  ;;  %v10942_v63 = vld [vmem:[#allocation110_spill] sm:$0xff] }
 0x169   :  { %2278 = vmatpush.msra.mxu3 %v10923_v12  ;;  %2059 = vmatmul.f32.vlgmr.msra.gmra.mxu2 %v8437_v54  ;;  %v10930_v54 = vld [vmem:[#allocation67_spill] sm:$0xff]  ;;  %v10944_v12 = vld [vmem:[#allocation82_spill] sm:$0xff] }
 0x16a   :  { %2186 = vmatpush.msrb.mxu1 %v10861_v30  ;;  %2209 = vmatpush.msrb.mxu2 %v10924_v9  ;;  %v10931_v30 = vld [vmem:[#allocation71_spill] sm:$0xff] }
 0x16b   :  { %2165 = vmatpush.msrb.mxu0 %v10925_v20  ;;  %2284 = vmatpush.msra.mxu3 %v10926_v34  ;;  %v10945_v20 = vld [vmem:[#allocation119_spill] sm:$0xff]  ;;  %v10947_v34 = vld [vmem:[#allocation86_spill] sm:$0xff] }
 0x16c   :  { %2167 = vmatmul.f32.vlgmr.msrb.gmra.mxu0 %v8426_v5  ;;  %2188 = vmatpush.msrb.mxu1 %v10864_v62  ;;  %v10935_v62 = vld [vmem:[#allocation107_spill] sm:$0xff] }
 0x16d   :  { %2211 = vmatpush.msrb.mxu2 %v10927_v15  ;;  %2352 = vmatpush.msra.mxu0 %v10928_v60 }
 0x16e   :  { %2290 = vmatpush.msra.mxu3 %v10929_v16  ;;  %2190 = vmatpush.msrb.mxu1 %v10866_v25  ;;  %v10938_v25 = vld [vmem:[#allocation109_spill] sm:$0xff]  ;;  %v10948_v16 = vld [vmem:[#allocation123_spill] sm:$0xff] }
 0x16f   :  { %2213 = vmatpush.msrb.mxu2 %v10930_v54  ;;  %2355 = vmatpush.msra.mxu0 %v10931_v30  ;;  %v10949_v30 = vld [vmem:[#allocation87_spill] sm:$0xff] }
 0x170   :  { %2296 = vmatpush.msra.mxu3 %v10932_v50  ;;  %2192 = vmatpush.msrb.mxu1 %v10868_v46  ;;  %v10941_v46 = vld [vmem:[#allocation131_spill] sm:$0xff]  ;;  %v10951_v50 = vld [vmem:[#allocation126_spill] sm:$0xff] }
 0x171   :  { %2215 = vmatpush.msrb.mxu2 %v10933_v36  ;;  %2358 = vmatpush.msra.mxu0 %v10934_v17  ;;  %v1860_v7 = vmul.f32 %v10941_v46, %v10941_v46 }
 0x172   :  { %2302 = vmatpush.msra.mxu3 %v10935_v62  ;;  %2194 = vmatpush.msrb.mxu1 %v10870_v43  ;;  %v10943_v43 = vld [vmem:[#allocation80_spill] sm:$0xff]  ;;  %v10953_v62 = vld [vmem:[#allocation94_spill] sm:$0xff] }
 0x173   :  { %2217 = vmatpush.msrb.mxu2 %v10936_v48  ;;  %2361 = vmatpush.msra.mxu0 %v10937_v51  ;;  %v8569_v60 = vand.u32 4294901760, %v1860_v7  ;;  %v10954_v51 = vld [vmem:[#allocation128_spill] sm:$0xff] }
 0x174   :  { %2308 = vmatpush.msra.mxu3 %v10938_v25  ;;  %2196 = vmatpush.msrb.mxu1 %v10872_v52  ;;  %v10946_v52 = vld [vmem:[#allocation83_spill] sm:$0xff]  ;;  %v10956_v25 = vld [vmem:[#allocation98_spill] sm:$0xff] }
 0x175   :  { %2219 = vmatpush.msrb.mxu2 %v10939_v6  ;;  %2364 = vmatpush.msra.mxu0 %v10940_v32  ;;  %v8580_v17 = vsub.f32 %v1860_v7, %v8569_v60  ;;  %v10958_v32 = vld [vmem:[#allocation108_spill] sm:$0xff]  ;;  %v10959_v7 = vld [vmem:[#allocation101_spill] sm:$0xff] }
 0x176   :  { %2314 = vmatpush.msra.mxu3 %v10942_v63  ;;  %2198 = vmatpush.msrb.mxu1 %v10874_v22  ;;  %v10950_v22 = vld [vmem:[#allocation90_spill] sm:$0xff] }
 0x177   :  { %2221 = vmatpush.msrb.mxu2 %v10943_v43  ;;  %2367 = vmatpush.msra.mxu0 %v10944_v12  ;;  %v2242_v63 = vand.u32 4294901760, %v8580_v17  ;;  %v10960_v12 = vld [vmem:[#allocation111_spill] sm:$0xff] }
 0x178   :  { %2320 = vmatpush.msra.mxu3 %v10945_v20  ;;  %2200 = vmatpush.msrb.mxu1 %v10876_v37  ;;  %v10952_v37 = vld [vmem:[#allocation91_spill] sm:$0xff]  ;;  %v10961_v20 = vld [vmem:[#allocation112_spill] sm:$0xff] }
 0x179   :  { %2223 = vmatpush.msrb.mxu2 %v10946_v52  ;;  %2370 = vmatpush.msra.mxu0 %v10947_v34  ;;  %v2243_v34 = vsub.f32 %v8580_v17, %v2242_v63 }
 0x17a   :  { %2326 = vmatpush.msra.mxu3 %v10948_v16  ;;  %2202 = vmatpush.msrb.mxu1 %v10879_v3  ;;  %v10955_v3 = vld [vmem:[#allocation95_spill] sm:$0xff]  ;;  %v322_v16 = vpop.f32.mrf.mxu1 }
 0x17b   :  { %2225 = vmatpush.msrb.mxu2 %v10949_v30  ;;  %2373 = vmatpush.msra.mxu0 %v10950_v22  ;;  %v10962_v22 = vld [vmem:[#allocation114_spill] sm:$0xff] }
 0x17c   :  { %2204 = vmatmul.f32.vlgmr.msrb.gmra.mxu1 %v8426_v5  ;;  %2332 = vmatpush.msra.mxu3 %v10951_v50  ;;  %v10957_v5 = vld [vmem:[#allocation129_spill] sm:$0xff]  ;;  %v10963_v50 = vld [vmem:[#allocation115_spill] sm:$0xff] }
 0x17d   :  { %2405 = vmatpush.msra.mxu1 %v10924_v9  ;;  %2227 = vmatpush.msrb.mxu2 %v10952_v37 }
 0x17e   :  { %2376 = vmatpush.msra.mxu0 %v10953_v62  ;;  %2338 = vmatpush.msra.mxu3 %v10954_v51  ;;  %v10964_v62 = vld [vmem:[#allocation117_spill] sm:$0xff]  ;;  %v10965_v51 = vld [vmem:[#allocation118_spill] sm:$0xff] }
 0x17f   :  { %2407 = vmatpush.msra.mxu1 %v10927_v15  ;;  %2229 = vmatpush.msrb.mxu2 %v10955_v3 }
 0x180   :  { %2379 = vmatpush.msra.mxu0 %v10956_v25  ;;  %2344 = vmatpush.msra.mxu3 %v10957_v5  ;;  %v2244_v25 = vand.u32 4294901760, %v2243_v34  ;;  %v10966_v5 = vld [vmem:[#allocation121_spill] sm:$0xff]  ;;  %v10971_v34 = vld [vmem:[#allocation132_spill] sm:$0xff] }
 0x181   :  { %2409 = vmatpush.msra.mxu1 %v10930_v54  ;;  %2231 = vmatpush.msrb.mxu2 %v10958_v32 }
 0x182   :  { %2346 = vmatmul.f32.vlgmr.msra.gmra.mxu3 %v8569_v60  ;;  %2382 = vmatpush.msra.mxu0 %v10959_v7  ;;  %v10967_v7 = vld [vmem:[#allocation122_spill] sm:$0xff] }
 0x183   :  { %2513 = vmatpush.msrb.mxu3 %v10924_v9  ;;  %2411 = vmatpush.msra.mxu1 %v10933_v36  ;;  %v423_v9 = vpop.f32.mrf.mxu2 }
 0x184   :  { %2233 = vmatpush.msrb.mxu2 %v10960_v12  ;;  %2385 = vmatpush.msra.mxu0 %v10961_v20  ;;  %v10968_v20 = vld [vmem:[#allocation73_spill] sm:$0xff] }
 0x185   :  { %2515 = vmatpush.msrb.mxu3 %v10927_v15  ;;  %2413 = vmatpush.msra.mxu1 %v10936_v48  ;;  %v424_v15 = vadd.f32 %v423_v9, %v322_v16  ;;  %v585_v16 = vpop.f32.mrf.mxu1 }
 0x186   :  { %2235 = vmatpush.msrb.mxu2 %v10962_v22  ;;  %2388 = vmatpush.msra.mxu0 %v10963_v50 }
 0x187   :  { %2517 = vmatpush.msrb.mxu3 %v10930_v54  ;;  %2415 = vmatpush.msra.mxu1 %v10939_v6  ;;  %v477_v54 = vpop.f32.mrf.mxu3 }
 0x188   :  { %2237 = vmatpush.msrb.mxu2 %v10964_v62  ;;  %2391 = vmatpush.msra.mxu0 %v10965_v51  ;;  %v478_v50 = vadd.f32 %v477_v54, %v424_v15  ;;  %v10969_v51 = vld [vmem:[#allocation125_spill] sm:$0xff]  ;;  %v10972_v15 = vld [vmem:[#allocation78_spill] sm:$0xff]  ;;  %v10975_v54 = vld [vmem:[#allocation135_spill] sm:$0xff] }
 0x189   :  { %2519 = vmatpush.msrb.mxu3 %v10933_v36  ;;  %2417 = vmatpush.msra.mxu1 %v10943_v43  ;;  %v10970_v36 = vld [vmem:[#allocation76_spill] sm:$0xff] }
 0x18a   :  { %2239 = vmatpush.msrb.mxu2 %v10966_v5  ;;  %2394 = vmatpush.msra.mxu0 %v10967_v7  ;;  %v10974_v7 = vld [vmem:[#allocation81_spill] sm:$0xff] }
 0x18b   :  { %2521 = vmatpush.msrb.mxu3 %v10936_v48  ;;  %2245 = vmatmul.f32.vlgmr.msrb.gmra.mxu2 %v2244_v25  ;;  %v516_v48 = vpop.f32.mrf.mxu0  ;;  %v10973_v25 = vld [vmem:[#allocation133_spill] sm:$0xff] }
 0x18c   :  { %2419 = vmatpush.msra.mxu1 %v10946_v52  ;;  %2446 = vmatpush.msra.mxu2 %v10968_v20  ;;  %v517_v9 = vadd.f32 %v516_v48, %v478_v50  ;;  %v10977_v20 = vld [vmem:[#allocation137_spill] sm:$0xff]  ;;  %v622_v50 = vpop.f32.mrf.mxu2 }
 0x18d   :  { %2397 = vmatpush.msra.mxu0 %v10969_v51  ;;  %2523 = vmatpush.msrb.mxu3 %v10939_v6  ;;  %v10978_v51 = vld [vmem:[#allocation89_spill] sm:$0xff] }
 0x18e   :  { %2400 = vmatmul.f32.vlgmr.msra.gmra.mxu0 %v8580_v17  ;;  %2421 = vmatpush.msra.mxu1 %v10949_v30  ;;  %v586_v6 = vadd.f32 %v585_v16, %v517_v9  ;;  %v10981_v16 = vld [vmem:[#allocation143_spill] sm:$0xff]  ;;  %v10982_v9 = vld [vmem:[#allocation174_spill] sm:$0xff] }
 0x18f   :  { %2450 = vmatpush.msra.mxu2 %v10970_v36  ;;  %2550 = vmatpush.msrb.mxu0 %v10971_v34  ;;  %v10979_v36 = vld [vmem:[#allocation140_spill] sm:$0xff]  ;;  %v663_v48 = vpop.f32.mrf.mxu3 }
 0x190   :  { %2525 = vmatpush.msrb.mxu3 %v10943_v43  ;;  %2423 = vmatpush.msra.mxu1 %v10952_v37  ;;  %v10976_v43 = vld [vmem:[#allocation85_spill] sm:$0xff] }
 0x191   :  { %2454 = vmatpush.msra.mxu2 %v10972_v15  ;;  %2552 = vmatpush.msrb.mxu0 %v10973_v25  ;;  %v1861_v15 = vmul.f32 %v10982_v9, %v10982_v9 }
 0x192   :  { %2527 = vmatpush.msrb.mxu3 %v10946_v52  ;;  %2425 = vmatpush.msra.mxu1 %v10955_v3  ;;  %v623_v52 = vadd.f32 %v622_v50, %v586_v6  ;;  %v10983_v6 = vld [vmem:[#allocation97_spill] sm:$0xff]  ;;  %v10986_v50 = vld [vmem:[#allocation147_spill] sm:$0xff] }
 0x193   :  { %2458 = vmatpush.msra.mxu2 %v10974_v7  ;;  %2554 = vmatpush.msrb.mxu0 %v10975_v54  ;;  %v10984_v7 = vld [vmem:[#allocation146_spill] sm:$0xff] }
 0x194   :  { %2529 = vmatpush.msrb.mxu3 %v10949_v30  ;;  %2427 = vmatpush.msra.mxu1 %v10958_v32  ;;  %v10980_v30 = vld [vmem:[#allocation93_spill] sm:$0xff]  ;;  %v857_v17 = vpop.f32.mrf.mxu2 }
 0x195   :  { %2462 = vmatpush.msra.mxu2 %v10976_v43  ;;  %2556 = vmatpush.msrb.mxu0 %v10977_v20  ;;  %v764_v43 = vpop.f32.mrf.mxu0 }
 0x196   :  { %2531 = vmatpush.msrb.mxu3 %v10952_v37  ;;  %2429 = vmatpush.msra.mxu1 %v10960_v12  ;;  %v664_v37 = vadd.f32 %v663_v48, %v623_v52  ;;  %v10987_v52 = vld [vmem:[#allocation148_spill] sm:$0xff]  ;;  %v10988_v48 = vld [vmem:[#allocation103_spill] sm:$0xff] }
 0x197   :  { %2466 = vmatpush.msra.mxu2 %v10978_v51  ;;  %2558 = vmatpush.msrb.mxu0 %v10979_v36  ;;  %v8651_v51 = vand.u32 4294901760, %v1861_v15 }
 0x198   :  { %2533 = vmatpush.msrb.mxu3 %v10955_v3  ;;  %2431 = vmatpush.msra.mxu1 %v10962_v22  ;;  %v10985_v3 = vld [vmem:[#allocation100_spill] sm:$0xff] }
 0x199   :  { %2470 = vmatpush.msra.mxu2 %v10980_v30  ;;  %2560 = vmatpush.msrb.mxu0 %v10981_v16  ;;  %v818_v30 = vpop.f32.mrf.mxu1  ;;  %v8663_v9 = vsub.f32 %v1861_v15, %v8651_v51  ;;  %v926_v15 = vpop.f32.mrf.mxu3 }
 0x19a   :  { %2535 = vmatpush.msrb.mxu3 %v10958_v32  ;;  %2433 = vmatpush.msra.mxu1 %v10964_v62  ;;  %v765_v32 = vadd.f32 %v764_v43, %v664_v37  ;;  %v10993_v37 = vld [vmem:[#allocation157_spill] sm:$0xff]  ;;  %v10994_v43 = vld [vmem:[#allocation116_spill] sm:$0xff] }
 0x19b   :  { %2474 = vmatpush.msra.mxu2 %v10983_v6  ;;  %2562 = vmatpush.msrb.mxu0 %v10984_v7  ;;  %v10989_v6 = vld [vmem:[#allocation152_spill] sm:$0xff] }
 0x19c   :  { %2537 = vmatpush.msrb.mxu3 %v10960_v12  ;;  %2435 = vmatpush.msra.mxu1 %v10966_v5  ;;  %v819_v12 = vadd.f32 %v818_v30, %v765_v32  ;;  %v10995_v30 = vld [vmem:[#allocation160_spill] sm:$0xff] }
 0x19d   :  { %2478 = vmatpush.msra.mxu2 %v10985_v3  ;;  %2564 = vmatpush.msrb.mxu0 %v10986_v50  ;;  %v10990_v3 = vld [vmem:[#allocation105_spill] sm:$0xff]  ;;  %v10996_v32 = vld [vmem:[#allocation120_spill] sm:$0xff] }
 0x19e   :  { %2439 = vmatmul.f32.vlgmr.msra.gmra.mxu1 %v2242_v63  ;;  %2539 = vmatpush.msrb.mxu3 %v10962_v22  ;;  %v10991_v63 = vld [vmem:[#allocation155_spill] sm:$0xff]  ;;  %v10992_v22 = vld [vmem:[#allocation113_spill] sm:$0xff] }
 0x19f   :  { %2595 = vmatpush.msrb.mxu1 %v10987_v52  ;;  %2482 = vmatpush.msra.mxu2 %v10988_v48  ;;  %v10997_v48 = vld [vmem:[#allocation163_spill] sm:$0xff] }
 0x1a0   :  { %2566 = vmatpush.msrb.mxu0 %v7642_v4  ;;  %2541 = vmatpush.msrb.mxu3 %v10964_v62  ;;  %v858_v62 = vadd.f32 %v857_v17, %v819_v12  ;;  %v10998_v12 = vld [vmem:[#allocation124_spill] sm:$0xff]  ;;  %v963_v17 = vpop.f32.mrf.mxu0 }
 0x1a1   :  { %2601 = vmatpush.msrb.mxu1 %v10989_v6  ;;  %2486 = vmatpush.msra.mxu2 %v10990_v3  ;;  %v10999_v3 = vld [vmem:[#allocation165_spill] sm:$0xff] }
 0x1a2   :  { %2568 = vmatpush.msrb.mxu0 %v7659_v61  ;;  %2543 = vmatpush.msrb.mxu3 %v10966_v5  ;;  %v2583_v5 = vand.u32 4294901760, %v8663_v9  ;;  %v927_v52 = vadd.f32 %v926_v15, %v858_v62  ;;  %v11002_v15 = vld [vmem:[#allocation134_spill] sm:$0xff] }
 0x1a3   :  { %2607 = vmatpush.msrb.mxu1 %v10991_v63  ;;  %2490 = vmatpush.msra.mxu2 %v10992_v22  ;;  %v1004_v63 = vpop.f32.mrf.mxu1  ;;  %v11000_v22 = vld [vmem:[#allocation127_spill] sm:$0xff] }
 0x1a4   :  { %2545 = vmatmul.f32.vlgmr.msrb.gmra.mxu3 %v8569_v60  ;;  %2570 = vmatpush.msrb.mxu0 %v7678_v33  ;;  %v2584_v6 = vsub.f32 %v8663_v9, %v2583_v5  ;;  %v964_v62 = vadd.f32 %v963_v17, %v927_v52  ;;  %v11005_v52 = vld [vmem:[#allocation138_spill] sm:$0xff]  ;;  %v11007_v17 = vld [vmem:[#allocation139_spill] sm:$0xff] }
 0x1a5   :  { %2746 = vmatpush.msra.mxu3 %v10971_v34  ;;  %2613 = vmatpush.msrb.mxu1 %v10993_v37  ;;  %v11001_v37 = vld [vmem:[#allocation167_spill] sm:$0xff] }
 0x1a6   :  { %2494 = vmatpush.msra.mxu2 %v10994_v43  ;;  %2572 = vmatpush.msrb.mxu0 %v7698_v42  ;;  %v2585_v43 = vand.u32 4294901760, %v2584_v6  ;;  %v11008_v6 = vld [vmem:[#allocation141_spill] sm:$0xff] }
 0x1a7   :  { %2748 = vmatpush.msra.mxu3 %v10973_v25  ;;  %2619 = vmatpush.msrb.mxu1 %v10995_v30  ;;  %v1005_v30 = vadd.f32 %v1004_v63, %v964_v62  ;;  %v1159_v63 = vpop.f32.mrf.mxu3  ;;  %v11010_v62 = vld [vmem:[#allocation142_spill] sm:$0xff] }
 0x1a8   :  { %2498 = vmatpush.msra.mxu2 %v10996_v32  ;;  %2574 = vmatpush.msrb.mxu0 %v7717_v0  ;;  %v1105_v32 = vpop.f32.mrf.mxu2 }
 0x1a9   :  { %2750 = vmatpush.msra.mxu3 %v10975_v54  ;;  %2625 = vmatpush.msrb.mxu1 %v10997_v48  ;;  %v11003_v48 = vld [vmem:[#allocation169_spill] sm:$0xff] }
 0x1aa   :  { %2502 = vmatpush.msra.mxu2 %v10998_v12  ;;  %2576 = vmatpush.msrb.mxu0 %v7741_v2  ;;  %v11004_v12 = vld [vmem:[#allocation136_spill] sm:$0xff] }
 0x1ab   :  { %2752 = vmatpush.msra.mxu3 %v10977_v20  ;;  %2631 = vmatpush.msrb.mxu1 %v10999_v3  ;;  %v1106_v3 = vadd.f32 %v1105_v32, %v1005_v30  ;;  %v1198_v30 = vpop.f32.mrf.mxu0  ;;  %v11014_v32 = vld [vmem:[#allocation177_spill] sm:$0xff] }
 0x1ac   :  { %2506 = vmatpush.msra.mxu2 %v11000_v22  ;;  %2578 = vmatpush.msrb.mxu0 %v7760_v38  ;;  %v11009_v22 = vld [vmem:[#allocation173_spill] sm:$0xff] }
 0x1ad   :  { %2754 = vmatpush.msra.mxu3 %v10979_v36  ;;  %2508 = vmatmul.f32.vlgmr.msra.gmra.mxu2 %v8569_v60  ;;  %v11006_v60 = vld [vmem:[#allocation171_spill] sm:$0xff] }
 0x1ae   :  { %2637 = vmatpush.msrb.mxu1 %v11001_v37  ;;  %2693 = vmatpush.msrb.mxu2 %v11002_v15  ;;  %v11011_v37 = vld [vmem:[#allocation144_spill] sm:$0xff]  ;;  %v11012_v15 = vld [vmem:[#allocation175_spill] sm:$0xff] }
 0x1af   :  { %2580 = vmatpush.msrb.mxu0 %v7777_v47  ;;  %2756 = vmatpush.msra.mxu3 %v10981_v16 }
 0x1b0   :  { %2586 = vmatmul.f32.vlgmr.msrb.gmra.mxu0 %v2585_v43  ;;  %2643 = vmatpush.msrb.mxu1 %v11003_v48  ;;  %v1160_v43 = vadd.f32 %v1159_v63, %v1106_v3  ;;  %v11013_v48 = vld [vmem:[#allocation145_spill] sm:$0xff]  ;;  %v11018_v3 = vld [vmem:[#allocation151_spill] sm:$0xff]  ;;  %v11019_v63 = vld [vmem:[#allocation154_spill] sm:$0xff] }
 0x1b1   :  { %2696 = vmatpush.msrb.mxu2 %v11004_v12  ;;  %2787 = vmatpush.msra.mxu0 %v11005_v52  ;;  %v11015_v12 = vld [vmem:[#allocation149_spill] sm:$0xff]  ;;  %v11016_v52 = vld [vmem:[#allocation150_spill] sm:$0xff] }
 0x1b2   :  { %2758 = vmatpush.msra.mxu3 %v10984_v7  ;;  %2649 = vmatpush.msrb.mxu1 %v11006_v60  ;;  %v1267_v60 = vpop.f32.mrf.mxu1 }
 0x1b3   :  { %2699 = vmatpush.msrb.mxu2 %v11007_v17  ;;  %2791 = vmatpush.msra.mxu0 %v11008_v6  ;;  %v11017_v17 = vld [vmem:[#allocation179_spill] sm:$0xff]  ;;  %v1199_v6 = vadd.f32 %v1198_v30, %v1160_v43  ;;  %v11024_v43 = vld [vmem:[#allocation158_spill] sm:$0xff] }
 0x1b4   :  { %2760 = vmatpush.msra.mxu3 %v10986_v50  ;;  %2655 = vmatpush.msrb.mxu1 %v11009_v22 }
 0x1b5   :  { %2702 = vmatpush.msrb.mxu2 %v11010_v62  ;;  %2795 = vmatpush.msra.mxu0 %v11011_v37  ;;  %v1268_v22 = vadd.f32 %v1267_v60, %v1199_v6  ;;  %v11021_v62 = vld [vmem:[#allocation153_spill] sm:$0xff]  ;;  %v11022_v37 = vld [vmem:[#allocation183_spill] sm:$0xff]  ;;  %v11029_v6 = vld [vmem:[#allocation190_spill] sm:$0xff] }
 0x1b6   :  { %2762 = vmatpush.msra.mxu3 %v7642_v4  ;;  %2661 = vmatpush.msrb.mxu1 %v11012_v15  ;;  %v11023_v15 = vld [vmem:[#allocation156_spill] sm:$0xff] }
 0x1b7   :  { %2705 = vmatpush.msrb.mxu2 %v11013_v48  ;;  %2799 = vmatpush.msra.mxu0 %v7611_v11  ;;  %v11020_v11 = vld [vmem:[#allocation180_spill] sm:$0xff]  ;;  %v1304_v48 = vpop.f32.mrf.mxu2 }
 0x1b8   :  { %2764 = vmatpush.msra.mxu3 %v7659_v61  ;;  %2667 = vmatpush.msrb.mxu1 %v11014_v32  ;;  %v1305_v30 = vadd.f32 %v1304_v48, %v1268_v22  ;;  %v11025_v32 = vld [vmem:[#allocation159_spill] sm:$0xff]  ;;  %v11036_v22 = vld [vmem:[#allocation172_spill] sm:$0xff] }
 0x1b9   :  { %2708 = vmatpush.msrb.mxu2 %v11015_v12  ;;  %2803 = vmatpush.msra.mxu0 %v11016_v52  ;;  %v1345_v12 = vpop.f32.mrf.mxu3  ;;  %v11027_v52 = vld [vmem:[#allocation162_spill] sm:$0xff] }
 0x1ba   :  { %2766 = vmatpush.msra.mxu3 %v7678_v33  ;;  %2673 = vmatpush.msrb.mxu1 %v11017_v17  ;;  %v1346_v60 = vadd.f32 %v1345_v12, %v1305_v30  ;;  %v11028_v17 = vld [vmem:[#allocation164_spill] sm:$0xff]  ;;  %v11052_v30 = vld [vmem:[#allocation235_spill] sm:$0xff] }
 0x1bb   :  { %2711 = vmatpush.msrb.mxu2 %v11018_v3  ;;  %2807 = vmatpush.msra.mxu0 %v11019_v63  ;;  %v11030_v3 = vld [vmem:[#allocation166_spill] sm:$0xff] }
 0x1bc   :  { %2768 = vmatpush.msra.mxu3 %v7698_v42  ;;  %2679 = vmatpush.msrb.mxu1 %v11020_v11  ;;  %v11031_v63 = vld [vmem:[#allocation194_spill] sm:$0xff]  ;;  %v11032_v11 = vld [vmem:[#allocation168_spill] sm:$0xff] }
 0x1bd   :  { %2714 = vmatpush.msrb.mxu2 %v11021_v62  ;;  %2811 = vmatpush.msra.mxu0 %v7668_v45  ;;  %v11026_v45 = vld [vmem:[#allocation161_spill] sm:$0xff]  ;;  %v11037_v62 = vld [vmem:[#allocation206_spill] sm:$0xff] }
 0x1be   :  { %2770 = vmatpush.msra.mxu3 %v7717_v0  ;;  %2685 = vmatpush.msrb.mxu1 %v11022_v37  ;;  %v11044_v37 = vld [vmem:[#allocation229_spill] sm:$0xff] }
 0x1bf   :  { %2717 = vmatpush.msrb.mxu2 %v11023_v15  ;;  %2815 = vmatpush.msra.mxu0 %v11024_v43  ;;  %v11048_v43 = vld [vmem:[#allocation200_spill] sm:$0xff] }
 0x1c0   :  { %2687 = vmatmul.f32.vlgmr.msrb.gmra.mxu1 %v8651_v51  ;;  %2772 = vmatpush.msra.mxu3 %v7741_v2 }
 0x1c1   :  { %2854 = vmatpush.msra.mxu1 %v10971_v34  ;;  %2720 = vmatpush.msrb.mxu2 %v11025_v32  ;;  %v1446_v34 = vpop.f32.mrf.mxu0  ;;  %v11053_v32 = vld [vmem:[#allocation176_spill] sm:$0xff] }
 0x1c2   :  { %2819 = vmatpush.msra.mxu0 %v11026_v45  ;;  %2774 = vmatpush.msra.mxu3 %v7760_v38  ;;  %v1863_v12 = vmul.f32 %v11053_v32, %v11053_v32 }
 0x1c3   :  { %2856 = vmatpush.msra.mxu1 %v10973_v25  ;;  %2723 = vmatpush.msrb.mxu2 %v11027_v52  ;;  %v1500_v25 = vpop.f32.mrf.mxu1  ;;  %v11054_v52 = vld [vmem:[#allocation205_spill] sm:$0xff] }
 0x1c4   :  { %2823 = vmatpush.msra.mxu0 %v7731_v1  ;;  %2776 = vmatpush.msra.mxu3 %v7777_v47  ;;  %v1447_v1 = vadd.f32 %v1446_v34, %v1346_v60 }
 0x1c5   :  { %2858 = vmatpush.msra.mxu1 %v10975_v54  ;;  %2726 = vmatpush.msrb.mxu2 %v11028_v17  ;;  %v1539_v54 = vpop.f32.mrf.mxu2  ;;  %v11055_v17 = vld [vmem:[#allocation208_spill] sm:$0xff] }
 0x1c6   :  { %2780 = vmatmul.f32.vlgmr.msra.gmra.mxu3 %v2583_v5  ;;  %2827 = vmatpush.msra.mxu0 %v7755_v31  ;;  %v1501_v31 = vadd.f32 %v1500_v25, %v1447_v1  ;;  %v11033_v5 = vld [vmem:[#allocation198_spill] sm:$0xff]  ;;  %v11057_v25 = vld [vmem:[#allocation212_spill] sm:$0xff] }
 0x1c7   :  { %2936 = vmatpush.msrb.mxu3 %v11029_v6  ;;  %2860 = vmatpush.msra.mxu1 %v10977_v20  ;;  %v11034_v20 = vld [vmem:[#allocation170_spill] sm:$0xff]  ;;  %v11056_v6 = vld [vmem:[#allocation209_spill] sm:$0xff] }
 0x1c8   :  { %2729 = vmatpush.msrb.mxu2 %v11030_v3  ;;  %2831 = vmatpush.msra.mxu0 %v7772_v57  ;;  %v11035_v57 = vld [vmem:[#allocation202_spill] sm:$0xff]  ;;  %v1865_v3 = vsel %vm280_vm1, %v1863_v12, 0  ;;  %v11087_v12 = vld [vmem:[#allocation240_spill] sm:$0xff] }
 0x1c9   :  { %2942 = vmatpush.msrb.mxu3 %v11031_v63  ;;  %2862 = vmatpush.msra.mxu1 %v10979_v36  ;;  %v1540_v36 = vadd.f32 %v1539_v54, %v1501_v31  ;;  %v11059_v54 = vld [vmem:[#allocation216_spill] sm:$0xff]  ;;  %v11060_v31 = vld [vmem:[#allocation218_spill] sm:$0xff] }
 0x1ca   :  { %2732 = vmatpush.msrb.mxu2 %v11032_v11  ;;  %2835 = vmatpush.msra.mxu0 %v7788_v35  ;;  %v11038_v35 = vld [vmem:[#allocation210_spill] sm:$0xff]  ;;  %v8835_v11 = vand.u32 4294901760, %v1865_v3 }
 0x1cb   :  { %2948 = vmatpush.msrb.mxu3 %v11033_v5  ;;  %2864 = vmatpush.msra.mxu1 %v10981_v16  ;;  %v1790_v15 = vpop.f32.mrf.mxu1 }
 0x1cc   :  { %2735 = vmatpush.msrb.mxu2 %v11034_v20  ;;  %2839 = vmatpush.msra.mxu0 %v7802_v55  ;;  %v1608_v55 = vpop.f32.mrf.mxu3 }
 0x1cd   :  { %2954 = vmatpush.msrb.mxu3 %v11035_v57  ;;  %2866 = vmatpush.msra.mxu1 %v10984_v7  ;;  %v1676_v16 = vpop.f32.mrf.mxu2  ;;  %v11040_v7 = vld [vmem:[#allocation219_spill] sm:$0xff]  ;;  %v11062_v57 = vld [vmem:[#allocation222_spill] sm:$0xff] }
 0x1ce   :  { %2738 = vmatpush.msrb.mxu2 %v11036_v22  ;;  %2843 = vmatpush.msra.mxu0 %v7819_v49  ;;  %v1609_v49 = vadd.f32 %v1608_v55, %v1540_v36  ;;  %v11063_v22 = vld [vmem:[#allocation225_spill] sm:$0xff] }
 0x1cf   :  { %2960 = vmatpush.msrb.mxu3 %v11037_v62  ;;  %2741 = vmatmul.f32.vlgmr.msrb.gmra.mxu2 %v8663_v9  ;;  %v11039_v9 = vld [vmem:[#allocation214_spill] sm:$0xff] }
 0x1d0   :  { %2868 = vmatpush.msra.mxu1 %v10986_v50  ;;  %2891 = vmatpush.msra.mxu2 %v7825_v56  ;;  %v11064_v62 = vld [vmem:[#allocation182_spill] sm:$0xff] }
 0x1d1   :  { %2847 = vmatpush.msra.mxu0 %v10816_v19  ;;  %2966 = vmatpush.msrb.mxu3 %v11038_v35  ;;  %v1645_v19 = vpop.f32.mrf.mxu0  ;;  %v11065_v35 = vld [vmem:[#allocation228_spill] sm:$0xff] }
 0x1d2   :  { %2849 = vmatmul.f32.vlgmr.msra.gmra.mxu0 %v8651_v51  ;;  %2870 = vmatpush.msra.mxu1 %v7642_v4  ;;  %v1646_v50 = vadd.f32 %v1645_v19, %v1609_v49  ;;  %v11041_v4 = vld [vmem:[#allocation223_spill] sm:$0xff]  ;;  %v11068_v49 = vld [vmem:[#allocation178_spill] sm:$0xff]  ;;  %v11070_v19 = vld [vmem:[#allocation192_spill] sm:$0xff] }
 0x1d3   :  { %2893 = vmatpush.msra.mxu2 %v7847_v27  ;;  %3034 = vmatpush.msrb.mxu0 %v10817_v26 }
 0x1d4   :  { %2972 = vmatpush.msrb.mxu3 %v11039_v9  ;;  %2872 = vmatpush.msra.mxu1 %v7659_v61  ;;  %v1677_v26 = vadd.f32 %v1676_v16, %v1646_v50  ;;  %v11067_v16 = vld [vmem:[#allocation188_spill] sm:$0xff]  ;;  %v11073_v50 = vld [vmem:[#allocation193_spill] sm:$0xff] }
 0x1d5   :  { %2895 = vmatpush.msra.mxu2 %v7871_v58  ;;  %3037 = vmatpush.msrb.mxu0 %v10819_v14  ;;  %v1727_v61 = vpop.f32.mrf.mxu2  ;;  %v11042_v14 = vld [vmem:[#allocation226_spill] sm:$0xff] }
 0x1d6   :  { %2978 = vmatpush.msrb.mxu3 %v11040_v7  ;;  %2874 = vmatpush.msra.mxu1 %v7678_v33  ;;  %v11043_v33 = vld [vmem:[#allocation217_spill] sm:$0xff]  ;;  %v11071_v7 = vld [vmem:[#allocation186_spill] sm:$0xff] }
 0x1d7   :  { %2897 = vmatpush.msra.mxu2 %v7892_v39  ;;  %3040 = vmatpush.msrb.mxu0 %v10821_v8  ;;  %v1862_v8 = vmul.f32 %v11043_v33, %v11043_v33 }
 0x1d8   :  { %2984 = vmatpush.msrb.mxu3 %v11041_v4  ;;  %2876 = vmatpush.msra.mxu1 %v7698_v42  ;;  %v1728_v42 = vadd.f32 %v1727_v61, %v1677_v26  ;;  %v11074_v61 = vld [vmem:[#allocation199_spill] sm:$0xff] }
 0x1d9   :  { %2899 = vmatpush.msra.mxu2 %v7901_v59  ;;  %3043 = vmatpush.msrb.mxu0 %v10822_v21  ;;  %v11045_v21 = vld [vmem:[#allocation231_spill] sm:$0xff] }
 0x1da   :  { %2990 = vmatpush.msrb.mxu3 %v11042_v14  ;;  %2878 = vmatpush.msra.mxu1 %v7717_v0  ;;  %v8795_v0 = vand.u32 4294901760, %v1862_v8  ;;  %v11075_v14 = vld [vmem:[#allocation236_spill] sm:$0xff]  ;;  %v11076_v26 = vld [vmem:[#allocation187_spill] sm:$0xff] }
 0x1db   :  { %2901 = vmatpush.msra.mxu2 %v7913_v24  ;;  %3046 = vmatpush.msrb.mxu0 %v10823_v44  ;;  %v1761_v44 = vpop.f32.mrf.mxu3 }
 0x1dc   :  { %2996 = vmatpush.msrb.mxu3 %v11044_v37  ;;  %2880 = vmatpush.msra.mxu1 %v7741_v2  ;;  %v1762_v2 = vadd.f32 %v1761_v44, %v1728_v42  ;;  %v11077_v42 = vld [vmem:[#allocation203_spill] sm:$0xff] }
 0x1dd   :  { %2903 = vmatpush.msra.mxu2 %v7939_v28  ;;  %3049 = vmatpush.msrb.mxu0 %v10824_v29  ;;  %v11046_v29 = vld [vmem:[#allocation233_spill] sm:$0xff]  ;;  %v11079_v44 = vld [vmem:[#allocation207_spill] sm:$0xff] }
 0x1de   :  { %3002 = vmatpush.msrb.mxu3 %v11045_v21  ;;  %2882 = vmatpush.msra.mxu1 %v7760_v38  ;;  %v11047_v38 = vld [vmem:[#allocation197_spill] sm:$0xff]  ;;  %v1791_v48 = vadd.f32 %v1790_v15, %v1762_v2  ;;  %v11078_v21 = vld [vmem:[#allocation196_spill] sm:$0xff] }
 0x1df   :  { %2905 = vmatpush.msra.mxu2 %v7961_v18  ;;  %3052 = vmatpush.msrb.mxu0 %v10826_v41  ;;  %v8806_v41 = vsub.f32 %v1862_v8, %v8795_v0  ;;  %v3483_v8 = vld [vmem:[%s10236_s3 + $0x50] sm:$0xf]  ;;  %v11081_v15 = vld [vmem:[#allocation237_spill] sm:$0xff] }
 0x1e0   :  { %3008 = vmatpush.msrb.mxu3 %v8174_v13  ;;  %2884 = vmatpush.msra.mxu1 %v7777_v47  ;;  %v1829_v13 = vpop.f32.mrf.mxu2  ;;  %v11049_v47 = vld [vmem:[#allocation234_spill] sm:$0xff]  ;;  %v3493_v2 = vsel %vm3491_vm3, %v3483_v8, 0 }
 0x1e1   :  { %2907 = vmatpush.msra.mxu2 %v7978_v40  ;;  %3055 = vmatpush.msrb.mxu0 %v10827_v10  ;;  %v11050_v10 = vld [vmem:[#allocation201_spill] sm:$0xff]  ;;  %v1830_v45 = vadd.f32 %v1829_v13, %v1791_v48  ;;  %v2924_v60 = vand.u32 4294901760, %v8806_v41  ;;  %v11082_v13 = vld [vmem:[#allocation211_spill] sm:$0xff]  ;;  %v11084_v48 = vld [vmem:[#allocation238_spill] sm:$0xff] }
 0x1e2   :  { %2886 = vmatmul.f32.vlgmr.msra.gmra.mxu1 %v8651_v51  ;;  %3014 = vmatpush.msrb.mxu3 %v11046_v29  ;;  %v11051_v51 = vld [vmem:[#allocation204_spill] sm:$0xff]  ;;  %v11080_v29 = vld [vmem:[#allocation5_spill] sm:$0xff] }
 0x1e3   :  { %3087 = vmatpush.msrb.mxu1 %v7825_v56  ;;  %2909 = vmatpush.msra.mxu2 %v11047_v38  ;;  %v1856_v34 = vpop.f32.mrf.mxu3  ;;  %v2925_v63 = vsub.f32 %v8806_v41, %v2924_v60 }
 0x1e4   :  { %3058 = vmatpush.msrb.mxu0 %v11048_v43  ;;  %3020 = vmatpush.msrb.mxu3 %v11049_v47  ;;  %v1857_v1 = vadd.f32 %v1856_v34, %v1830_v45  ;;  %v11083_v43 = vld [vmem:[#allocation6_spill] sm:$0xff]  ;;  %v8900_v47 = vand.u32 4294901760, %v3493_v2  ;;  %v11088_v45 = vld [vmem:[#allocation220_spill] sm:$0xff] }
 0x1e5   :  { %3089 = vmatpush.msrb.mxu1 %v7847_v27  ;;  %2911 = vmatpush.msra.mxu2 %v11050_v10  ;;  %v2926_v20 = vand.u32 4294901760, %v2925_v63  ;;  %v11092_v63 = vld [vmem:[#allocation9_spill] sm:$0xff] }
 0x1e6   :  { %3061 = vmatpush.msrb.mxu0 %v11051_v51  ;;  %3026 = vmatpush.msrb.mxu3 %v11052_v30  ;;  %v3443_v5 = vsel %vm3442_vm2, %v1857_v1, 0.0  ;;  %v11086_v51 = vld [vmem:[#allocation242_spill] sm:$0xff]  ;;  %v8921_v34 = vsub.f32 %v3493_v2, %v8900_v47  ;;  %v11101_v2 = vld [vmem:[#allocation3_spill] sm:$0xff] }
 0x1e7   :  { %3091 = vmatpush.msrb.mxu1 %v7871_v58  ;;  %2913 = vmatpush.msra.mxu2 %v11054_v52  ;;  %v3444_v36 = vrot.slane %v3443_v5, 4 }
 0x1e8   :  { %3028 = vmatmul.f32.vlgmr.msrb.gmra.mxu3 %v8795_v0  ;;  %3064 = vmatpush.msrb.mxu0 %v11055_v17  ;;  %v11089_v17 = vld [vmem:[#allocation8_spill] sm:$0xff] }
 0x1e9   :  { %3195 = vmatpush.msra.mxu3 %v7825_v56  ;;  %3093 = vmatpush.msrb.mxu1 %v7892_v39  ;;  %v11058_v56 = vld [vmem:[#allocation213_spill] sm:$0xff] }
 0x1ea   :  { %2915 = vmatpush.msra.mxu2 %v11056_v6  ;;  %3067 = vmatpush.msrb.mxu0 %v11057_v25  ;;  %v11091_v25 = vld [vmem:[#allocation224_spill] sm:$0xff] }
 0x1eb   :  { %3197 = vmatpush.msra.mxu3 %v7847_v27  ;;  %3095 = vmatpush.msrb.mxu1 %v7901_v59  ;;  %v11061_v27 = vld [vmem:[#allocation221_spill] sm:$0xff] }
 0x1ec   :  { %2917 = vmatpush.msra.mxu2 %v11058_v56  ;;  %3070 = vmatpush.msrb.mxu0 %v11059_v54  ;;  %v8937_v54 = vand.u32 4294901760, %v8921_v34 }
 0x1ed   :  { %3199 = vmatpush.msra.mxu3 %v7871_v58  ;;  %3097 = vmatpush.msrb.mxu1 %v7913_v24  ;;  %v8846_v58 = vsub.f32 %v1865_v3, %v8835_v11 }
 0x1ee   :  { %2919 = vmatpush.msra.mxu2 %v11060_v31  ;;  %3073 = vmatpush.msrb.mxu0 %v11061_v27  ;;  %v11094_v27 = vld [vmem:[#allocation10_spill] sm:$0xff] }
 0x1ef   :  { %3201 = vmatpush.msra.mxu3 %v7892_v39  ;;  %3099 = vmatpush.msrb.mxu1 %v7939_v28  ;;  %v11066_v39 = vld [vmem:[#allocation185_spill] sm:$0xff]  ;;  %v3255_v55 = vand.u32 4294901760, %v8846_v58 }
 0x1f0   :  { %2921 = vmatpush.msra.mxu2 %v11062_v57  ;;  %3076 = vmatpush.msrb.mxu0 %v11063_v22  ;;  %v11095_v22 = vld [vmem:[#allocation230_spill] sm:$0xff] }
 0x1f1   :  { %3203 = vmatpush.msra.mxu3 %v7901_v59  ;;  %2927 = vmatmul.f32.vlgmr.msra.gmra.mxu2 %v2926_v20  ;;  %v3445_v59 = vadd.f32 %v3444_v36, %v3443_v5  ;;  %v3485_v20 = vld [vmem:[%s10236_s3 + $0x60] sm:$0xf] }
 0x1f2   :  { %3101 = vmatpush.msrb.mxu1 %v7961_v18  ;;  %3128 = vmatpush.msrb.mxu2 %v11064_v62  ;;  %v3551_v62 = vsub.f32 %v8921_v34, %v8937_v54 }
 0x1f3   :  { %3079 = vmatpush.msrb.mxu0 %v11065_v35  ;;  %3205 = vmatpush.msra.mxu3 %v7913_v24  ;;  %v11069_v24 = vld [vmem:[#allocation191_spill] sm:$0xff]  ;;  %v3446_v9 = vrot.slane %v3445_v59, 2  ;;  %v11096_v35 = vld [vmem:[#allocation232_spill] sm:$0xff] }
 0x1f4   :  { %3082 = vmatmul.f32.vlgmr.msrb.gmra.mxu0 %v8806_v41  ;;  %3103 = vmatpush.msrb.mxu1 %v7978_v40  ;;  %v3478_v41 = vld [vmem:[%s10236_s3 + $0x28] sm:$0xff] }
 0x1f5   :  { %3132 = vmatpush.msrb.mxu2 %v11066_v39  ;;  %3242 = vmatpush.msra.mxu0 %v8273_v23  ;;  %v3447_v4 = vadd.f32 %v3446_v9, %v3445_v59  ;;  %v3499_v59 = vsel %vm3491_vm3, %v3485_v20, 0  ;;  %v11097_v9 = vld [vmem:[#allocation181_spill] sm:$0xff] }
 0x1f6   :  { %3207 = vmatpush.msra.mxu3 %v7939_v28  ;;  %3105 = vmatpush.msrb.mxu1 %v11047_v38  ;;  %v3256_v28 = vsub.f32 %v8846_v58, %v3255_v55 }
 0x1f7   :  { %3136 = vmatpush.msrb.mxu2 %v11067_v16  ;;  %3244 = vmatpush.msra.mxu0 %v11068_v49  ;;  %v3448_v37 = vrot.slane %v3447_v4, 1 }
 0x1f8   :  { %3209 = vmatpush.msra.mxu3 %v7961_v18  ;;  %3107 = vmatpush.msrb.mxu1 %v11050_v10  ;;  %v11072_v18 = vld [vmem:[#allocation195_spill] sm:$0xff] }
 0x1f9   :  { %3140 = vmatpush.msrb.mxu2 %v11069_v24  ;;  %3246 = vmatpush.msra.mxu0 %v8303_v53  ;;  %v3480_v24 = vld [vmem:[%s10236_s3 + $0x38] sm:$0xff] }
 0x1fa   :  { %3211 = vmatpush.msra.mxu3 %v7978_v40  ;;  %3109 = vmatpush.msrb.mxu1 %v11054_v52  ;;  %v3257_v40 = vand.u32 4294901760, %v3256_v28  ;;  %v8980_v28 = vand.u32 4294901760, %v3551_v62 }
 0x1fb   :  { %3144 = vmatpush.msrb.mxu2 %v11070_v19  ;;  %3248 = vmatpush.msra.mxu0 %v11071_v7  ;;  %v3484_v19 = vld [vmem:[%s10236_s3 + $0x58] sm:$0xf] }
 0x1fc   :  { %3213 = vmatpush.msra.mxu3 %v11047_v38  ;;  %3111 = vmatpush.msrb.mxu1 %v11056_v6  ;;  %v3449_v38 = vadd.f32 %v3448_v37, %v3447_v4  ;;  %v11098_v4 = vld [vmem:[#allocation184_spill] sm:$0xff] }
 0x1fd   :  { %3148 = vmatpush.msrb.mxu2 %v11072_v18  ;;  %3250 = vmatpush.msra.mxu0 %v11073_v50  ;;  %v3475_v18 = vld [vmem:[%s10236_s3 + $0x10] sm:$0xff] }
 0x1fe   :  { %3215 = vmatpush.msra.mxu3 %v11050_v10  ;;  %3113 = vmatpush.msrb.mxu1 %v11058_v56  ;;  %v11085_v10 = vld [vmem:[#allocation215_spill] sm:$0xff]  ;;  %v8909_v30 = vmul.f32 0.004464286, %v3449_v38  ;;  %v9009_v37 = vand.u32 4294901760, %v3475_v18 }
 0x1ff   :  { %3152 = vmatpush.msrb.mxu2 %v11074_v61  ;;  %3252 = vmatpush.msra.mxu0 %v11075_v14  ;;  %v11099_v61 = vld [vmem:[#allocation189_spill] sm:$0xff] }
 0x200   :  { %3217 = vmatpush.msra.mxu3 %v11054_v52  ;;  %3258 = vmatmul.f32.vlgmr.msra.gmra.mxu0 %v3257_v40  ;;  %v8913_v52 = vand.u32 4294901760, %v3478_v41  ;;  %v3489_v1 = vsel %vm3442_vm2, %v8909_v30, 0 }
 0x201   :  { %3389 = vmatpush.msrb.mxu0 %v11076_v26  ;;  %3115 = vmatpush.msrb.mxu1 %v11060_v31  ;;  %v3496_v26 = vsel %vm3491_vm3, %v3484_v19, 0 }
 0x202   :  { %3156 = vmatpush.msrb.mxu2 %v11077_v42  ;;  %3219 = vmatpush.msra.mxu3 %v11056_v6  ;;  %v11090_v6 = vld [vmem:[#allocation241_spill] sm:$0xff]  ;;  %v3479_v42 = vld [vmem:[%s10236_s3 + $0x30] sm:$0xff] }
 0x203   :  { %3393 = vmatpush.msrb.mxu0 %v11078_v21  ;;  %3117 = vmatpush.msrb.mxu1 %v11062_v57 }
 0x204   :  { %3160 = vmatpush.msrb.mxu2 %v11079_v44  ;;  %3121 = vmatmul.f32.vlgmr.msrb.gmra.mxu1 %v2924_v60  ;;  %v3473_v60 = vld [vmem:[%s10236_s3] sm:$0xff] }
 0x205   :  { %3221 = vmatpush.msra.mxu3 %v11058_v56  ;;  %3277 = vmatpush.msra.mxu1 %v11080_v29  ;;  %v8927_v3 = vand.u32 4294901760, %v3473_v60  ;;  %v8934_v56 = vsub.f32 %v3478_v41, %v8913_v52  ;;  %v3474_v29 = vld [vmem:[%s10236_s3 + $0x8] sm:$0xff] }
 0x206   :  { %3397 = vmatpush.msrb.mxu0 %v11081_v15  ;;  %3164 = vmatpush.msrb.mxu2 %v11082_v13  ;;  %v9039_v15 = vsub.f32 %v3475_v18, %v9009_v37  ;;  %v11102_v13 = vld [vmem:[#allocation239_spill] sm:$0xff]  ;;  %v9054_v41 = vand.u32 4294901760, %v3474_v29 }
 0x207   :  { %3223 = vmatpush.msra.mxu3 %v11060_v31  ;;  %3283 = vmatpush.msra.mxu1 %v11083_v43  ;;  %v11093_v31 = vld [vmem:[#allocation227_spill] sm:$0xff]  ;;  %v8944_v5 = vand.u32 4294901760, %v8934_v56  ;;  %v8954_v36 = vsub.f32 %v3473_v60, %v8927_v3 }
 0x208   :  { %3401 = vmatpush.msrb.mxu0 %v11084_v48  ;;  %3168 = vmatpush.msrb.mxu2 %v11085_v10 }
 0x209   :  { %3225 = vmatpush.msra.mxu3 %v11062_v57  ;;  %3289 = vmatpush.msra.mxu1 %v11086_v51  ;;  %v8949_v57 = vand.u32 4294901760, %v3489_v1  ;;  %v8963_v39 = vand.u32 4294901760, %v8954_v36  ;;  %v3557_v16 = vsub.f32 %v8934_v56, %v8944_v5  ;;  %v9064_v51 = vand.u32 4294901760, %v9039_v15 }
 0x20a   :  { %3405 = vmatpush.msrb.mxu0 %v11087_v12  ;;  %3172 = vmatpush.msrb.mxu2 %v11088_v45 }
 0x20b   :  { %3227 = vmatmul.f32.vlgmr.msra.gmra.mxu3 %v8795_v0  ;;  %3295 = vmatpush.msra.mxu1 %v11089_v17  ;;  %v8997_v40 = vand.u32 4294901760, %v3557_v16  ;;  %v9083_v17 = vsub.f32 %v3474_v29, %v9054_v41 }
 0x20c   :  { %3358 = vmatpush.msrb.mxu3 %v8273_v23  ;;  %3409 = vmatpush.msrb.mxu0 %v11090_v6 }
 0x20d   :  { %3176 = vmatpush.msrb.mxu2 %v11091_v25  ;;  %3411 = vmatmul.f32.vlgmr.msrb.gmra.mxu0 %v8835_v11  ;;  %v3907_v25 = vsub.f32 %v9039_v15, %v9064_v51 }
 0x20e   :  { %3360 = vmatpush.msrb.mxu3 %v11068_v49  ;;  %3301 = vmatpush.msra.mxu1 %v11092_v63 }
 0x20f   :  { %3180 = vmatpush.msrb.mxu2 %v11093_v31  ;;  %3586 = vmatpush.msra.mxu0 %v8921_v34  ;;  %v3487_v31 = vld [vmem:[%s10236_s3 + $0x70] sm:$0xf]  ;;  %v9110_v20 = vand.u32 4294901760, %v3907_v25 }
 0x210   :  { %3362 = vmatpush.msrb.mxu3 %v8303_v53  ;;  %3307 = vmatpush.msra.mxu1 %v11094_v27  ;;  %v9106_v27 = vand.u32 4294901760, %v9083_v17  ;;  %v3505_v62 = vsel %vm3491_vm3, %v3487_v31, 0 }
 0x211   :  { %3184 = vmatpush.msrb.mxu2 %v11095_v22  ;;  %3309 = vmatmul.f32.vlgmr.msra.gmra.mxu1 %v8835_v11  ;;  %v9128_v16 = vand.u32 4294901760, %v3505_v62 }
 0x212   :  { %3364 = vmatpush.msrb.mxu3 %v11071_v7  ;;  %3426 = vmatpush.msrb.mxu1 %v8273_v23  ;;  %v8971_v23 = vsub.f32 %v3489_v1, %v8949_v57  ;;  %v3735_v19 = vsub.f32 %v9083_v17, %v9106_v27 }
 0x213   :  { %3589 = vmatpush.msra.mxu0 %v8934_v56  ;;  %3188 = vmatpush.msrb.mxu2 %v11096_v35 }
 0x214   :  { %3366 = vmatpush.msrb.mxu3 %v11073_v50  ;;  %3428 = vmatpush.msrb.mxu1 %v11068_v49  ;;  %v8982_v49 = vand.u32 4294901760, %v3499_v59  ;;  %v9021_v21 = vand.u32 4294901760, %v8971_v23 }
 0x215   :  { %3190 = vmatmul.f32.vlgmr.msrb.gmra.mxu2 %v8795_v0  ;;  %3592 = vmatpush.msra.mxu0 %v8954_v36  ;;  %v3563_v0 = vsub.f32 %v8954_v36, %v8963_v39 }
 0x216   :  { %3325 = vmatpush.msra.mxu2 %v11097_v9  ;;  %3368 = vmatpush.msrb.mxu3 %v11075_v14  ;;  %v9007_v8 = vsub.f32 %v3499_v59, %v8982_v49  ;;  %v3482_v59 = vld [vmem:[%s10236_s3 + $0x48] sm:$0xff] }
 0x217   :  { %3430 = vmatpush.msrb.mxu1 %v8303_v53  ;;  %3595 = vmatmul.f32.vlgmr.msra.gmra.mxu0 %v8971_v23  ;;  %v8999_v53 = vand.u32 4294901760, %v3480_v24  ;;  %v3486_v9 = vld [vmem:[%s10236_s3 + $0x68] sm:$0xf]  ;;  %v9144_v18 = vand.u32 4294901760, %v3482_v59 }
 0x218   :  { %3328 = vmatpush.msra.mxu2 %v11098_v4  ;;  %3372 = vmatmul.f32.vlgmr.msrb.gmra.mxu3 %v3255_v55  ;;  %v9013_v55 = vand.u32 4294901760, %v3563_v0  ;;  %v9036_v38 = vand.u32 4294901760, %v9007_v8  ;;  %v3477_v0 = vld [vmem:[%s10236_s3 + $0x20] sm:$0xff] }
 0x219   :  { %3432 = vmatpush.msrb.mxu1 %v11071_v7  ;;  %3669 = vmatpush.msrb.mxu0 %v8900_v47  ;;  %v11100_v7 = vld [vmem:[#allocation2_spill] sm:$0xff]  ;;  %v9024_v44 = vsub.f32 %v3480_v24, %v8999_v53  ;;  %v9168_v29 = vsub.f32 %v3482_v59, %v9144_v18 }
 0x21a   :  { %3331 = vmatpush.msra.mxu2 %v11099_v61  ;;  %3553 = vmatpush.msra.mxu3 %v8980_v28  ;;  %v3895_v10 = vsub.f32 %v9007_v8, %v9036_v38  ;;  %v3502_v61 = vsel %vm3491_vm3, %v3486_v9, 0 }
 0x21b   :  { %3434 = vmatpush.msrb.mxu1 %v11073_v50  ;;  %3671 = vmatpush.msrb.mxu0 %v8913_v52  ;;  %v9028_v50 = vand.u32 4294901760, %v3496_v26  ;;  %v9050_v43 = vand.u32 4294901760, %v9024_v44  ;;  %v9192_v31 = vand.u32 4294901760, %v9168_v29 }
 0x21c   :  { %3334 = vmatpush.msra.mxu2 %v11100_v7  ;;  %3559 = vmatpush.msra.mxu3 %v8997_v40  ;;  %v9087_v6 = vand.u32 4294901760, %v3895_v10  ;;  %v9156_v7 = vand.u32 4294901760, %v3477_v0 }
 0x21d   :  { %3436 = vmatpush.msrb.mxu1 %v11075_v14  ;;  %3673 = vmatpush.msrb.mxu0 %v8927_v3  ;;  %v9043_v14 = vand.u32 4294901760, %v3479_v42  ;;  %v9057_v48 = vsub.f32 %v3496_v26, %v9028_v50  ;;  %v3901_v45 = vsub.f32 %v9024_v44, %v9050_v43  ;;  %v9154_v26 = vsub.f32 %v3505_v62, %v9128_v16 }
 0x21e   :  { %3337 = vmatpush.msra.mxu2 %v11101_v2  ;;  %3438 = vmatmul.f32.vlgmr.msrb.gmra.mxu1 %v8835_v11  ;;  %v3529_v11 = vsub.f32 %v8971_v23, %v9021_v21  ;;  %v3481_v2 = vld [vmem:[%s10236_s3 + $0x40] sm:$0xff]  ;;  %11103 = vst [vmem:[#allocation14_spill] sm:$0xff] %v9192_v31 }
 0x21f   :  { %3565 = vmatpush.msra.mxu3 %v9013_v55  ;;  %3675 = vmatmul.f32.vlgmr.msrb.gmra.mxu0 %v8949_v57  ;;  %v9080_v60 = vand.u32 4294901760, %v9057_v48  ;;  %v9098_v63 = vand.u32 4294901760, %v3901_v45  ;;  %v9180_v10 = vand.u32 4294901760, %v9154_v26  ;;  %v9183_v45 = vsub.f32 %v3477_v0, %v9156_v7 }
 0x220   :  { %3340 = vmatpush.msra.mxu2 %v11102_v13  ;;  %3567 = vmatmul.f32.vlgmr.msra.gmra.mxu3 %v8949_v57  ;;  %v9073_v12 = vand.u32 4294901760, %v3529_v11  ;;  %v9172_v13 = vand.u32 4294901760, %v3502_v61  ;;  %v3476_v11 = vld [vmem:[%s10236_s3 + $0x18] sm:$0xff]  ;;  %v9187_v25 = vand.u32 4294901760, %v3481_v2  ;;  %v4245_v0 = vsub.f32 %v9168_v29, %v9192_v31 }
 0x221   :  { %3343 = vmatmul.f32.vlgmr.msra.gmra.mxu2 %v8846_v58  ;;  %3693 = vmatpush.msra.mxu1 %v9028_v50  ;;  %v9069_v58 = vsub.f32 %v3479_v42, %v9043_v14  ;;  %v3723_v22 = vsub.f32 %v9057_v48, %v9080_v60  ;;  %v9162_v42 = vand.u32 4294901760, %v3735_v19  ;;  %v9206_v59 = vand.u32 4294901760, %v9183_v45 }
 0x222   :  { %3785 = vmatpush.msra.mxu0 %v9028_v50  ;;  %3641 = vmatpush.msrb.mxu3 %v8937_v54  ;;  %v9199_v62 = vsub.f32 %v3502_v61, %v9172_v13  ;;  %v9211_v9 = vsub.f32 %v3481_v2, %v9187_v25 }
 0x223   :  { %3695 = vmatpush.msra.mxu1 %v9043_v14  ;;  %3521 = vmatpush.msrb.mxu2 %v8900_v47  ;;  %v9094_v1 = vand.u32 4294901760, %v9069_v58  ;;  %v9132_v24 = vand.u32 4294901760, %v3723_v22  ;;  %v9196_v22 = vand.u32 4294901760, %v3476_v11  ;;  %11104 = vst [vmem:[#allocation24_spill] sm:$0xff] %v9206_v59  ;;  %v4251_v32 = vsub.f32 %v9183_v45, %v9206_v59 }
 0x224   :  { %3787 = vmatpush.msra.mxu0 %v9043_v14  ;;  %3645 = vmatpush.msrb.mxu3 %v8944_v5  ;;  %11105 = vst [vmem:[#allocation28_spill] sm:$0xff] %v9211_v9  ;;  %v9220_v19 = vand.u32 4294901760, %v9199_v62  ;;  %v9234_v33 = vand.u32 4294901760, %v9211_v9 }
 0x225   :  { %3697 = vmatpush.msra.mxu1 %v9054_v41  ;;  %3523 = vmatpush.msrb.mxu2 %v8913_v52  ;;  %v3729_v35 = vsub.f32 %v9069_v58, %v9094_v1  ;;  %v9223_v61 = vsub.f32 %v3476_v11, %v9196_v22  ;;  %v9238_v11 = vand.u32 4294901760, %v4245_v0  ;;  %v9247_v46 = vand.u32 4294901760, %v4251_v32 }
 0x226   :  { %3703 = vmatmul.f32.vlgmr.msra.gmra.mxu1 %v9073_v12  ;;  %3789 = vmatpush.msra.mxu0 %v9054_v41  ;;  %v4067_v0 = vsub.f32 %v9199_v62, %v9220_v19 }
 0x227   :  { %3649 = vmatpush.msrb.mxu3 %v8963_v39  ;;  %3793 = vmatmul.f32.vlgmr.msra.gmra.mxu0 %v9021_v21  ;;  %v9148_v4 = vand.u32 4294901760, %v3729_v35  ;;  %v4239_v35 = vsub.f32 %v9154_v26, %v9180_v10  ;;  %11107 = vst [vmem:[#allocation30_spill] sm:$0xff] %v9238_v11 }
 0x228   :  { %3525 = vmatpush.msrb.mxu2 %v8927_v3  ;;  %3651 = vmatmul.f32.vlgmr.msrb.gmra.mxu3 %v8949_v57  ;;  %v9263_v32 = vand.u32 4294901760, %v4067_v0 }
 0x229   :  { %3531 = vmatmul.f32.vlgmr.msrb.gmra.mxu2 %v9073_v12  ;;  %3813 = vmatpush.msrb.mxu1 %v9080_v60  ;;  %v9227_v2 = vand.u32 4294901760, %v4239_v35  ;;  %v9243_v35 = vand.u32 4294901760, %v9223_v61 }
 0x22a   :  { %3897 = vmatpush.msrb.mxu0 %v9087_v6  ;;  %3758 = vmatpush.msra.mxu3 %v9057_v48 }
 0x22b   :  { %3817 = vmatpush.msrb.mxu1 %v9094_v1  ;;  %3613 = vmatpush.msra.mxu2 %v8900_v47  ;;  %11106 = vst [vmem:[#allocation25_spill] sm:$0xff] %v9227_v2 }
 0x22c   :  { %3903 = vmatpush.msrb.mxu0 %v9098_v63  ;;  %3761 = vmatpush.msra.mxu3 %v9069_v58 }
 0x22d   :  { %3821 = vmatpush.msrb.mxu1 %v9106_v27  ;;  %3615 = vmatpush.msra.mxu2 %v8913_v52 }
 0x22e   :  { %3823 = vmatmul.f32.vlgmr.msrb.gmra.mxu1 %v8949_v57  ;;  %3909 = vmatpush.msrb.mxu0 %v9110_v20 }
 0x22f   :  { %3764 = vmatpush.msra.mxu3 %v9083_v17  ;;  %3911 = vmatmul.f32.vlgmr.msrb.gmra.mxu0 %v8949_v57 }
 0x230   :  { %3617 = vmatpush.msra.mxu2 %v8927_v3  ;;  %3767 = vmatmul.f32.vlgmr.msra.gmra.mxu3 %v8971_v23 }
 0x231   :  { %3621 = vmatmul.f32.vlgmr.msra.gmra.mxu2 %v9021_v21  ;;  %3930 = vmatpush.msra.mxu1 %v9007_v8 }
 0x232   :  { %4013 = vmatpush.msra.mxu0 %v8982_v49  ;;  %3865 = vmatpush.msrb.mxu3 %v8982_v49 }
 0x233   :  { %3933 = vmatpush.msra.mxu1 %v9024_v44  ;;  %3725 = vmatpush.msrb.mxu2 %v9132_v24 }
 0x234   :  { %4015 = vmatpush.msra.mxu0 %v8999_v53  ;;  %3867 = vmatpush.msrb.mxu3 %v8999_v53 }
 0x235   :  { %3936 = vmatpush.msra.mxu1 %v9039_v15  ;;  %3731 = vmatpush.msrb.mxu2 %v9148_v4 }
 0x236   :  { %3939 = vmatmul.f32.vlgmr.msra.gmra.mxu1 %v8971_v23  ;;  %4017 = vmatpush.msra.mxu0 %v9009_v37 }
 0x237   :  { %3869 = vmatpush.msrb.mxu3 %v9009_v37  ;;  %4019 = vmatmul.f32.vlgmr.msra.gmra.mxu0 %v8949_v57 }
 0x238   :  { %3737 = vmatpush.msrb.mxu2 %v9162_v42  ;;  %3875 = vmatmul.f32.vlgmr.msrb.gmra.mxu3 %v9073_v12 }
 0x239   :  { %3739 = vmatmul.f32.vlgmr.msrb.gmra.mxu2 %v8949_v57  ;;  %4037 = vmatpush.msrb.mxu1 %v9172_v13 }
 0x23a   :  { %4129 = vmatpush.msrb.mxu0 %v9172_v13  ;;  %3985 = vmatpush.msra.mxu3 %v9036_v38 }
 0x23b   :  { %4039 = vmatpush.msrb.mxu1 %v9187_v25  ;;  %3841 = vmatpush.msra.mxu2 %v9028_v50 }
 0x23c   :  { %4131 = vmatpush.msrb.mxu0 %v9187_v25  ;;  %3989 = vmatpush.msra.mxu3 %v9050_v43 }
 0x23d   :  { %4041 = vmatpush.msrb.mxu1 %v9196_v22  ;;  %3843 = vmatpush.msra.mxu2 %v9043_v14 }
 0x23e   :  { %4047 = vmatmul.f32.vlgmr.msrb.gmra.mxu1 %v9073_v12  ;;  %4133 = vmatpush.msrb.mxu0 %v9196_v22 }
 0x23f   :  { %3993 = vmatpush.msra.mxu3 %v9064_v51  ;;  %4137 = vmatmul.f32.vlgmr.msrb.gmra.mxu0 %v9021_v21 }
 0x240   :  { %3845 = vmatpush.msra.mxu2 %v9054_v41  ;;  %3995 = vmatmul.f32.vlgmr.msra.gmra.mxu3 %v8949_v57 }
 0x241   :  { %3847 = vmatmul.f32.vlgmr.msra.gmra.mxu2 %v8949_v57  ;;  %4157 = vmatpush.msra.mxu1 %v9220_v19 }
 0x242   :  { %4241 = vmatpush.msra.mxu0 %v9227_v2  ;;  %4102 = vmatpush.msrb.mxu3 %v9199_v62  ;;  %v4073_v2 = vsub.f32 %v9211_v9, %v9234_v33 }
 0x243   :  { %4161 = vmatpush.msra.mxu1 %v9234_v33  ;;  %3957 = vmatpush.msrb.mxu2 %v8982_v49 }
 0x244   :  { %4247 = vmatpush.msra.mxu0 %v9238_v11  ;;  %4105 = vmatpush.msrb.mxu3 %v9211_v9  ;;  %v4079_v11 = vsub.f32 %v9223_v61, %v9243_v35  ;;  %v9271_v9 = vand.u32 4294901760, %v4073_v2  ;;  %v2060_v2 = vpop.f32.mrf.mxu2 }
 0x245   :  { %4165 = vmatpush.msra.mxu1 %v9243_v35  ;;  %3959 = vmatpush.msrb.mxu2 %v8999_v53 }
 0x246   :  { %4167 = vmatmul.f32.vlgmr.msra.gmra.mxu1 %v8949_v57  ;;  %4253 = vmatpush.msra.mxu0 %v9247_v46  ;;  %v9279_v0 = vand.u32 4294901760, %v4079_v11 }
 0x247   :  { %4108 = vmatpush.msrb.mxu3 %v9223_v61  ;;  %4255 = vmatmul.f32.vlgmr.msra.gmra.mxu0 %v8949_v57 }
 0x248   :  { %3961 = vmatpush.msrb.mxu2 %v9009_v37  ;;  %4111 = vmatmul.f32.vlgmr.msrb.gmra.mxu3 %v8971_v23 }
 0x249   :  { %3965 = vmatmul.f32.vlgmr.msrb.gmra.mxu2 %v9021_v21  ;;  %4274 = vmatpush.msrb.mxu1 %v9154_v26 }
 0x24a   :  { %4357 = vmatpush.msrb.mxu0 %v9128_v16  ;;  %4209 = vmatpush.msra.mxu3 %v9128_v16 }
 0x24b   :  { %4277 = vmatpush.msrb.mxu1 %v9168_v29  ;;  %4069 = vmatpush.msra.mxu2 %v9263_v32 }
 0x24c   :  { %4359 = vmatpush.msrb.mxu0 %v9144_v18  ;;  %4211 = vmatpush.msra.mxu3 %v9144_v18 }
 0x24d   :  { %4280 = vmatpush.msrb.mxu1 %v9183_v45  ;;  %4075 = vmatpush.msra.mxu2 %v9271_v9 }
 0x24e   :  { %4283 = vmatmul.f32.vlgmr.msrb.gmra.mxu1 %v8971_v23  ;;  %4361 = vmatpush.msrb.mxu0 %v9156_v7  ;;  %v2006_v23 = vpop.f32.mrf.mxu1 }
 0x24f   :  { %4213 = vmatpush.msra.mxu3 %v9156_v7  ;;  %4363 = vmatmul.f32.vlgmr.msrb.gmra.mxu0 %v8949_v57 }
 0x250   :  { %4081 = vmatpush.msra.mxu2 %v9279_v0  ;;  %4219 = vmatmul.f32.vlgmr.msra.gmra.mxu3 %v9073_v12  ;;  %v1905_v12 = vpop.f32.mrf.mxu0 }
 0x251   :  { %4083 = vmatmul.f32.vlgmr.msra.gmra.mxu2 %v8949_v57  ;;  %4329 = vmatpush.msrb.mxu3 %v9180_v10 }
 0x252   :  { %4185 = vmatpush.msrb.mxu2 %v9172_v13  ;;  %4476 = vmatpush.msra.mxu0 %v8900_v47 }
 0x253   :  { %4333 = vmatpush.msrb.mxu3 %v9192_v31  ;;  %4384 = vmatpush.msra.mxu1 %v8900_v47 }
 0x254   :  { %4187 = vmatpush.msrb.mxu2 %v9187_v25  ;;  %4478 = vmatpush.msra.mxu0 %v8913_v52 }
 0x255   :  { %4337 = vmatpush.msrb.mxu3 %v9206_v59  ;;  %4386 = vmatpush.msra.mxu1 %v8913_v52 }
 0x256   :  { %4189 = vmatpush.msrb.mxu2 %v9196_v22  ;;  %4480 = vmatpush.msra.mxu0 %v8927_v3 }
 0x257   :  { %4449 = vmatpush.msra.mxu3 %v8921_v34  ;;  %4388 = vmatpush.msra.mxu1 %v8927_v3  ;;  %v2007_v34 = vadd.f32 %v2006_v23, %v1905_v12 }
 0x258   :  { %4301 = vmatpush.msra.mxu2 %v9128_v16  ;;  %4339 = vmatmul.f32.vlgmr.msrb.gmra.mxu3 %v8949_v57 }
 0x259   :  { %4191 = vmatmul.f32.vlgmr.msrb.gmra.mxu2 %v8949_v57  ;;  %4452 = vmatpush.msra.mxu3 %v8934_v56  ;;  %v2061_v11 = vadd.f32 %v2060_v2, %v2007_v34  ;;  %v2099_v56 = vpop.f32.mrf.mxu3  ;;  %v2168_v57 = vpop.f32.mrf.mxu0 }
 0x25a   :  { %4303 = vmatpush.msra.mxu2 %v9144_v18  ;;  %4588 = vmatpush.msrb.mxu0 %v9132_v24 }
 0x25b   :  { %4455 = vmatpush.msra.mxu3 %v8954_v36  ;;  %4504 = vmatpush.msrb.mxu1 %v8937_v54  ;;  %v2100_v54 = vadd.f32 %v2099_v56, %v2061_v11  ;;  %v2205_v36 = vpop.f32.mrf.mxu1 }
 0x25c   :  { %4305 = vmatpush.msra.mxu2 %v9156_v7  ;;  %4594 = vmatpush.msrb.mxu0 %v9148_v4 }
 0x25d   :  { %4556 = vmatpush.msrb.mxu3 %v9028_v50  ;;  %4508 = vmatpush.msrb.mxu1 %v8944_v5  ;;  %v2246_v5 = vpop.f32.mrf.mxu2 }
 0x25e   :  { %4416 = vmatpush.msrb.mxu2 %v8980_v28  ;;  %4600 = vmatpush.msrb.mxu0 %v9162_v42  ;;  %v2169_v28 = vadd.f32 %v2168_v57, %v2100_v54 }
 0x25f   :  { %4558 = vmatpush.msrb.mxu3 %v9043_v14  ;;  %4512 = vmatpush.msrb.mxu1 %v8963_v39 }
 0x260   :  { %4422 = vmatpush.msrb.mxu2 %v8997_v40  ;;  %v2206_v40 = vadd.f32 %v2205_v36, %v2169_v28 }
 0x261   :  { %4560 = vmatpush.msrb.mxu3 %v9054_v41  ;;  %4309 = vmatmul.f32.vlgmr.msra.gmra.mxu2 %v9021_v21  ;;  %v2347_v4 = vpop.f32.mrf.mxu3  ;;  %v2401_v39 = vpop.f32.mrf.mxu0 }
 0x262   :  { %4428 = vmatpush.msrb.mxu2 %v9013_v55  ;;  %v2247_v24 = vadd.f32 %v2246_v5, %v2206_v40 }
 0x263   :  { %v2440_v23 = vpop.f32.mrf.mxu1 }
 0x264   :  { %4532 = vmatpush.msra.mxu2 %v8900_v47  ;;  %v2348_v42 = vadd.f32 %v2347_v4, %v2247_v24 }
 0x265   :  { %v2509_v21 = vpop.f32.mrf.mxu2 }
 0x266   :  { %4534 = vmatpush.msra.mxu2 %v8913_v52  ;;  %v2402_v12 = vadd.f32 %v2401_v39, %v2348_v42 }
 0x268   :  { %4536 = vmatpush.msra.mxu2 %v8927_v3  ;;  %v2441_v2 = vadd.f32 %v2440_v23, %v2402_v12 }
 0x269   :  { %v2546_v34 = vpop.f32.mrf.mxu3  ;;  %v2587_v11 = vpop.f32.mrf.mxu0 }
 0x26a   :  { %v2510_v55 = vadd.f32 %v2509_v21, %v2441_v2 }
 0x26b   :  { %v2688_v56 = vpop.f32.mrf.mxu1 }
 0x26c   :  { %v2547_v47 = vadd.f32 %v2546_v34, %v2510_v55 }
 0x26d   :  { %v2742_v57 = vpop.f32.mrf.mxu2 }
 0x26e   :  { %v2588_v54 = vadd.f32 %v2587_v11, %v2547_v47 }
 0x270   :  { %v2689_v52 = vadd.f32 %v2688_v56, %v2588_v54 }
 0x271   :  { %v2781_v36 = vpop.f32.mrf.mxu3  ;;  %v2850_v3 = vpop.f32.mrf.mxu0 }
 0x272   :  { %v2743_v59 = vadd.f32 %v2742_v57, %v2689_v52 }
 0x273   :  { %v2887_v5 = vpop.f32.mrf.mxu1 }
 0x274   :  { %v2782_v28 = vadd.f32 %v2781_v36, %v2743_v59 }
 0x275   :  { %v2928_v24 = vpop.f32.mrf.mxu2 }
 0x276   :  { %v2851_v40 = vadd.f32 %v2850_v3, %v2782_v28 }
 0x278   :  { %v2888_v4 = vadd.f32 %v2887_v5, %v2851_v40 }
 0x279   :  { %v3029_v42 = vpop.f32.mrf.mxu3  ;;  %v3083_v23 = vpop.f32.mrf.mxu0 }
 0x27a   :  { %v2929_v31 = vadd.f32 %v2928_v24, %v2888_v4 }
 0x27c   :  { %v3030_v39 = vadd.f32 %v3029_v42, %v2929_v31 }
 0x27e   :  { %v3084_v21 = vadd.f32 %v3083_v23, %v3030_v39 }
 0x281   :  { %v3122_v12 = vpop.f32.mrf.mxu1  ;;  %v3259_v56 = vpop.f32.mrf.mxu0 }
 0x282   :  { %v3123_v2 = vadd.f32 %v3122_v12, %v3084_v21 }
 0x28a   :  { %v3412_v5 = vpop.f32.mrf.mxu0 }
 0x28e   :  { %v3228_v47 = vpop.f32.mrf.mxu3  ;;  %v3310_v57 = vpop.f32.mrf.mxu1 }
 0x298   :  { %v3191_v55 = vpop.f32.mrf.mxu2 }
 0x299   :  { %v3192_v34 = vadd.f32 %v3191_v55, %v3123_v2  ;;  %v3459_v55 = vmul.f32 %v8909_v30, %v8909_v30 }
 0x29b   :  { %v3229_v11 = vadd.f32 %v3228_v47, %v3192_v34  ;;  %v3373_v28 = vpop.f32.mrf.mxu3  ;;  %v3439_v24 = vpop.f32.mrf.mxu1 }
 0x29d   :  { %v3260_v54 = vadd.f32 %v3259_v56, %v3229_v11 }
 0x29f   :  { %v3311_v59 = vadd.f32 %v3310_v57, %v3260_v54 }
 0x2a4   :  { %v3344_v52 = vpop.f32.mrf.mxu2 }
 0x2a5   :  { %v3345_v36 = vadd.f32 %v3344_v52, %v3311_v59 }
 0x2a7   :  { %v3374_v3 = vadd.f32 %v3373_v28, %v3345_v36 }
 0x2a9   :  { %v3413_v40 = vadd.f32 %v3412_v5, %v3374_v3 }
 0x2ab   :  { %v3440_v31 = vadd.f32 %v3439_v24, %v3413_v40 }
 0x2ad   :  { %v3451_v4 = vsel %vm3442_vm2, %v3440_v31, 0.0 }
 0x2ae   :  { %v3452_v42 = vrot.slane %v3451_v4, 4 }
 0x2b0   :  { %v3453_v39 = vadd.f32 %v3452_v42, %v3451_v4  ;;  %v5324_v42 = vld [vmem:[%s10237_s5 + $0xe0] sm:$0xff] }
 0x2b2   :  { %v3454_v23 = vrot.slane %v3453_v39, 2 }
 0x2b4   :  { %v3455_v12 = vadd.f32 %v3454_v23, %v3453_v39  ;;  %v5301_v23 = vld [vmem:[%s10237_s5 + $0x28] sm:$0xff] }
 0x2b6   :  { %v3456_v21 = vrot.slane %v3455_v12, 1 }
 0x2b8   :  { %v3457_v2 = vadd.f32 %v3456_v21, %v3455_v12  ;;  %v5323_v12 = vld [vmem:[%s10237_s5 + $0xd8] sm:$0xff] }
 0x2ba   :  { %v3458_v34 = vmul.f32 0.004464286, %v3457_v2  ;;  %v5300_v2 = vld [vmem:[%s10237_s5 + $0x20] sm:$0xff] }
 0x2bc   :  { %v3460_v47 = vsub.f32 %v3458_v34, %v3459_v55  ;;  %v5322_v55 = vld [vmem:[%s10237_s5 + $0xd0] sm:$0xff] }
 0x2be   :  { %v3461_v11 = vmax.f32 %v3460_v47, 0.0 }
 0x2c0   :  { %v3462_v56 = vadd.f32 1e-05, %v3461_v11  ;;  %v5299_v11 = vld [vmem:[%s10237_s5 + $0x18] sm:$0xff] }
 0x2c2   :  { %6647 = vrsqrt.f32 %v3462_v56  ;;  %vm3469_vm5 = vweird.f32 %v3462_v56 }
 0x2c8   :  { %v6648_v54 = vpop.eup %6647 }
 0x2c9   :  { %v3464_v57 = vmul.f32 %v6648_v54, %v3462_v56  ;;  %vm3470_vm4 = vweird.f32 %v6648_v54  ;;  %v5321_v56 = vld [vmem:[%s10237_s5 + $0xc8] sm:$0xff] }
 0x2ca   :  { %vm3471_vm6 = vmor %vm3469_vm5, %vm3470_vm4  ;;  %vm6509_vm4 = vcmask 490496  }
 0x2cb   :  { %v3465_v59 = vmul.f32 %v6648_v54, %v3464_v57  ;;  %v5298_v57 = vld [vmem:[%s10237_s5 + $0x10] sm:$0xff] }
 0x2cd   :  { %v3466_v52 = vmul.f32 0.5, %v3465_v59  ;;  %v5320_v59 = vld [vmem:[%s10237_s5 + $0xc0] sm:$0xff] }
 0x2cf   :  { %v3467_v36 = vsub.f32 1.5, %v3466_v52  ;;  %v5342_v52 = vld [vmem:[%s10237_s5 + $0x170] sm:$0xff] }
 0x2d1   :  { %v3468_v28 = vmul.f32 %v6648_v54, %v3467_v36  ;;  %v5297_v36 = vld [vmem:[%s10237_s5 + $0x8] sm:$0xff] }
 0x2d3   :  { %v3472_v3 = vsel %vm3471_vm6, %v6648_v54, %v3468_v28  ;;  %v5343_v54 = vld [vmem:[%s10237_s5 + $0x178] sm:$0xff] }
 0x2d4   :  { %v4368_v5 = vsel %vm3442_vm2, %v3472_v3, 0  ;;  %v5319_v28 = vld [vmem:[%s10237_s5 + $0xb8] sm:$0xff]  ;;  %v5341_v3 = vld [vmem:[%s10237_s5 + $0x168] sm:$0xff] }
 0x2d5   :  { %v9330_v40 = vand.u32 4294901760, %v4368_v5 }
 0x2d7   :  { %4430 = vmatmul.f32.vlgmr.msrb.gmra.mxu2 %v9330_v40  ;;  %v9334_v30 = vsub.f32 %v4368_v5, %v9330_v40 }
 0x2d8   :  { %4648 = vmatpush.msrb.mxu2 %v9028_v50 }
 0x2d9   :  { %4458 = vmatmul.f32.vlgmr.msra.gmra.mxu3 %v9334_v30  ;;  %v9339_v24 = vand.u32 4294901760, %v9334_v30 }
 0x2da   :  { %4650 = vmatpush.msrb.mxu2 %v9043_v14  ;;  %4676 = vmatpush.msra.mxu3 %v9080_v60  ;;  %v9463_v60 = vpop.f32.mrf.mxu1 }
 0x2db   :  { %4484 = vmatmul.f32.vlgmr.msra.gmra.mxu0 %v9339_v24  ;;  %v4392_v31 = vsub.f32 %v9334_v30, %v9339_v24 }
 0x2dc   :  { %4652 = vmatpush.msrb.mxu2 %v9054_v41  ;;  %4680 = vmatpush.msra.mxu3 %v9094_v1 }
 0x2dd   :  { %v9348_v4 = vand.u32 4294901760, %v4392_v31  ;;  %4704 = vmatpush.msra.mxu0 %v9028_v50  ;;  %v11111_v50 = vld [vmem:[#allocation14_spill] sm:$0xff] }
 0x2de   :  { %4684 = vmatpush.msra.mxu3 %v9106_v27 }
 0x2df   :  { %4394 = vmatmul.f32.vlgmr.msra.gmra.mxu1 %v9348_v4  ;;  %4538 = vmatmul.f32.vlgmr.msra.gmra.mxu2 %v9330_v40 }
 0x2e0   :  { %4621 = vmatpush.msra.mxu1 %v9057_v48  ;;  %4706 = vmatpush.msra.mxu0 %v9043_v14  ;;  %v9448_v14 = vpop.f32.mrf.mxu3 }
 0x2e1   :  { %4566 = vmatmul.f32.vlgmr.msrb.gmra.mxu3 %v9348_v4  ;;  %4760 = vmatpush.msra.mxu2 %v9087_v6 }
 0x2e2   :  { %4624 = vmatpush.msra.mxu1 %v9069_v58  ;;  %4708 = vmatpush.msra.mxu0 %v9054_v41 }
 0x2e3   :  { %4602 = vmatmul.f32.vlgmr.msrb.gmra.mxu0 %v9330_v40  ;;  %4766 = vmatpush.msra.mxu2 %v9098_v63  ;;  %v9471_v63 = vpop.f32.mrf.mxu1 }
 0x2e4   :  { %4793 = vmatpush.msrb.mxu3 %v9007_v8  ;;  %4627 = vmatpush.msra.mxu1 %v9083_v17  ;;  %v5311_v8 = vld [vmem:[%s10237_s5 + $0x78] sm:$0xff] }
 0x2e5   :  { %4772 = vmatpush.msra.mxu2 %v9110_v20  ;;  %4820 = vmatpush.msrb.mxu0 %v8982_v49 }
 0x2e6   :  { %4796 = vmatpush.msrb.mxu3 %v9024_v44  ;;  %v9441_v44 = vpop.f32.mrf.mxu0 }
 0x2e7   :  { %4514 = vmatmul.f32.vlgmr.msrb.gmra.mxu1 %v9330_v40  ;;  %4656 = vmatmul.f32.vlgmr.msrb.gmra.mxu2 %v9339_v24 }
 0x2e8   :  { %4728 = vmatpush.msrb.mxu1 %v8982_v49  ;;  %4799 = vmatpush.msrb.mxu3 %v9039_v15  ;;  %v11112_v15 = vld [vmem:[#allocation24_spill] sm:$0xff]  ;;  %v9457_v48 = vpop.f32.mrf.mxu3 }
 0x2e9   :  { %4686 = vmatmul.f32.vlgmr.msra.gmra.mxu3 %v9330_v40  ;;  %4822 = vmatpush.msrb.mxu0 %v8999_v53 }
 0x2ea   :  { %4730 = vmatpush.msrb.mxu1 %v8999_v53  ;;  %4876 = vmatpush.msrb.mxu2 %v8982_v49  ;;  %v11108_v49 = vld [vmem:[#allocation28_spill] sm:$0xff] }
 0x2eb   :  { %4710 = vmatmul.f32.vlgmr.msra.gmra.mxu0 %v9330_v40  ;;  %4900 = vmatpush.msra.mxu3 %v9172_v13 }
 0x2ec   :  { %4824 = vmatpush.msrb.mxu0 %v9009_v37  ;;  %4878 = vmatpush.msrb.mxu2 %v8999_v53  ;;  %v11109_v53 = vld [vmem:[#allocation25_spill] sm:$0xff] }
 0x2ed   :  { %4732 = vmatpush.msrb.mxu1 %v9009_v37  ;;  %4902 = vmatpush.msra.mxu3 %v9187_v25 }
 0x2ee   :  { %4880 = vmatpush.msrb.mxu2 %v9009_v37  ;;  %4932 = vmatpush.msra.mxu0 %v9263_v32  ;;  %v5309_v37 = vld [vmem:[%s10237_s5 + $0x68] sm:$0xff] }
 0x2ef   :  { %4630 = vmatmul.f32.vlgmr.msra.gmra.mxu1 %v9334_v30  ;;  %4774 = vmatmul.f32.vlgmr.msra.gmra.mxu2 %v9330_v40  ;;  %v5325_v32 = vld [vmem:[%s10237_s5 + $0xe8] sm:$0xff] }
 0x2f0   :  { %4848 = vmatpush.msra.mxu1 %v9036_v38  ;;  %4904 = vmatpush.msra.mxu3 %v9196_v22  ;;  %v9445_v38 = vpop.f32.mrf.mxu2  ;;  %v9465_v17 = vpop.f32.mrf.mxu3 }
 0x2f1   :  { %4802 = vmatmul.f32.vlgmr.msrb.gmra.mxu3 %v9334_v30  ;;  %4938 = vmatpush.msra.mxu0 %v9271_v9 }
 0x2f2   :  { %4852 = vmatpush.msra.mxu1 %v9050_v43  ;;  %4992 = vmatpush.msra.mxu2 %v9172_v13  ;;  %v9452_v43 = vpop.f32.mrf.mxu0 }
 0x2f3   :  { %4828 = vmatmul.f32.vlgmr.msrb.gmra.mxu0 %v9339_v24  ;;  %5020 = vmatpush.msrb.mxu3 %v9220_v19  ;;  %v5304_v19 = vld [vmem:[%s10237_s5 + $0x40] sm:$0xff] }
 0x2f4   :  { %4944 = vmatpush.msra.mxu0 %v9279_v0  ;;  %4994 = vmatpush.msra.mxu2 %v9187_v25  ;;  %v5302_v0 = vld [vmem:[%s10237_s5 + $0x30] sm:$0xff] }
 0x2f5   :  { %4856 = vmatpush.msra.mxu1 %v9064_v51  ;;  %5024 = vmatpush.msrb.mxu3 %v9234_v33  ;;  %v11110_v33 = vld [vmem:[#allocation30_spill] sm:$0xff] }
 0x2f6   :  { %4996 = vmatpush.msra.mxu2 %v9196_v22  ;;  %5048 = vmatpush.msrb.mxu0 %v9172_v13 }
 0x2f7   :  { %4738 = vmatmul.f32.vlgmr.msrb.gmra.mxu1 %v9348_v4  ;;  %4882 = vmatmul.f32.vlgmr.msrb.gmra.mxu2 %v9330_v40 }
 0x2f8   :  { %4965 = vmatpush.msrb.mxu1 %v9199_v62  ;;  %5028 = vmatpush.msrb.mxu3 %v9243_v35  ;;  %v9454_v41 = vpop.f32.mrf.mxu2  ;;  %v9473_v27 = vpop.f32.mrf.mxu3  ;;  %v5303_v35 = vld [vmem:[%s10237_s5 + $0x38] sm:$0xff] }
 0x2f9   :  { %4910 = vmatmul.f32.vlgmr.msra.gmra.mxu3 %v9348_v4  ;;  %5050 = vmatpush.msrb.mxu0 %v9187_v25  ;;  %v5305_v25 = vld [vmem:[%s10237_s5 + $0x48] sm:$0xff] }
 0x2fa   :  { %4968 = vmatpush.msrb.mxu1 %v11108_v49  ;;  %5104 = vmatpush.msrb.mxu2 %v11109_v53  ;;  %v9459_v51 = vpop.f32.mrf.mxu0  ;;  %v5339_v49 = vld [vmem:[%s10237_s5 + $0x158] sm:$0xff] }
 0x2fb   :  { %4946 = vmatmul.f32.vlgmr.msra.gmra.mxu0 %v9330_v40  ;;  %5137 = vmatpush.msra.mxu3 %v9154_v26 }
 0x2fc   :  { %5052 = vmatpush.msrb.mxu0 %v9196_v22  ;;  %5110 = vmatpush.msrb.mxu2 %v11110_v33  ;;  %v5327_v22 = vld [vmem:[%s10237_s5 + $0xf8] sm:$0xff] }
 0x2fd   :  { %4971 = vmatpush.msrb.mxu1 %v9223_v61  ;;  %5140 = vmatpush.msra.mxu3 %v9168_v29  ;;  %v5307_v29 = vld [vmem:[%s10237_s5 + $0x58] sm:$0xff]  ;;  %v5326_v61 = vld [vmem:[%s10237_s5 + $0xf0] sm:$0xff] }
 0x2fe   :  { %5116 = vmatpush.msrb.mxu2 %v9247_v46  ;;  %5164 = vmatpush.msra.mxu0 %v9128_v16  ;;  %v5310_v46 = vld [vmem:[%s10237_s5 + $0x70] sm:$0xff] }
 0x2ff   :  { %4858 = vmatmul.f32.vlgmr.msra.gmra.mxu1 %v9330_v40  ;;  %5000 = vmatmul.f32.vlgmr.msra.gmra.mxu2 %v9339_v24 }
 0x300   :  { %5072 = vmatpush.msra.mxu1 %v9128_v16  ;;  %5143 = vmatpush.msra.mxu3 %v9183_v45  ;;  %v9461_v58 = vpop.f32.mrf.mxu2  ;;  %v9481_v26 = vpop.f32.mrf.mxu3 }
 0x301   :  { %5030 = vmatmul.f32.vlgmr.msrb.gmra.mxu3 %v9330_v40  ;;  %5166 = vmatpush.msra.mxu0 %v9144_v18 }
 0x302   :  { %5074 = vmatpush.msra.mxu1 %v9144_v18  ;;  %5220 = vmatpush.msra.mxu2 %v9128_v16  ;;  %v9467_v6 = vpop.f32.mrf.mxu0 }
 0x303   :  { %5054 = vmatmul.f32.vlgmr.msrb.gmra.mxu0 %v9330_v40  ;;  %5370 = vmatpush.msrb.mxu3 %v5311_v8  ;;  %v5316_v8 = vld [vmem:[%s10237_s5 + $0xa0] sm:$0xff] }
 0x304   :  { %5168 = vmatpush.msra.mxu0 %v9156_v7  ;;  %5222 = vmatpush.msra.mxu2 %v9144_v18  ;;  %v9479_v18 = vpop.f32.mrf.mxu1 }
 0x305   :  { %5076 = vmatpush.msra.mxu1 %v9156_v7  ;;  %5371 = vmatpush.msrb.mxu3 %v5310_v46  ;;  %v5338_v46 = vld [vmem:[%s10237_s5 + $0x150] sm:$0xff] }
 0x306   :  { %5224 = vmatpush.msra.mxu2 %v9156_v7  ;;  %v5308_v7 = vld [vmem:[%s10237_s5 + $0x60] sm:$0xff]  ;;  %5390 = vmatpush.msrb.mxu0 %v5327_v22 }
 0x307   :  { %4974 = vmatmul.f32.vlgmr.msrb.gmra.mxu1 %v9334_v30  ;;  %5118 = vmatmul.f32.vlgmr.msrb.gmra.mxu2 %v9330_v40 }
 0x308   :  { %5192 = vmatpush.msrb.mxu1 %v9180_v10  ;;  %5372 = vmatpush.msrb.mxu3 %v5309_v37  ;;  %v9469_v1 = vpop.f32.mrf.mxu2  ;;  %v5306_v10 = vld [vmem:[%s10237_s5 + $0x50] sm:$0xff]  ;;  %v9504_v9 = vpop.f32.mrf.mxu3  ;;  %v3569_v37 = vadd.f32 %v9448_v14, %v9445_v38  ;;  %v5336_v14 = vld [vmem:[%s10237_s5 + $0x140] sm:$0xff] }
 0x309   :  { %5146 = vmatmul.f32.vlgmr.msra.gmra.mxu3 %v9334_v30  ;;  %5391 = vmatpush.msrb.mxu0 %v5326_v61  ;;  %v5318_v30 = vld [vmem:[%s10237_s5 + $0xb0] sm:$0xff]  ;;  %v5335_v61 = vld [vmem:[%s10237_s5 + $0x138] sm:$0xff] }
 0x30a   :  { %5196 = vmatpush.msrb.mxu1 %v11111_v50  ;;  %v9475_v20 = vpop.f32.mrf.mxu0  ;;  %5373 = vmatpush.msrb.mxu3 %v5308_v7  ;;  %v5315_v50 = vld [vmem:[%s10237_s5 + $0x98] sm:$0xff]  ;;  %v5314_v38 = vld [vmem:[%s10237_s5 + $0x90] sm:$0xff] }
 0x30b   :  { %5172 = vmatmul.f32.vlgmr.msra.gmra.mxu0 %v9339_v24  ;;  %v5340_v24 = vld [vmem:[%s10237_s5 + $0x160] sm:$0xff]  ;;  %v5359_v7 = vld [vmem:[%s10237_s5 + $0x1f8] sm:$0xff] }
 0x30c   :  { %5200 = vmatpush.msrb.mxu1 %v11112_v15  ;;  %5374 = vmatpush.msrb.mxu3 %v5307_v29  ;;  %v9502_v62 = vpop.f32.mrf.mxu1  ;;  %v5337_v15 = vld [vmem:[%s10237_s5 + $0x148] sm:$0xff] }
 0x30d   :  { %5392 = vmatpush.msrb.mxu0 %v5325_v32  ;;  %5430 = vmatpush.msrb.mxu2 %v5359_v7  ;;  %v11113_v7 = vld [vmem:[#allocation130_spill] sm:$0xff] }
 0x30e   :  { %5375 = vmatpush.msrb.mxu3 %v5306_v10  ;;  %v5358_v10 = vld [vmem:[%s10237_s5 + $0x1f0] sm:$0xff] }
 0x30f   :  { %5082 = vmatmul.f32.vlgmr.msra.gmra.mxu1 %v9348_v4  ;;  %5226 = vmatmul.f32.vlgmr.msra.gmra.mxu2 %v9330_v40  ;;  %v5317_v4 = vld [vmem:[%s10237_s5 + $0xa8] sm:$0xff] }
 0x310   :  { %v9477_v16 = vpop.f32.mrf.mxu2  ;;  %5376 = vmatpush.msrb.mxu3 %v5305_v25  ;;  %5393 = vmatpush.msrb.mxu0 %v5324_v42  ;;  %v9542_v47 = vpop.f32.mrf.mxu3  ;;  %v3597_v25 = vadd.f32 %v9441_v44, %v3569_v37  ;;  %v5312_v42 = vld [vmem:[%s10237_s5 + $0x80] sm:$0xff]  ;;  %v5329_v37 = vld [vmem:[%s10237_s5 + $0x108] sm:$0xff] }
 0x311   :  { %5410 = vmatpush.msra.mxu1 %v5343_v54  ;;  %5431 = vmatpush.msrb.mxu2 %v5358_v10 }
 0x312   :  { %v9489_v13 = vpop.f32.mrf.mxu0  ;;  %5377 = vmatpush.msrb.mxu3 %v5304_v19  ;;  %5394 = vmatpush.msrb.mxu0 %v5323_v12  ;;  %v5313_v19 = vld [vmem:[%s10237_s5 + $0x88] sm:$0xff]  ;;  %v3623_v32 = vadd.f32 %v9454_v41, %v3597_v25  ;;  %v5356_v12 = vld [vmem:[%s10237_s5 + $0x1e0] sm:$0xff]  ;;  %v3741_v41 = vadd.f32 %v9461_v58, %v9463_v60  ;;  %v5354_v58 = vld [vmem:[%s10237_s5 + $0x1d0] sm:$0xff] }
 0x313   :  { %5411 = vmatpush.msra.mxu1 %v5342_v52 }
 0x314   :  { %5378 = vmatpush.msrb.mxu3 %v5303_v35  ;;  %5395 = vmatpush.msrb.mxu0 %v5322_v55  ;;  %v9540_v34 = vpop.f32.mrf.mxu1  ;;  %v5357_v35 = vld [vmem:[%s10237_s5 + $0x1e8] sm:$0xff]  ;;  %v3769_v60 = vadd.f32 %v9465_v17, %v3741_v41 }
 0x315   :  { %5412 = vmatpush.msra.mxu1 %v5341_v3  ;;  %5432 = vmatpush.msrb.mxu2 %v5357_v35  ;;  %v5333_v55 = vld [vmem:[%s10237_s5 + $0x128] sm:$0xff] }
 0x316   :  { %5379 = vmatpush.msrb.mxu3 %v5302_v0  ;;  %5396 = vmatpush.msrb.mxu0 %v5321_v56  ;;  %v3653_v56 = vadd.f32 %v9457_v48, %v3623_v32  ;;  %v5331_v48 = vld [vmem:[%s10237_s5 + $0x118] sm:$0xff]  ;;  %v5349_v35 = vld [vmem:[%s10237_s5 + $0x1a8] sm:$0xff] }
 0x317   :  { %5202 = vmatmul.f32.vlgmr.msrb.gmra.mxu1 %v9330_v40  ;;  %v5296_v40 = vld [vmem:[%s10237_s5] sm:$0xff]  ;;  %5433 = vmatpush.msrb.mxu2 %v5356_v12 }
 0x318   :  { %v9494_v45 = vpop.f32.mrf.mxu2  ;;  %5380 = vmatpush.msrb.mxu3 %v5301_v23  ;;  %5397 = vmatpush.msrb.mxu0 %v5320_v59  ;;  %v9592_v33 = vpop.f32.mrf.mxu3  ;;  %v5334_v23 = vld [vmem:[%s10237_s5 + $0x130] sm:$0xff]  ;;  %v5332_v59 = vld [vmem:[%s10237_s5 + $0x120] sm:$0xff] }
 0x319   :  { %5413 = vmatpush.msra.mxu1 %v5340_v24  ;;  %v5348_v12 = vld [vmem:[%s10237_s5 + $0x1a0] sm:$0xff] }
 0x31a   :  { %v9524_v39 = vpop.f32.mrf.mxu0  ;;  %5381 = vmatpush.msrb.mxu3 %v5300_v2  ;;  %5398 = vmatpush.msrb.mxu0 %v5319_v28  ;;  %v3677_v28 = vadd.f32 %v9452_v43, %v3653_v56  ;;  %v5352_v43 = vld [vmem:[%s10237_s5 + $0x1c0] sm:$0xff] }
 0x31b   :  { %5414 = vmatpush.msra.mxu1 %v5339_v49 }
 0x31c   :  { %5382 = vmatpush.msrb.mxu3 %v5299_v11  ;;  %5399 = vmatpush.msrb.mxu0 %v5318_v30  ;;  %v9590_v53 = vpop.f32.mrf.mxu1  ;;  %v5355_v11 = vld [vmem:[%s10237_s5 + $0x1d8] sm:$0xff] }
 0x31d   :  { %5415 = vmatpush.msra.mxu1 %v5338_v46  ;;  %5434 = vmatpush.msrb.mxu2 %v5355_v11  ;;  %v3795_v46 = vadd.f32 %v9459_v51, %v3769_v60  ;;  %v5350_v51 = vld [vmem:[%s10237_s5 + $0x1b0] sm:$0xff] }
 0x31e   :  { %5383 = vmatpush.msrb.mxu3 %v5298_v57  ;;  %5400 = vmatpush.msrb.mxu0 %v5317_v4  ;;  %v5330_v4 = vld [vmem:[%s10237_s5 + $0x110] sm:$0xff] }
 0x31f   :  { %5416 = vmatpush.msra.mxu1 %v5337_v15  ;;  %5435 = vmatpush.msrb.mxu2 %v5354_v58 }
 0x320   :  { %v9532_v21 = vpop.f32.mrf.mxu2  ;;  %5384 = vmatpush.msrb.mxu3 %v5297_v36  ;;  %5401 = vmatpush.msrb.mxu0 %v5316_v8  ;;  %v5353_v36 = vld [vmem:[%s10237_s5 + $0x1c8] sm:$0xff] }
 0x321   :  { %5417 = vmatpush.msra.mxu1 %v5336_v14  ;;  %5436 = vmatpush.msrb.mxu2 %v5353_v36  ;;  %v5328_v14 = vld [vmem:[%s10237_s5 + $0x100] sm:$0xff] }
 0x322   :  { %v9571_v5 = vpop.f32.mrf.mxu0  ;;  %5385 = vmatpush.msrb.mxu3 %v5296_v40  ;;  %5402 = vmatpush.msrb.mxu0 %v5315_v50  ;;  %v9666_v40 = vld [vmem:[%s10235_s4] sm:$0x77]  ;;  %v5351_v50 = vld [vmem:[%s10237_s5 + $0x1b8] sm:$0xff] }
 0x323   :  { %5418 = vmatpush.msra.mxu1 %v5335_v61  ;;  %v5240_v17 = vperm.slane %v9666_v40, 1  ;;  %v5260_v8 = vperm.slane %v9666_v40, 2  ;;  %5437 = vmatpush.msrb.mxu2 %v5352_v43  ;;  %v5241_v56 = vperm.slane %v9666_v40, 5 }
 0x324   :  { %5403 = vmatpush.msrb.mxu0 %v5314_v38 }
 0x325   :  { %5419 = vmatpush.msra.mxu1 %v5334_v23  ;;  %v5250_v38 = vperm.slane %v5240_v17, 1  ;;  %5438 = vmatpush.msrb.mxu2 %v5351_v50  ;;  %v5270_v25 = vperm.slane %v5260_v8, 2  ;;  %v5365_v8 = vld [vmem:[%s10237_s5 + $0x228] sm:$0xff]  ;;  %v5364_v50 = vld [vmem:[%s10237_s5 + $0x220] sm:$0xff] }
 0x326   :  { %5404 = vmatpush.msrb.mxu0 %v5313_v19  ;;  %v3825_v19 = vadd.f32 %v9471_v63, %v3795_v46  ;;  %5460 = vmatpush.msra.mxu3 %v5365_v8 }
 0x327   :  { %5420 = vmatpush.msra.mxu1 %v5333_v55  ;;  %5439 = vmatpush.msrb.mxu2 %v5350_v51  ;;  %v5347_v55 = vld [vmem:[%s10237_s5 + $0x198] sm:$0xff] }
 0x328   :  { %v9582_v31 = vpop.f32.mrf.mxu2  ;;  %5405 = vmatpush.msrb.mxu0 %v5312_v42  ;;  %v3849_v41 = vadd.f32 %v9469_v1, %v3825_v19  ;;  %5461 = vmatpush.msra.mxu3 %v5364_v50 }
 0x329   :  { %5421 = vmatpush.msra.mxu1 %v5332_v59  ;;  %5440 = vmatpush.msrb.mxu2 %v5349_v35  ;;  %v5261_v59 = vperm.slane %v9666_v40, 6  ;;  %v5344_v40 = vld [vmem:[%s10237_s5 + $0x180] sm:$0xff] }
 0x32b   :  { %5422 = vmatpush.msra.mxu1 %v5331_v48  ;;  %5441 = vmatpush.msrb.mxu2 %v5348_v12  ;;  %v11114_v48 = vld [vmem:[#allocation131_spill] sm:$0xff] }
 0x32c   :  { %v5231_v36 = vsub.f32 %v11114_v48, %v3849_v41 }
 0x32d   :  { %5423 = vmatpush.msra.mxu1 %v5330_v4  ;;  %5442 = vmatpush.msrb.mxu2 %v5347_v55 }
 0x32f   :  { %5424 = vmatpush.msra.mxu1 %v5329_v37 }
 0x331   :  { %5425 = vmatpush.msra.mxu1 %v5328_v14 }
 0x358   :  { %v4485_v29 = vpop.f32.mrf.mxu0 }
 0x35a   :  { %v4431_v22 = vpop.f32.mrf.mxu2 }
 0x35c   :  { %v4395_v44 = vpop.f32.mrf.mxu1  ;;  %v4459_v0 = vpop.f32.mrf.mxu3 }
 0x35d   :  { %v4432_v2 = vadd.f32 %v4431_v22, %v4395_v44 }
 0x35f   :  { %v4460_v54 = vadd.f32 %v4459_v0, %v4432_v2  ;;  %v3913_v0 = vadd.f32 %v9467_v6, %v9473_v27 }
 0x360   :  { %v4603_v57 = vpop.f32.mrf.mxu0 }
 0x361   :  { %v4486_v3 = vadd.f32 %v4485_v29, %v4460_v54  ;;  %v5230_v29 = vsub.f32 %v11113_v7, %v3677_v28  ;;  %v3941_v27 = vadd.f32 %v9479_v18, %v3913_v0  ;;  %v5346_v54 = vld [vmem:[%s10237_s5 + $0x190] sm:$0xff]  ;;  %v5251_v28 = vperm.slane %v5241_v56, 1 }
 0x362   :  { %v4539_v52 = vpop.f32.mrf.mxu2  ;;  %5443 = vmatpush.msrb.mxu2 %v5346_v54 }
 0x363   :  { %v3967_v58 = vadd.f32 %v9477_v16, %v3941_v27  ;;  %v5271_v16 = vperm.slane %v5261_v59, 2  ;;  %v4257_v27 = vadd.f32 %v9524_v39, %v9542_v47 }
 0x364   :  { %v4515_v30 = vpop.f32.mrf.mxu1  ;;  %v4567_v24 = vpop.f32.mrf.mxu3 }
 0x365   :  { %v4516_v49 = vadd.f32 %v4515_v30, %v4486_v3  ;;  %v4604_v44 = vadd.f32 %v4603_v57, %v4567_v24  ;;  %v3997_v43 = vadd.f32 %v9481_v26, %v3967_v58  ;;  %v4285_v48 = vadd.f32 %v9590_v53, %v4257_v27 }
 0x367   :  { %v4540_v15 = vadd.f32 %v4539_v52, %v4516_v49  ;;  %v5345_v52 = vld [vmem:[%s10237_s5 + $0x188] sm:$0xff]  ;;  %v4085_v49 = vadd.f32 %v9494_v45, %v9502_v62  ;;  %v4021_v7 = vadd.f32 %v9475_v20, %v3997_v43  ;;  %v5363_v45 = vld [vmem:[%s10237_s5 + $0x218] sm:$0xff]  ;;  %v5362_v20 = vld [vmem:[%s10237_s5 + $0x210] sm:$0xff] }
 0x368   :  { %v4711_v22 = vpop.f32.mrf.mxu0  ;;  %5444 = vmatpush.msrb.mxu2 %v5345_v52  ;;  %5462 = vmatpush.msra.mxu3 %v5363_v45 }
 0x369   :  { %v5235_v10 = vmul.f32 %v5230_v29, %v4540_v15  ;;  %v4113_v26 = vadd.f32 %v9504_v9, %v4085_v49 }
 0x36a   :  { %v4657_v61 = vpop.f32.mrf.mxu2  ;;  %5445 = vmatpush.msrb.mxu2 %v5344_v40  ;;  %5463 = vmatpush.msra.mxu3 %v5362_v20 }
 0x36b   :  { %v5255_v32 = vmul.f32 %v5250_v38, %v5235_v10  ;;  %v6658_v38 = vld [vmem:[%s10235_s4 + $0x8] sm:$0x77]  ;;  %v4139_v35 = vadd.f32 %v9489_v13, %v4113_v26 }
 0x36c   :  { %v4631_v42 = vpop.f32.mrf.mxu1  ;;  %v4687_v23 = vpop.f32.mrf.mxu3  ;;  %v5242_v14 = vperm.slane %v6658_v38, 1  ;;  %v5243_v58 = vperm.slane %v6658_v38, 5 }
 0x36d   :  { %v5275_v2 = vadd.f32 %v5270_v25, %v5255_v32  ;;  %v4632_v63 = vadd.f32 %v4631_v42, %v4604_v44  ;;  %v5360_v44 = vld [vmem:[%s10237_s5 + $0x200] sm:$0xff]  ;;  %v4169_v41 = vadd.f32 %v9540_v34, %v4139_v35 }
 0x36e   :  { %v11115_v42 = vld [vmem:[#allocation174_spill] sm:$0xff]  ;;  %v5252_v12 = vperm.slane %v5242_v14, 1  ;;  %v5253_v47 = vperm.slane %v5243_v58, 1  ;;  %v11117_v14 = vld [vmem:[#allocation176_spill] sm:$0xff]  ;;  %v5477_v58 = vld [vmem:[%s10238_s6 + $0x38] sm:$0xff] }
 0x36f   :  { %v4658_v11 = vadd.f32 %v4657_v61, %v4632_v63  ;;  %vm5280_vm7 = vcmp.gt.f32.partialorder %v5275_v2, 0.0  ;;  %v5285_v6 = vmul.f32 0.01, %v5275_v2  ;;  %v5361_v61 = vld [vmem:[%s10237_s5 + $0x208] sm:$0xff]  ;;  %v4193_v59 = vadd.f32 %v9532_v21, %v4169_v41 }
 0x370   :  { %v4829_v3 = vpop.f32.mrf.mxu0  ;;  %5464 = vmatpush.msra.mxu3 %v5361_v61  ;;  %v5482_v61 = vld [vmem:[%s10238_s6 + $0x60] sm:$0xf]  ;;  %v5479_v41 = vld [vmem:[%s10238_s6 + $0x48] sm:$0xff] }
 0x371   :  { %v4688_v57 = vadd.f32 %v4687_v23, %v4658_v11  ;;  %v5290_v1 = vsel %vm5280_vm7, %v5275_v2, %v5285_v6  ;;  %v5232_v23 = vsub.f32 %v11115_v42, %v4021_v7  ;;  %v5488_v35 = vsel %vm3491_vm3, %v5482_v61, 0 }
 0x372   :  { %v4775_v60 = vpop.f32.mrf.mxu2  ;;  %5386 = vmatmul.f32.vlgmr.msrb.gmra.mxu3 %v5290_v1 }
 0x373   :  { %v4712_v18 = vadd.f32 %v4711_v22, %v4688_v57  ;;  %v5262_v22 = vperm.slane %v6658_v38, 2  ;;  %5465 = vmatpush.msra.mxu3 %v5360_v44  ;;  %v5481_v44 = vld [vmem:[%s10238_s6 + $0x58] sm:$0xff] }
 0x374   :  { %v4739_v17 = vpop.f32.mrf.mxu1  ;;  %v4803_v30 = vpop.f32.mrf.mxu3  ;;  %v9771_v42 = vand.u32 4294901760, %v5481_v44 }
 0x375   :  { %v5236_v24 = vmul.f32 %v5231_v36, %v4712_v18  ;;  %v4776_v4 = vadd.f32 %v4775_v60, %v4739_v17  ;;  %v5272_v63 = vperm.slane %v5262_v22, 2  ;;  %v5263_v36 = vperm.slane %v6658_v38, 6 }
 0x376   :  { %v4311_v17 = vadd.f32 %v9582_v31, %v4285_v48 }
 0x377   :  { %v5256_v46 = vmul.f32 %v5251_v28, %v5236_v24  ;;  %v4804_v37 = vadd.f32 %v4803_v30, %v4776_v4  ;;  %v11116_v28 = vld [vmem:[#allocation217_spill] sm:$0xff]  ;;  %v5273_v24 = vperm.slane %v5263_v36, 2 }
 0x378   :  { %v4947_v32 = vpop.f32.mrf.mxu0  ;;  %v4341_v43 = vadd.f32 %v9592_v33, %v4311_v17 }
 0x379   :  { %v5276_v15 = vadd.f32 %v5271_v16, %v5256_v46  ;;  %v4830_v62 = vadd.f32 %v4829_v3, %v4804_v37  ;;  %v5233_v3 = vsub.f32 %v11116_v28, %v4193_v59  ;;  %v6659_v46 = vld [vmem:[%s10235_s4 + $0x10] sm:$0x7] }
 0x37a   :  { %v4883_v29 = vpop.f32.mrf.mxu2  ;;  %v5244_v37 = vperm.slane %v6659_v46, 1  ;;  %v4365_v31 = vadd.f32 %v9571_v5, %v4341_v43  ;;  %v5474_v43 = vld [vmem:[%s10238_s6 + $0x20] sm:$0xff] }
 0x37b   :  { %vm5281_vm8 = vcmp.gt.f32.partialorder %v5276_v15, 0.0  ;;  %v5286_v51 = vmul.f32 0.01, %v5276_v15 }
 0x37c   :  { %v4859_v10 = vpop.f32.mrf.mxu1  ;;  %v4911_v25 = vpop.f32.mrf.mxu3 }
 0x37d   :  { %v4860_v9 = vadd.f32 %v4859_v10, %v4830_v62  ;;  %v5291_v19 = vsel %vm5281_vm8, %v5276_v15, %v5286_v51  ;;  %v4948_v56 = vadd.f32 %v4947_v32, %v4911_v25  ;;  %v5234_v51 = vsub.f32 %v11117_v14, %v4365_v31 }
 0x37e   :  { %5406 = vmatmul.f32.vlgmr.msrb.gmra.mxu0 %v5291_v19  ;;  %v5254_v10 = vperm.slane %v5244_v37, 1  ;;  %v9763_v32 = vand.u32 4294901760, %v5488_v35 }
 0x37f   :  { %v4884_v0 = vadd.f32 %v4883_v29, %v4860_v9  ;;  %v5264_v29 = vperm.slane %v6659_v46, 2  ;;  %v9891_v46 = vand.u32 4294901760, %v5474_v43 }
 0x380   :  { %v5055_v52 = vpop.f32.mrf.mxu0  ;;  %5666 = vmatpush.msrb.mxu3 %v9763_v32  ;;  %5494 = vmatpush.msra.mxu0 %v9763_v32 }
 0x381   :  { %v5237_v2 = vmul.f32 %v5232_v23, %v4884_v0  ;;  %v5274_v25 = vperm.slane %v5264_v29, 2  ;;  %v9769_v0 = vsub.f32 %v5488_v35, %v9763_v32  ;;  %v5480_v23 = vld [vmem:[%s10238_s6 + $0x50] sm:$0xff] }
 0x382   :  { %v5001_v55 = vpop.f32.mrf.mxu2  ;;  %5668 = vmatpush.msrb.mxu3 %v9771_v42  ;;  %5496 = vmatpush.msra.mxu0 %v9771_v42 }
 0x383   :  { %v5257_v11 = vmul.f32 %v5252_v12, %v5237_v2  ;;  %v9779_v12 = vand.u32 4294901760, %v9769_v0  ;;  %v9782_v2 = vsub.f32 %v5481_v44, %v9771_v42  ;;  %5619 = vmatpush.msra.mxu2 %v9769_v0 }
 0x384   :  { %v4975_v13 = vpop.f32.mrf.mxu1  ;;  %v5031_v6 = vpop.f32.mrf.mxu3 }
 0x385   :  { %v5277_v54 = vadd.f32 %v5272_v63, %v5257_v11  ;;  %v4976_v57 = vadd.f32 %v4975_v13, %v4948_v56  ;;  %v9785_v63 = vand.u32 4294901760, %v5480_v23  ;;  %v9795_v11 = vand.u32 4294901760, %v9782_v2  ;;  %5622 = vmatpush.msra.mxu2 %v9782_v2 }
 0x386   :  { %v9801_v13 = vand.u32 4294901760, %v5479_v41 }
 0x387   :  { %v5002_v1 = vadd.f32 %v5001_v55, %v4976_v57  ;;  %vm5282_vm9 = vcmp.gt.f32.partialorder %v5277_v54, 0.0  ;;  %v5287_v60 = vmul.f32 0.01, %v5277_v54  ;;  %v5534_v55 = vsub.f32 %v9769_v0, %v9779_v12  ;;  %5670 = vmatpush.msrb.mxu3 %v9785_v63  ;;  %5498 = vmatpush.msra.mxu0 %v9785_v63 }
 0x388   :  { %v5173_v50 = vpop.f32.mrf.mxu0  ;;  %v9798_v56 = vsub.f32 %v5480_v23, %v9785_v63  ;;  %v9816_v59 = vsub.f32 %v5479_v41, %v9801_v13 }
 0x389   :  { %v5032_v34 = vadd.f32 %v5031_v6, %v5002_v1  ;;  %v5292_v18 = vsel %vm5282_vm9, %v5277_v54, %v5287_v60  ;;  %v5478_v6 = vld [vmem:[%s10238_s6 + $0x40] sm:$0xff]  ;;  %v9808_v27 = vand.u32 4294901760, %v5534_v55  ;;  %v5540_v54 = vsub.f32 %v9782_v2, %v9795_v11  ;;  %5672 = vmatpush.msrb.mxu3 %v9801_v13  ;;  %5500 = vmatpush.msra.mxu0 %v9801_v13 }
 0x38a   :  { %5426 = vmatmul.f32.vlgmr.msra.gmra.mxu1 %v5292_v18  ;;  %v5119_v30 = vpop.f32.mrf.mxu2  ;;  %v9813_v57 = vand.u32 4294901760, %v9798_v56  ;;  %5625 = vmatpush.msra.mxu2 %v9798_v56  ;;  %v9820_v1 = vand.u32 4294901760, %v5478_v6  ;;  %v9832_v48 = vand.u32 4294901760, %v9816_v59  ;;  %v5476_v18 = vld [vmem:[%s10238_s6 + $0x30] sm:$0xff]  ;;  %vm6593_vm9 = vcmask 31744  }
 0x38b   :  { %v5056_v39 = vadd.f32 %v5055_v52, %v5032_v34  ;;  %5536 = vmatpush.msrb.mxu1 %v9808_v27  ;;  %v9827_v60 = vand.u32 4294901760, %v5540_v54  ;;  %v9835_v34 = vand.u32 4294901760, %v5477_v58 }
 0x38c   :  { %v5083_v40 = vpop.f32.mrf.mxu1  ;;  %v5147_v4 = vpop.f32.mrf.mxu3  ;;  %v5546_v52 = vsub.f32 %v9798_v56, %v9813_v57  ;;  %5628 = vmatpush.msra.mxu2 %v9816_v59  ;;  %v9838_v36 = vsub.f32 %v5478_v6, %v9820_v1  ;;  %5674 = vmatpush.msrb.mxu3 %v9820_v1 }
 0x38d   :  { %v5238_v21 = vmul.f32 %v5233_v3, %v5056_v39  ;;  %v5120_v16 = vadd.f32 %v5119_v30, %v5083_v40  ;;  %5502 = vmatpush.msra.mxu0 %v9820_v1  ;;  %5542 = vmatpush.msrb.mxu1 %v9827_v60  ;;  %v5552_v3 = vsub.f32 %v9816_v59, %v9832_v48  ;;  %v9853_v39 = vand.u32 4294901760, %v5476_v18  ;;  %v5475_v30 = vld [vmem:[%s10238_s6 + $0x28] sm:$0xff] }
 0x38e   :  { %v9846_v28 = vand.u32 4294901760, %v5546_v52  ;;  %v9851_v17 = vsub.f32 %v5477_v58, %v9835_v34  ;;  %5631 = vmatpush.msra.mxu2 %v9838_v36  ;;  %5676 = vmatpush.msrb.mxu3 %v9835_v34 }
 0x38f   :  { %v5258_v49 = vmul.f32 %v5253_v47, %v5238_v21  ;;  %v5148_v53 = vadd.f32 %v5147_v4, %v5120_v16  ;;  %v9856_v47 = vand.u32 4294901760, %v9838_v36  ;;  %v9864_v40 = vand.u32 4294901760, %v5552_v3  ;;  %5504 = vmatpush.msra.mxu0 %v9835_v34 }
 0x390   :  { %5548 = vmatpush.msrb.mxu1 %v9846_v28  ;;  %v9867_v21 = vand.u32 4294901760, %v9851_v17  ;;  %v9872_v16 = vand.u32 4294901760, %v5475_v30  ;;  %5634 = vmatpush.msra.mxu2 %v9851_v17 }
 0x391   :  { %v5278_v8 = vadd.f32 %v5273_v24, %v5258_v49  ;;  %v5174_v15 = vadd.f32 %v5173_v50, %v5148_v53  ;;  %v9870_v24 = vsub.f32 %v5476_v18, %v9853_v39  ;;  %v5558_v4 = vsub.f32 %v9838_v36, %v9856_v47  ;;  %5678 = vmatpush.msrb.mxu3 %v9853_v39  ;;  %v5473_v50 = vld [vmem:[%s10238_s6 + $0x18] sm:$0xff] }
 0x392   :  { %v5227_v38 = vpop.f32.mrf.mxu2  ;;  %5554 = vmatpush.msrb.mxu1 %v9864_v40  ;;  %v5564_v49 = vsub.f32 %v9851_v17, %v9867_v21  ;;  %5506 = vmatpush.msra.mxu0 %v9853_v39  ;;  %v9914_v29 = vand.u32 4294901760, %v5473_v50 }
 0x393   :  { %vm5283_vm10 = vcmp.gt.f32.partialorder %v5278_v8, 0.0  ;;  %v5288_v7 = vmul.f32 0.01, %v5278_v8  ;;  %v9886_v53 = vand.u32 4294901760, %v9870_v24  ;;  %v9894_v37 = vand.u32 4294901760, %v5558_v4  ;;  %5637 = vmatpush.msra.mxu2 %v9870_v24  ;;  %5680 = vmatpush.msrb.mxu3 %v9872_v16 }
 0x394   :  { %v5203_v26 = vpop.f32.mrf.mxu1  ;;  %v9901_v31 = vand.u32 4294901760, %v5564_v49  ;;  %5508 = vmatpush.msra.mxu0 %v9872_v16 }
 0x395   :  { %v5204_v45 = vadd.f32 %v5203_v26, %v5174_v15  ;;  %v5293_v62 = vsel %vm5283_vm10, %v5278_v8, %v5288_v7  ;;  %v9889_v8 = vsub.f32 %v5475_v30, %v9872_v16  ;;  %v5570_v15 = vsub.f32 %v9870_v24, %v9886_v53  ;;  %5560 = vmatpush.msrb.mxu1 %v9894_v37 }
 0x396   :  { %5446 = vmatmul.f32.vlgmr.msrb.gmra.mxu2 %v5293_v62  ;;  %v9909_v26 = vsub.f32 %v5474_v43, %v9891_v46  ;;  %5682 = vmatpush.msrb.mxu3 %v9891_v46 }
 0x397   :  { %v5228_v33 = vadd.f32 %v5227_v38, %v5204_v45  ;;  %v9906_v7 = vand.u32 4294901760, %v9889_v8  ;;  %5640 = vmatpush.msra.mxu2 %v9889_v8  ;;  %v5472_v45 = vld [vmem:[%s10238_s6 + $0x10] sm:$0xff]  ;;  %v9919_v62 = vand.u32 4294901760, %v5570_v15  ;;  %5510 = vmatpush.msra.mxu0 %v9891_v46 }
 0x398   :  { %v9926_v14 = vand.u32 4294901760, %v5472_v45  ;;  %5566 = vmatpush.msrb.mxu1 %v9901_v31  ;;  %5684 = vmatpush.msrb.mxu3 %v9914_v29 }
 0x399   :  { %v5239_v20 = vmul.f32 %v5234_v51, %v5228_v33  ;;  %v5576_v38 = vsub.f32 %v9889_v8, %v9906_v7  ;;  %v9924_v33 = vand.u32 4294901760, %v9909_v26  ;;  %v9932_v51 = vsub.f32 %v5473_v50, %v9914_v29  ;;  %5643 = vmatpush.msra.mxu2 %v9909_v26  ;;  %5512 = vmatpush.msra.mxu0 %v9914_v29 }
 0x39a   :  { %5572 = vmatpush.msrb.mxu1 %v9919_v62  ;;  %5686 = vmatpush.msrb.mxu3 %v9926_v14 }
 0x39b   :  { %v5259_v9 = vmul.f32 %v5254_v10, %v5239_v20  ;;  %v5471_v10 = vld [vmem:[%s10238_s6 + $0x8] sm:$0xff]  ;;  %v5582_v20 = vsub.f32 %v9909_v26, %v9924_v33  ;;  %5646 = vmatpush.msra.mxu2 %v9932_v51  ;;  %5514 = vmatpush.msra.mxu0 %v9926_v14 }
 0x39d   :  { %v5279_v22 = vadd.f32 %v5274_v25, %v5259_v9  ;;  %v9938_v25 = vand.u32 4294901760, %v5576_v38  ;;  %v9943_v9 = vsub.f32 %v5472_v45, %v9926_v14  ;;  %v5583_v61 = vand.u32 4294901760, %v5582_v20 }
 0x39f   :  { %vm5284_vm11 = vcmp.gt.f32.partialorder %v5279_v22, 0.0  ;;  %v5289_v19 = vmul.f32 0.01, %v5279_v22  ;;  %v9958_v35 = vand.u32 4294901760, %v9943_v9  ;;  %5578 = vmatpush.msrb.mxu1 %v9938_v25  ;;  %5649 = vmatpush.msra.mxu2 %v9943_v9 }
 0x3a1   :  { %v5294_v5 = vsel %vm5284_vm11, %v5279_v22, %v5289_v19  ;;  %v9945_v22 = vand.u32 4294901760, %v5471_v10  ;;  %v9951_v19 = vand.u32 4294901760, %v9932_v51  ;;  %v5594_v55 = vsub.f32 %v9943_v9, %v9958_v35  ;;  %5584 = vmatpush.msrb.mxu1 %v5583_v61 }
 0x3a2   :  { %6641 = vmatmul.msk.f32.vlgmr.msra.gmra.mxu3 %vm280_vm1, %v5294_v5  ;;  %v5470_v5 = vld [vmem:[%s10238_s6] sm:$0xff] }
 0x3a3   :  { %v9961_v44 = vsub.f32 %v5471_v10, %v9945_v22  ;;  %v9963_v23 = vand.u32 4294901760, %v5470_v5  ;;  %v5588_v41 = vsub.f32 %v9932_v51, %v9951_v19  ;;  %5688 = vmatpush.msrb.mxu3 %v9945_v22  ;;  %5516 = vmatpush.msra.mxu0 %v9945_v22  ;;  %v5595_v52 = vand.u32 4294901760, %v5594_v55 }
 0x3a5   :  { %v9974_v6 = vand.u32 4294901760, %v9961_v44  ;;  %v9977_v54 = vsub.f32 %v5470_v5, %v9963_v23  ;;  %v5589_v58 = vand.u32 4294901760, %v5588_v41  ;;  %5652 = vmatpush.msra.mxu2 %v9961_v44  ;;  %5690 = vmatpush.msrb.mxu3 %v9963_v23 }
 0x3a6   :  { %5518 = vmatpush.msra.mxu0 %v9963_v23 }
 0x3a7   :  { %v5600_v18 = vsub.f32 %v9961_v44, %v9974_v6  ;;  %v9985_v3 = vand.u32 4294901760, %v9977_v54  ;;  %5590 = vmatpush.msrb.mxu1 %v5589_v58  ;;  %5655 = vmatpush.msra.mxu2 %v9977_v54 }
 0x3a8   :  { %5842 = vmatpush.msra.mxu3 %v9808_v27  ;;  %5704 = vmatpush.msrb.mxu0 %v9779_v12  ;;  %v10042_v27 = vld [vmem:[%s10239_s8] sm:$0x7] }
 0x3a9   :  { %v5601_v30 = vand.u32 4294901760, %v5600_v18  ;;  %v5606_v4 = vsub.f32 %v9977_v54, %v9985_v3  ;;  %5800 = vmatpush.msrb.mxu2 %v9763_v32  ;;  %5596 = vmatpush.msrb.mxu1 %v5595_v52 }
 0x3aa   :  { %5848 = vmatpush.msra.mxu3 %v9827_v60  ;;  %5708 = vmatpush.msrb.mxu0 %v9795_v11  ;;  %v5366_v60 = vperm.slane %v10042_v27, 0 }
 0x3ab   :  { %v5607_v43 = vand.u32 4294901760, %v5606_v4  ;;  %5802 = vmatpush.msrb.mxu2 %v9771_v42  ;;  %5602 = vmatpush.msrb.mxu1 %v5601_v30 }
 0x3ac   :  { %5854 = vmatpush.msra.mxu3 %v9846_v28  ;;  %5712 = vmatpush.msrb.mxu0 %v9813_v57 }
 0x3ad   :  { %5804 = vmatpush.msrb.mxu2 %v9785_v63  ;;  %5608 = vmatpush.msrb.mxu1 %v5607_v43 }
 0x3ae   :  { %5860 = vmatpush.msra.mxu3 %v9864_v40  ;;  %5716 = vmatpush.msrb.mxu0 %v9832_v48 }
 0x3af   :  { %5762 = vmatpush.msra.mxu1 %v9763_v32  ;;  %5806 = vmatpush.msrb.mxu2 %v9801_v13 }
 0x3b0   :  { %5866 = vmatpush.msra.mxu3 %v9894_v37  ;;  %5720 = vmatpush.msrb.mxu0 %v9856_v47 }
 0x3b1   :  { %5764 = vmatpush.msra.mxu1 %v9771_v42  ;;  %5808 = vmatpush.msrb.mxu2 %v9820_v1 }
 0x3b2   :  { %5872 = vmatpush.msra.mxu3 %v9901_v31  ;;  %5724 = vmatpush.msrb.mxu0 %v9867_v21 }
 0x3b3   :  { %5766 = vmatpush.msra.mxu1 %v9785_v63  ;;  %5810 = vmatpush.msrb.mxu2 %v9835_v34 }
 0x3b4   :  { %5878 = vmatpush.msra.mxu3 %v9919_v62  ;;  %5728 = vmatpush.msrb.mxu0 %v9886_v53 }
 0x3b5   :  { %5768 = vmatpush.msra.mxu1 %v9801_v13  ;;  %5812 = vmatpush.msrb.mxu2 %v9853_v39 }
 0x3b6   :  { %5884 = vmatpush.msra.mxu3 %v9938_v25  ;;  %5732 = vmatpush.msrb.mxu0 %v9906_v7 }
 0x3b7   :  { %5770 = vmatpush.msra.mxu1 %v9820_v1  ;;  %5814 = vmatpush.msrb.mxu2 %v9872_v16 }
 0x3b8   :  { %5890 = vmatpush.msra.mxu3 %v5583_v61  ;;  %5736 = vmatpush.msrb.mxu0 %v9924_v33 }
 0x3b9   :  { %5772 = vmatpush.msra.mxu1 %v9835_v34  ;;  %5816 = vmatpush.msrb.mxu2 %v9891_v46 }
 0x3ba   :  { %5896 = vmatpush.msra.mxu3 %v5589_v58  ;;  %5740 = vmatpush.msrb.mxu0 %v9951_v19 }
 0x3bb   :  { %5774 = vmatpush.msra.mxu1 %v9853_v39  ;;  %5818 = vmatpush.msrb.mxu2 %v9914_v29 }
 0x3bc   :  { %5902 = vmatpush.msra.mxu3 %v5595_v52  ;;  %5744 = vmatpush.msrb.mxu0 %v9958_v35 }
 0x3bd   :  { %5776 = vmatpush.msra.mxu1 %v9872_v16  ;;  %5820 = vmatpush.msrb.mxu2 %v9926_v14 }
 0x3be   :  { %5908 = vmatpush.msra.mxu3 %v5601_v30  ;;  %5748 = vmatpush.msrb.mxu0 %v9974_v6 }
 0x3bf   :  { %5778 = vmatpush.msra.mxu1 %v9891_v46  ;;  %5822 = vmatpush.msrb.mxu2 %v9945_v22 }
 0x3c0   :  { %5914 = vmatpush.msra.mxu3 %v5607_v43  ;;  %5752 = vmatpush.msrb.mxu0 %v9985_v3 }
 0x3c1   :  { %5780 = vmatpush.msra.mxu1 %v9914_v29  ;;  %5824 = vmatpush.msrb.mxu2 %v9963_v23 }
 0x3c3   :  { %5782 = vmatpush.msra.mxu1 %v9926_v14 }
 0x3c5   :  { %5784 = vmatpush.msra.mxu1 %v9945_v22 }
 0x3c7   :  { %5786 = vmatpush.msra.mxu1 %v9963_v23 }
 0x3f5   :  { %v5387_v28 = vpop.f32.mrf.mxu3 }
 0x3f6   :  { %v5388_v49 = vadd.f32 %v5387_v28, %v5366_v60 }
 0x3fb   :  { %v5407_v40 = vpop.f32.mrf.mxu0 }
 0x3fc   :  { %v5408_v50 = vadd.f32 %v5407_v40, %v5388_v49 }
 0x407   :  { %v5427_v37 = vpop.f32.mrf.mxu1 }
 0x408   :  { %v5428_v15 = vadd.f32 %v5427_v37, %v5408_v50 }
 0x419   :  { %v5447_v31 = vpop.f32.mrf.mxu2 }
 0x41a   :  { %v5448_v45 = vadd.f32 %v5447_v31, %v5428_v15 }
 0x425   :  { %v5467_v62 = vpop.f32.mrf.mxu3 }
 0x426   :  { %v10045_v38 = vadd.f32 %v5467_v62, %v5448_v45 }
 0x428   :  { %v5485_v10 = vsel %vm5483_vm12, %v10045_v38, 0  ;;  %v5792_v25 = vmul.f32 %v10045_v38, %v10045_v38 }
 0x429   :  { %v5519_v20 = vand.u32 4294901760, %v5485_v10 }
 0x42a   :  { %v5794_v5 = vsel %vm5483_vm12, %v5792_v25, 0 }
 0x42b   :  { %v5520_v61 = vsub.f32 %v5485_v10, %v5519_v20  ;;  %v10052_v41 = vand.u32 4294901760, %v5794_v5  ;;  %5610 = vmatmul.f32.vlgmr.msrb.gmra.mxu1 %v5519_v20 }
 0x42c   :  { %5972 = vmatpush.msrb.mxu1 %v9763_v32 }
 0x42d   :  { %v5521_v55 = vand.u32 4294901760, %v5520_v61  ;;  %v10056_v58 = vsub.f32 %v5794_v5, %v10052_v41  ;;  %5658 = vmatmul.f32.vlgmr.msra.gmra.mxu2 %v5520_v61 }
 0x42e   :  { %5974 = vmatpush.msrb.mxu1 %v9771_v42  ;;  %6010 = vmatpush.msra.mxu2 %v9779_v12 }
 0x42f   :  { %v5522_v52 = vsub.f32 %v5520_v61, %v5521_v55  ;;  %v5827_v18 = vand.u32 4294901760, %v10056_v58  ;;  %5694 = vmatmul.f32.vlgmr.msrb.gmra.mxu3 %v5521_v55 }
 0x430   :  { %5976 = vmatpush.msrb.mxu1 %v9785_v63  ;;  %6014 = vmatpush.msra.mxu2 %v9795_v11 }
 0x431   :  { %v5523_v30 = vand.u32 4294901760, %v5522_v52  ;;  %6068 = vmatpush.msrb.mxu3 %v9763_v32  ;;  %v5828_v4 = vsub.f32 %v10056_v58, %v5827_v18  ;;  %v6130_v32 = vld [vmem:[%s10240_s7 + $0x8] sm:$0x3] }
 0x432   :  { %5978 = vmatpush.msrb.mxu1 %v9801_v13  ;;  %6018 = vmatpush.msra.mxu2 %v9813_v57 }
 0x433   :  { %6070 = vmatpush.msrb.mxu3 %v9771_v42  ;;  %5524 = vmatmul.f32.vlgmr.msra.gmra.mxu0 %v5523_v30  ;;  %v5829_v12 = vand.u32 4294901760, %v5828_v4 }
 0x434   :  { %5788 = vmatmul.f32.vlgmr.msra.gmra.mxu1 %v5519_v20  ;;  %5925 = vmatpush.msra.mxu0 %v9769_v0  ;;  %v6136_v0 = vsel %vm6134_vm13, %v6130_v32, 0 }
 0x435   :  { %5980 = vmatpush.msrb.mxu1 %v9820_v1  ;;  %6022 = vmatpush.msra.mxu2 %v9832_v48  ;;  %v10118_v42 = vand.u32 4294901760, %v6136_v0 }
 0x436   :  { %6072 = vmatpush.msrb.mxu3 %v9785_v63  ;;  %5830 = vmatmul.f32.vlgmr.msrb.gmra.mxu2 %v5829_v12 }
 0x437   :  { %5928 = vmatpush.msra.mxu0 %v9782_v2  ;;  %5982 = vmatpush.msrb.mxu1 %v9835_v34  ;;  %v6129_v2 = vld [vmem:[%s10240_s7] sm:$0xff]  ;;  %v6180_v63 = vsub.f32 %v6136_v0, %v10118_v42 }
 0x438   :  { %6026 = vmatpush.msra.mxu2 %v9856_v47  ;;  %6074 = vmatpush.msrb.mxu3 %v9801_v13  ;;  %v10125_v11 = vand.u32 4294901760, %v6129_v2 }
 0x439   :  { %5916 = vmatmul.f32.vlgmr.msra.gmra.mxu3 %v10052_v41  ;;  %5931 = vmatpush.msra.mxu0 %v9798_v56  ;;  %v6181_v56 = vand.u32 4294901760, %v6180_v63 }
 0x43a   :  { %5984 = vmatpush.msrb.mxu1 %v9853_v39  ;;  %6030 = vmatpush.msra.mxu2 %v9867_v21  ;;  %v6186_v13 = vsub.f32 %v6129_v2, %v10125_v11 }
 0x43b   :  { %6076 = vmatpush.msrb.mxu3 %v9820_v1  ;;  %5934 = vmatpush.msra.mxu0 %v9816_v59  ;;  %v6182_v57 = vsub.f32 %v6180_v63, %v6181_v56 }
 0x43c   :  { %5986 = vmatpush.msrb.mxu1 %v9872_v16  ;;  %6034 = vmatpush.msra.mxu2 %v9886_v53  ;;  %v6187_v59 = vand.u32 4294901760, %v6186_v13 }
 0x43d   :  { %6078 = vmatpush.msrb.mxu3 %v9835_v34  ;;  %5754 = vmatmul.f32.vlgmr.msrb.gmra.mxu0 %v5519_v20  ;;  %v6183_v1 = vand.u32 4294901760, %v6182_v57 }
 0x43e   :  { %5937 = vmatpush.msra.mxu0 %v9838_v36  ;;  %5988 = vmatpush.msrb.mxu1 %v9891_v46  ;;  %v6188_v48 = vsub.f32 %v6186_v13, %v6187_v59 }
 0x43f   :  { %6038 = vmatpush.msra.mxu2 %v9906_v7  ;;  %6080 = vmatpush.msrb.mxu3 %v9853_v39 }
 0x440   :  { %5940 = vmatpush.msra.mxu0 %v9851_v17  ;;  %5990 = vmatpush.msrb.mxu1 %v9914_v29  ;;  %v6189_v17 = vand.u32 4294901760, %v6188_v48 }
 0x441   :  { %6042 = vmatpush.msra.mxu2 %v9924_v33  ;;  %6082 = vmatpush.msrb.mxu3 %v9872_v16 }
 0x442   :  { %5943 = vmatpush.msra.mxu0 %v9870_v24  ;;  %5992 = vmatpush.msrb.mxu1 %v9926_v14 }
 0x443   :  { %6046 = vmatpush.msra.mxu2 %v9951_v19  ;;  %6084 = vmatpush.msrb.mxu3 %v9891_v46 }
 0x444   :  { %5946 = vmatpush.msra.mxu0 %v9889_v8  ;;  %5994 = vmatpush.msrb.mxu1 %v9945_v22 }
 0x445   :  { %6050 = vmatpush.msra.mxu2 %v9958_v35  ;;  %6086 = vmatpush.msrb.mxu3 %v9914_v29 }
 0x446   :  { %5949 = vmatpush.msra.mxu0 %v9909_v26  ;;  %5996 = vmatpush.msrb.mxu1 %v9963_v23 }
 0x447   :  { %6054 = vmatpush.msra.mxu2 %v9974_v6  ;;  %6088 = vmatpush.msrb.mxu3 %v9926_v14 }
 0x448   :  { %6000 = vmatmul.f32.vlgmr.msrb.gmra.mxu1 %v5827_v18  ;;  %5952 = vmatpush.msra.mxu0 %v9932_v51 }
 0x449   :  { %6058 = vmatpush.msra.mxu2 %v9985_v3  ;;  %6090 = vmatpush.msrb.mxu3 %v9945_v22 }
 0x44a   :  { %6060 = vmatmul.f32.vlgmr.msra.gmra.mxu2 %v10052_v41  ;;  %5955 = vmatpush.msra.mxu0 %v9943_v9 }
 0x44b   :  { %6092 = vmatpush.msrb.mxu3 %v9963_v23  ;;  %6212 = vmatpush.msrb.mxu2 %v6180_v63 }
 0x44c   :  { %6094 = vmatmul.f32.vlgmr.msrb.gmra.mxu3 %v10052_v41  ;;  %5958 = vmatpush.msra.mxu0 %v9961_v44 }
 0x44d   :  { %6289 = vmatpush.msra.mxu3 %v10118_v42  ;;  %6215 = vmatpush.msrb.mxu2 %v6186_v13 }
 0x44e   :  { %5961 = vmatpush.msra.mxu0 %v9977_v54  ;;  %6184 = vmatpush.msra.mxu1 %v6183_v1 }
 0x44f   :  { %5964 = vmatmul.f32.vlgmr.msra.gmra.mxu0 %v10056_v58  ;;  %6291 = vmatpush.msra.mxu3 %v10125_v11 }
 0x450   :  { %6153 = vmatpush.msrb.mxu0 %v10118_v42  ;;  %6315 = vmatpush.msra.mxu2 %v10118_v42 }
 0x451   :  { %6399 = vmatpush.msrb.mxu3 %v10118_v42  ;;  %6190 = vmatpush.msra.mxu1 %v6189_v17 }
 0x452   :  { %6155 = vmatpush.msrb.mxu0 %v10125_v11  ;;  %6317 = vmatpush.msra.mxu2 %v10125_v11 }
 0x453   :  { %6401 = vmatpush.msrb.mxu3 %v10125_v11  ;;  %6264 = vmatpush.msrb.mxu1 %v6181_v56 }
 0x454   :  { %6237 = vmatpush.msra.mxu0 %v10118_v42 }
 0x455   :  { %6268 = vmatpush.msrb.mxu1 %v6187_v59 }
 0x456   :  { %6239 = vmatpush.msra.mxu0 %v10125_v11 }
 0x4a8   :  { %v5611_v34 = vpop.f32.mrf.mxu1 }
 0x4b0   :  { %v5525_v36 = vpop.f32.mrf.mxu0  ;;  %v5659_v47 = vpop.f32.mrf.mxu2 }
 0x4b1   :  { %v5612_v39 = vadd.f32 %v5611_v34, %v5525_v36  ;;  %v5789_v46 = vpop.f32.mrf.mxu1  ;;  %v6481_v34 = vld [vmem:[%s10241_s9 + $0x60] sm:$0xf]  ;;  %v6480_v36 = vld [vmem:[%s10241_s9 + $0x58] sm:$0xff] }
 0x4b2   :  { %v5695_v24 = vpop.f32.mrf.mxu3 }
 0x4b3   :  { %v5660_v21 = vadd.f32 %v5659_v47, %v5612_v39  ;;  %v6478_v39 = vld [vmem:[%s10241_s9 + $0x48] sm:$0xff]  ;;  %v6477_v47 = vld [vmem:[%s10241_s9 + $0x40] sm:$0xff] }
 0x4b5   :  { %v5696_v16 = vadd.f32 %v5695_v24, %v5660_v21  ;;  %v6476_v21 = vld [vmem:[%s10241_s9 + $0x38] sm:$0xff]  ;;  %v6475_v24 = vld [vmem:[%s10241_s9 + $0x30] sm:$0xff] }
 0x4b9   :  { %v5831_v22 = vpop.f32.mrf.mxu2 }
 0x4ba   :  { %v5755_v53 = vpop.f32.mrf.mxu0 }
 0x4bb   :  { %v5756_v8 = vadd.f32 %v5755_v53, %v5696_v16  ;;  %v6474_v16 = vld [vmem:[%s10241_s9 + $0x28] sm:$0xff]  ;;  %v6473_v53 = vld [vmem:[%s10241_s9 + $0x20] sm:$0xff] }
 0x4bc   :  { %v5917_v19 = vpop.f32.mrf.mxu3 }
 0x4bd   :  { %v5790_v7 = vadd.f32 %v5789_v46, %v5756_v8  ;;  %v5918_v44 = vadd.f32 %v5917_v19, %v5831_v22  ;;  %v6472_v46 = vld [vmem:[%s10241_s9 + $0x18] sm:$0xff] }
 0x4bf   :  { %v6099_v26 = vsel %vm6098_vm14, %v5790_v7, 0.0 }
 0x4c0   :  { %v6100_v29 = vrot.slane %v6099_v26, 4 }
 0x4c2   :  { %v6101_v33 = vadd.f32 %v6100_v29, %v6099_v26  ;;  %v6471_v26 = vld [vmem:[%s10241_s9 + $0x10] sm:$0xff]  ;;  %v6470_v29 = vld [vmem:[%s10241_s9 + $0x8] sm:$0xff] }
 0x4c4   :  { %v6102_v14 = vrot.slane %v6101_v33, 2 }
 0x4c5   :  { %v6001_v43 = vpop.f32.mrf.mxu1 }
 0x4c6   :  { %v6103_v51 = vadd.f32 %v6102_v14, %v6101_v33  ;;  %v6469_v33 = vld [vmem:[%s10241_s9] sm:$0xff] }
 0x4c8   :  { %v6104_v9 = vrot.slane %v6103_v51, 1 }
 0x4ca   :  { %v6105_v35 = vadd.f32 %v6104_v9, %v6103_v51 }
 0x4cc   :  { %v6106_v23 = vmul.f32 0.0125, %v6105_v35  ;;  %v5965_v6 = vpop.f32.mrf.mxu0 }
 0x4cd   :  { %v5966_v54 = vadd.f32 %v5965_v6, %v5918_v44  ;;  %v6061_v40 = vpop.f32.mrf.mxu2 }
 0x4ce   :  { %v6132_v3 = vsel %vm6098_vm14, %v6106_v23, 0  ;;  %v6115_v52 = vmul.f32 %v6106_v23, %v6106_v23 }
 0x4cf   :  { %v6002_v60 = vadd.f32 %v6001_v43, %v5966_v54  ;;  %v6156_v28 = vand.u32 4294901760, %v6132_v3  ;;  %v6095_v50 = vpop.f32.mrf.mxu3 }
 0x4d1   :  { %v6062_v49 = vadd.f32 %v6061_v40, %v6002_v60  ;;  %6192 = vmatmul.f32.vlgmr.msra.gmra.mxu1 %v6156_v28  ;;  %6293 = vmatmul.f32.vlgmr.msra.gmra.mxu3 %v6156_v28  ;;  %v6157_v37 = vsub.f32 %v6132_v3, %v6156_v28 }
 0x4d2   :  { %6374 = vmatpush.msra.mxu1 %v6180_v63 }
 0x4d3   :  { %v6096_v31 = vadd.f32 %v6095_v50, %v6062_v49  ;;  %6218 = vmatmul.f32.vlgmr.msrb.gmra.mxu2 %v6157_v37  ;;  %v6158_v15 = vand.u32 4294901760, %v6157_v37 }
 0x4d4   :  { %6377 = vmatpush.msra.mxu1 %v6186_v13  ;;  %6426 = vmatpush.msrb.mxu2 %v6181_v56 }
 0x4d5   :  { %v6107_v45 = vsel %vm6098_vm14, %v6096_v31, 0.0  ;;  %v6159_v62 = vsub.f32 %v6157_v37, %v6158_v15 }
 0x4d6   :  { %v6108_v10 = vrot.slane %v6107_v45, 4  ;;  %6430 = vmatpush.msrb.mxu2 %v6187_v59 }
 0x4d7   :  { %v6160_v25 = vand.u32 4294901760, %v6159_v62 }
 0x4d8   :  { %v6109_v20 = vadd.f32 %v6108_v10, %v6107_v45  ;;  %v6463_v10 = vperm.slane %v10042_v27, 2 }
 0x4d9   :  { %6161 = vmatmul.f32.vlgmr.msrb.gmra.mxu0 %v6160_v25  ;;  %6270 = vmatmul.f32.vlgmr.msrb.gmra.mxu1 %v6156_v28 }
 0x4da   :  { %v6110_v5 = vrot.slane %v6109_v20, 2  ;;  %6346 = vmatpush.msrb.mxu0 %v6183_v1  ;;  %6642 = vmatpush.msk.msrb.mxu1 %vm3491_vm3, %v6481_v34 }
 0x4dc   :  { %v6111_v61 = vadd.f32 %v6110_v5, %v6109_v20  ;;  %6352 = vmatpush.msrb.mxu0 %v6189_v17  ;;  %6493 = vmatpush.msrb.mxu1 %v6480_v36  ;;  %v6479_v17 = vld [vmem:[%s10241_s9 + $0x50] sm:$0xff]  ;;  %v6563_v36 = vld [vmem:[%s10243_s11 + $0x28] sm:$0xff] }
 0x4de   :  { %v6112_v41 = vrot.slane %v6111_v61, 1  ;;  %6494 = vmatpush.msrb.mxu1 %v6479_v17 }
 0x4e0   :  { %v6113_v55 = vadd.f32 %v6112_v41, %v6111_v61  ;;  %6495 = vmatpush.msrb.mxu1 %v6478_v39 }
 0x4e1   :  { %6243 = vmatmul.f32.vlgmr.msra.gmra.mxu0 %v6158_v15  ;;  %v6461_v15 = vperm.slane %v10042_v27, 1 }
 0x4e2   :  { %v6114_v58 = vmul.f32 0.0125, %v6113_v55  ;;  %6451 = vmatpush.msra.mxu0 %v10118_v42  ;;  %6496 = vmatpush.msrb.mxu1 %v6477_v47  ;;  %v6660_v55 = vmov 8.0   ;;  %v6562_v47 = vld [vmem:[%s10243_s11 + $0x20] sm:$0xff] }
 0x4e4   :  { %v6116_v18 = vsub.f32 %v6114_v58, %v6115_v52  ;;  %6453 = vmatpush.msra.mxu0 %v10125_v11  ;;  %6497 = vmatpush.msrb.mxu1 %v6476_v21  ;;  %v10190_v52 = vld [vmem:[%s10242_s10] sm:$0x7] }
 0x4e6   :  { %v6117_v30 = vmax.f32 %v6116_v18, 0.0  ;;  %6498 = vmatpush.msrb.mxu1 %v6475_v24 }
 0x4e8   :  { %v6118_v4 = vadd.f32 1e-05, %v6117_v30  ;;  %6499 = vmatpush.msrb.mxu1 %v6474_v16 }
 0x4ea   :  { %6649 = vrsqrt.f32 %v6118_v4  ;;  %vm6125_vm0 = vweird.f32 %v6118_v4  ;;  %6500 = vmatpush.msrb.mxu1 %v6473_v53  ;;  %v6561_v53 = vld [vmem:[%s10243_s11 + $0x18] sm:$0xff] }
 0x4eb   :  { %6651 = vrcp.f32 %v6660_v55 }
 0x4ec   :  { %6501 = vmatpush.msrb.mxu1 %v6472_v46 }
 0x4ee   :  { %6502 = vmatpush.msrb.mxu1 %v6471_v26  ;;  %v6559_v26 = vld [vmem:[%s10243_s11 + $0x8] sm:$0xff] }
 0x4f0   :  { %v6650_v12 = vpop.eup %6649  ;;  %6503 = vmatpush.msrb.mxu1 %v6470_v29 }
 0x4f1   :  { %v6120_v32 = vmul.f32 %v6650_v12, %v6118_v4  ;;  %vm6126_vm15 = vweird.f32 %v6650_v12  ;;  %v6652_v58 = vpop.eup %6651 }
 0x4f2   :  { %vm6127_vm1 = vmor %vm6125_vm0, %vm6126_vm15  ;;  %6504 = vmatpush.msrb.mxu1 %v6469_v33  ;;  %v6518_v18 = vmul.f32 8.0, %v6652_v58  ;;  %vm6522_vm5 = vweird.f32 %v6652_v58 }
 0x4f3   :  { %v6121_v0 = vmul.f32 %v6650_v12, %v6120_v32 }
 0x4f4   :  { %v6519_v4 = vsub.f32 1.0, %v6518_v18 }
 0x4f5   :  { %v6122_v2 = vmul.f32 0.5, %v6121_v0 }
 0x4f7   :  { %v6123_v63 = vsub.f32 1.5, %v6122_v2  ;;  %v6520_v2 = vmul.f32 %v6652_v58, %v6519_v4 }
 0x4f9   :  { %v6124_v56 = vmul.f32 %v6650_v12, %v6123_v63 }
 0x4fb   :  { %v6128_v13 = vsel %vm6127_vm1, %v6650_v12, %v6124_v56 }
 0x4fc   :  { %v6298_v57 = vsel %vm6098_vm14, %v6128_v13, 0 }
 0x4fd   :  { %v6318_v59 = vand.u32 4294901760, %v6298_v57 }
 0x4ff   :  { %6354 = vmatmul.f32.vlgmr.msrb.gmra.mxu0 %v6318_v59  ;;  %v6319_v42 = vsub.f32 %v6298_v57, %v6318_v59  ;;  %v6565_v57 = vld [vmem:[%s10243_s11 + $0x38] sm:$0xf] }
 0x500   :  { %6644 = vmatpush.msk.msra.mxu3 %vm3491_vm3, %v6565_v57 }
 0x501   :  { %6380 = vmatmul.f32.vlgmr.msra.gmra.mxu1 %v6319_v42  ;;  %v6320_v11 = vand.u32 4294901760, %v6319_v42 }
 0x503   :  { %6405 = vmatmul.f32.vlgmr.msrb.gmra.mxu3 %v6320_v11  ;;  %v6321_v1 = vsub.f32 %v6319_v42, %v6320_v11  ;;  %v6564_v11 = vld [vmem:[%s10243_s11 + $0x30] sm:$0xff] }
 0x504   :  { %6582 = vmatpush.msra.mxu3 %v6564_v11 }
 0x505   :  { %v6322_v48 = vand.u32 4294901760, %v6321_v1  ;;  %v6521_v1 = vadd.f32 %v6652_v58, %v6520_v2 }
 0x506   :  { %6583 = vmatpush.msra.mxu3 %v6563_v36 }
 0x507   :  { %6323 = vmatmul.f32.vlgmr.msra.gmra.mxu2 %v6322_v48  ;;  %6455 = vmatmul.f32.vlgmr.msra.gmra.mxu0 %v6318_v59  ;;  %v6523_v21 = vsel %vm6522_vm5, %v6652_v58, %v6521_v1 }
 0x508   :  { %6584 = vmatpush.msra.mxu3 %v6562_v47 }
 0x50a   :  { %6585 = vmatpush.msra.mxu3 %v6561_v53 }
 0x50f   :  { %6432 = vmatmul.f32.vlgmr.msrb.gmra.mxu2 %v6318_v59 }
 0x54e   :  { %v6193_v7 = vpop.f32.mrf.mxu1 }
 0x554   :  { %v6294_v35 = vpop.f32.mrf.mxu3 }
 0x556   :  { %v6162_v8 = vpop.f32.mrf.mxu0  ;;  %v6219_v14 = vpop.f32.mrf.mxu2 }
 0x557   :  { %v6194_v9 = vadd.f32 %v6193_v7, %v6162_v8  ;;  %v6271_v22 = vpop.f32.mrf.mxu1  ;;  %v6560_v7 = vld [vmem:[%s10243_s11 + $0x10] sm:$0xff] }
 0x558   :  { %6586 = vmatpush.msra.mxu3 %v6560_v7 }
 0x559   :  { %v6220_v19 = vadd.f32 %v6219_v14, %v6194_v9  ;;  %v6558_v14 = vld [vmem:[%s10243_s11] sm:$0xff] }
 0x55a   :  { %6587 = vmatpush.msra.mxu3 %v6559_v26 }
 0x55c   :  { %6588 = vmatpush.msra.mxu3 %v6558_v14 }
 0x55e   :  { %v6244_v51 = vpop.f32.mrf.mxu0 }
 0x55f   :  { %v6245_v44 = vadd.f32 %v6244_v51, %v6220_v19 }
 0x561   :  { %v6272_v43 = vadd.f32 %v6271_v22, %v6245_v44 }
 0x563   :  { %v6295_v40 = vadd.f32 %v6294_v35, %v6272_v43  ;;  %v6550_v43 = vperm.slane %v10190_v52, 1 }
 0x565   :  { %v6459_v62 = vsub.f32 %v10045_v38, %v6295_v40  ;;  %v6482_v38 = vperm.slane %v10190_v52, 0  ;;  %v6552_v40 = vperm.slane %v10190_v52, 2 }
 0x57c   :  { %v6355_v23 = vpop.f32.mrf.mxu0 }
 0x57e   :  { %v6381_v3 = vpop.f32.mrf.mxu1 }
 0x584   :  { %v6456_v31 = vpop.f32.mrf.mxu0 }
 0x586   :  { %v6406_v28 = vpop.f32.mrf.mxu3 }
 0x58a   :  { %v6324_v6 = vpop.f32.mrf.mxu2 }
 0x58b   :  { %v6356_v54 = vadd.f32 %v6355_v23, %v6324_v6 }
 0x58d   :  { %v6382_v60 = vadd.f32 %v6381_v3, %v6356_v54 }
 0x58f   :  { %v6407_v49 = vadd.f32 %v6406_v28, %v6382_v60 }
 0x592   :  { %v6433_v37 = vpop.f32.mrf.mxu2 }
 0x593   :  { %v6434_v50 = vadd.f32 %v6433_v37, %v6407_v49 }
 0x595   :  { %v6457_v45 = vadd.f32 %v6456_v31, %v6434_v50 }
 0x597   :  { %v6460_v25 = vmul.f32 %v6459_v62, %v6457_v45 }
 0x599   :  { %v6462_v20 = vmul.f32 %v6461_v15, %v6460_v25  ;;  %v6557_v15 = vld [vmem:[%s10244_s12] sm:$0x7] }
 0x59a   :  { %v6566_v45 = vperm.slane %v6557_v15, 0 }
 0x59b   :  { %v6464_v5 = vadd.f32 %v6463_v10, %v6462_v20 }
 0x59d   :  { %vm6465_vm2 = vcmp.gt.f32.partialorder %v6464_v5, 0.0  ;;  %v6466_v61 = vmul.f32 0.01, %v6464_v5 }
 0x59f   :  { %v6467_v41 = vsel %vm6465_vm2, %v6464_v5, %v6466_v61 }
 0x5a0   :  { %6643 = vmatmul.msk.f32.vlgmr.msrb.gmra.mxu1 %vm5483_vm12, %v6467_v41 }
 0x61d   :  { %v6506_v27 = vpop.f32.mrf.mxu1 }
 0x61e   :  { %v6507_v30 = vadd.f32 %v6506_v27, %v6482_v38 }
 0x620   :  { %v6510_v12 = vsel %vm6509_vm4, %v6507_v30, 0.0  ;;  %v6525_v32 = vmul.f32 %v6507_v30, %v6507_v30 }
 0x621   :  { %v6511_v0 = vrot.slane %v6510_v12, 4 }
 0x622   :  { %v6526_v63 = vsel %vm6509_vm4, %v6525_v32, 0.0 }
 0x623   :  { %v6512_v56 = vadd.f32 %v6511_v0, %v6510_v12  ;;  %v6527_v13 = vrot.slane %v6526_v63, 4 }
 0x625   :  { %v6513_v59 = vrot.slane %v6512_v56, 2  ;;  %v6528_v42 = vadd.f32 %v6527_v13, %v6526_v63 }
 0x627   :  { %v6514_v48 = vadd.f32 %v6513_v59, %v6512_v56  ;;  %v6529_v34 = vrot.slane %v6528_v42, 2 }
 0x629   :  { %v6515_v17 = vrot.slane %v6514_v48, 1  ;;  %v6530_v39 = vadd.f32 %v6529_v34, %v6528_v42 }
 0x62b   :  { %v6516_v24 = vadd.f32 %v6515_v17, %v6514_v48  ;;  %v6531_v16 = vrot.slane %v6530_v39, 1  ;;  %v6627_v17 = vperm.slane %v6557_v15, 1 }
 0x62d   :  { %v6524_v8 = vmul.f32 %v6523_v21, %v6516_v24  ;;  %v6532_v46 = vadd.f32 %v6531_v16, %v6530_v39  ;;  %v6629_v24 = vperm.slane %v6557_v15, 2 }
 0x62f   :  { %v6533_v29 = vmul.f32 %v6532_v46, %v6523_v21  ;;  %v6534_v33 = vmul.f32 %v6524_v8, %v6524_v8  ;;  %v6537_v3 = vsub.f32 %v6507_v30, %v6524_v8 }
 0x631   :  { %v6535_v51 = vsub.f32 %v6533_v29, %v6534_v33 }
 0x633   :  { %v6536_v9 = vmax.f32 %v6535_v51, 0.0 }
 0x635   :  { %v6538_v22 = vadd.f32 1e-05, %v6536_v9 }
 0x637   :  { %6653 = vrsqrt.f32 %v6538_v22  ;;  %vm6545_vm6 = vweird.f32 %v6538_v22 }
 0x63d   :  { %v6654_v19 = vpop.eup %6653 }
 0x63e   :  { %v6540_v35 = vmul.f32 %v6654_v19, %v6538_v22  ;;  %vm6546_vm3 = vweird.f32 %v6654_v19 }
 0x63f   :  { %vm6547_vm7 = vmor %vm6545_vm6, %vm6546_vm3 }
 0x640   :  { %v6541_v44 = vmul.f32 %v6654_v19, %v6540_v35 }
 0x642   :  { %v6542_v23 = vmul.f32 0.5, %v6541_v44 }
 0x644   :  { %v6543_v6 = vsub.f32 1.5, %v6542_v23 }
 0x646   :  { %v6544_v54 = vmul.f32 %v6654_v19, %v6543_v6 }
 0x648   :  { %v6548_v60 = vsel %vm6547_vm7, %v6654_v19, %v6544_v54 }
 0x649   :  { %v6549_v28 = vmul.f32 %v6548_v60, %v6537_v3 }
 0x64b   :  { %v6551_v49 = vmul.f32 %v6550_v43, %v6549_v28 }
 0x64d   :  { %v6553_v37 = vadd.f32 %v6552_v40, %v6551_v49 }
 0x64f   :  { %vm6554_vm8 = vcmp.gt.f32.partialorder %v6553_v37, 0.0  ;;  %v6555_v50 = vmul.f32 0.01, %v6553_v37 }
 0x651   :  { %v6556_v31 = vsel %vm6554_vm8, %v6553_v37, %v6555_v50 }
 0x652   :  { %6645 = vmatmul.msk.f32.vlgmr.msra.gmra.mxu3 %vm6509_vm4, %v6556_v31 }
 0x6d5   :  { %v6590_v62 = vpop.f32.mrf.mxu3 }
 0x6d6   :  { %v6591_v10 = vadd.f32 %v6590_v62, %v6566_v45 }
 0x6d8   :  { %v6594_v25 = vsel %vm6593_vm9, %v6591_v10, 0.0  ;;  %v6602_v20 = vmul.f32 %v6591_v10, %v6591_v10 }
 0x6d9   :  { %v6595_v5 = vrot.slane %v6594_v25, 4 }
 0x6da   :  { %v6603_v61 = vsel %vm6593_vm9, %v6602_v20, 0.0 }
 0x6db   :  { %v6596_v41 = vadd.f32 %v6595_v5, %v6594_v25  ;;  %v6604_v55 = vrot.slane %v6603_v61, 4 }
 0x6dd   :  { %v6597_v58 = vrot.slane %v6596_v41, 2  ;;  %v6605_v52 = vadd.f32 %v6604_v55, %v6603_v61 }
 0x6df   :  { %v6598_v38 = vadd.f32 %v6597_v58, %v6596_v41  ;;  %v6606_v18 = vrot.slane %v6605_v52, 2 }
 0x6e1   :  { %v6599_v27 = vrot.slane %v6598_v38, 1  ;;  %v6607_v30 = vadd.f32 %v6606_v18, %v6605_v52 }
 0x6e3   :  { %v6600_v4 = vadd.f32 %v6599_v27, %v6598_v38  ;;  %v6608_v12 = vrot.slane %v6607_v30, 1 }
 0x6e5   :  { %v6601_v32 = vmul.f32 %v6600_v4, %v6523_v21  ;;  %v6609_v0 = vadd.f32 %v6608_v12, %v6607_v30 }
 0x6e7   :  { %v6610_v2 = vmul.f32 %v6609_v0, %v6523_v21  ;;  %v6611_v63 = vmul.f32 %v6601_v32, %v6601_v32  ;;  %v6614_v36 = vsub.f32 %v6591_v10, %v6601_v32 }
 0x6e9   :  { %v6612_v56 = vsub.f32 %v6610_v2, %v6611_v63 }
 0x6eb   :  { %v6613_v13 = vmax.f32 %v6612_v56, 0.0 }
 0x6ed   :  { %v6615_v57 = vadd.f32 1e-05, %v6613_v13 }
 0x6ef   :  { %6655 = vrsqrt.f32 %v6615_v57  ;;  %vm6622_vm11 = vweird.f32 %v6615_v57 }
 0x6f5   :  { %v6656_v59 = vpop.eup %6655 }
 0x6f6   :  { %v6617_v42 = vmul.f32 %v6656_v59, %v6615_v57  ;;  %vm6623_vm10 = vweird.f32 %v6656_v59 }
 0x6f7   :  { %vm6624_vm12 = vmor %vm6622_vm11, %vm6623_vm10 }
 0x6f8   :  { %v6618_v11 = vmul.f32 %v6656_v59, %v6617_v42 }
 0x6fa   :  { %v6619_v1 = vmul.f32 0.5, %v6618_v11 }
 0x6fc   :  { %v6620_v48 = vsub.f32 1.5, %v6619_v1 }
 0x6fe   :  { %v6621_v34 = vmul.f32 %v6656_v59, %v6620_v48 }
 0x700   :  { %v6625_v39 = vsel %vm6624_vm12, %v6656_v59, %v6621_v34 }
 0x701   :  { %v6626_v47 = vmul.f32 %v6625_v39, %v6614_v36 }
 0x703   :  { %v6628_v21 = vmul.f32 %v6627_v17, %v6626_v47 }
 0x705   :  { %v6630_v16 = vadd.f32 %v6629_v24, %v6628_v21 }
 0x707   :  { %6631 = vst.msk [vmem:[%s10245_s13] sm:$0xff] %vm6593_vm9, %v6630_v16 }

</bundles_post_ra>
